<compile_context>
chip_gen: v6e
topology: v6e:2x2x1
jax: 0.10.0
libtpu: 0.0.40
codegen_flags: <defaults>
</compile_context>

<pallas_src>
import jax
import jax.numpy as jnp
from jax.experimental import pallas as pl
from jax.experimental.pallas import tpu as pltpu


_LANE = 128                 # samples packed per output row (one vreg lane dim)
_MAX_GROUPS_PER_TILE = 128  # 128 groups * 128 rows = 16384 rows/step (~720 KiB HBM)


def _linear_kernel(x_ref, w_ref, b_ref, o_ref):
    # x_ref: (TBG, 128*Din) f32 VMEM -- 128 samples per row, fully lane-dense.
    # w_ref: (128*Din, 128) f32 VMEM -- block-diagonal weight, resident across steps.
    # b_ref: (1, 1)         f32 SMEM -- scalar bias.
    # o_ref: (TBG, 128)     f32 VMEM -- lane-dense output slab (128 samples/row).
    y = jnp.dot(
        x_ref[...], w_ref[...],
        preferred_element_type=jnp.float32,
        precision=jax.lax.Precision.HIGHEST,   # f32-accurate MXU passes
    )
    o_ref[...] = y + b_ref[0, 0]


def _pick_groups_per_tile(n_groups):
    """Rows-per-tile = 128 * groups.  Balance >=~0.5 MB/step vs >=~8 grid steps."""
    if n_groups < 64:
        # Tiny batch: one block covering the whole (possibly non-multiple-of-8)
        # array; block_shape == full dim is always legal.
        return n_groups
    tbg = min(_MAX_GROUPS_PER_TILE, n_groups // 8)   # keep >= ~8 grid steps
    return max(8, (tbg // 8) * 8)                    # sublane-aligned


def _simple_net_forward_pallas(x, weight, bias):
    """Pallas path: (B, 10) f32 -> (B, 1) f32, equal to x @ weight.T + bias."""
    x = x.astype(jnp.float32)
    B, Din = x.shape
    Dout = weight.shape[0]
    assert Dout == 1, "SimpleNet has a single output feature"

    # Pack 128 samples per row.  When B % 128 == 0 the reshape is metadata-only;
    # otherwise pad with zero rows (one extra copy of x -- prefer aligned B).
    pad = (-B) % _LANE
    if pad:
        x = jnp.pad(x, ((0, pad), (0, 0)))
    n_groups = (B + pad) // _LANE
    x2 = x.reshape(n_groups, _LANE * Din)            # (B/128, 1280) lane-dense

    # Block-diagonal weight: w_bd[j*Din + d, l] = w[d] if l == j else 0, so that
    # (x2 @ w_bd)[g, l] = sum_d x[g*128 + l, d] * w[d]  -- the dense output slab
    # falls straight out of the MXU, no column relayout, no masked stores.
    w_row = weight.reshape(-1).astype(jnp.float32)                      # (Din,)
    eye = jnp.eye(_LANE, dtype=jnp.float32)                             # (128, 128)
    w_bd = (eye[:, None, :] * w_row[None, :, None]).reshape(_LANE * Din, _LANE)

    b2 = bias.reshape(1, 1).astype(jnp.float32)      # scalar bias for SMEM

    tbg = _pick_groups_per_tile(n_groups)
    grid = (pl.cdiv(n_groups, tbg),)

    out2 = pl.pallas_call(
        _linear_kernel,
        out_shape=jax.ShapeDtypeStruct((n_groups, _LANE), jnp.float32),
        grid=grid,
        in_specs=[
            # x: streamed in (tbg, 1280) lane-dense tiles.
            pl.BlockSpec((tbg, _LANE * Din), lambda i: (i, 0)),
            # block-diagonal weight: small, resident across all grid steps.
            pl.BlockSpec((_LANE * Din, _LANE), lambda i: (0, 0)),
            # bias: whole (1, 1) array in scalar memory.
            pl.BlockSpec(memory_space=pltpu.MemorySpace.SMEM),
        ],
        # Output slab is lane-dense: unmasked vst, unpadded VMEM buffer,
        # dense writeback DMA.
        out_specs=pl.BlockSpec((tbg, _LANE), lambda i: (i, 0)),
        compiler_params=pltpu.CompilerParams(
            # Independent batch tiles -> v7x's two TensorCores split the grid;
            # harmless on v5e/v6e (1 TC/chip).
            dimension_semantics=("parallel",)
        ),
        cost_estimate=pl.CostEstimate(
            flops=2 * n_groups * _LANE * _LANE * Din,          # MXU work actually issued
            bytes_accessed=4 * (n_groups * _LANE * Din          # x
                                + _LANE * Din * _LANE           # w_bd
                                + n_groups * _LANE),            # out
            transcendentals=0,
        ),
    )(x2, w_bd, b2)

    # Undo the packing: (n_groups, 128) -> (n_groups*128, 1) -> drop pad rows.
    return out2.reshape(n_groups * _LANE, 1)[:B]


def simple_net_forward(x, weight, bias, *, min_rows_for_kernel=16384,
                       force_kernel=False):
    """SimpleNet.forward: nn.Linear(10, 1).

    Args:
      x:      (B, 10) float32
      weight: (1, 10) float32  (torch nn.Linear layout: (out, in))
      bias:   (1,)    float32
    Returns:
      (B, 1) float32 == x @ weight.T + bias
    """
    B = x.shape[0]
    if not force_kernel and B < min_rows_for_kernel:
        # At small B this op is dominated by kernel launch / pipeline-ramp
        # overhead; plain XLA fusion wins.  The Pallas path pays off once HBM
        # streaming of x dominates (tens of thousands of rows and up).
        return x @ weight.T + bias
    return _simple_net_forward_pallas(x, weight, bias)


if __name__ == "__main__":
    key = jax.random.PRNGKey(0)
    kx, kw, kb = jax.random.split(key, 3)

    Din, Dout = 10, 1
    # Deterministic init mimicking nn.Linear's uniform(-1/sqrt(in), 1/sqrt(in)).
    bound = 1.0 / jnp.sqrt(jnp.float32(Din))
    weight = jax.random.uniform(kw, (Dout, Din), jnp.float32, -bound, bound)
    bias = jax.random.uniform(kb, (Dout,), jnp.float32, -bound, bound)

    def ref(xv):
        return xv @ weight.T + bias

    # 1) Small batch -> XLA fallback path (kernel not worth the launch cost).
    x_small = jax.random.normal(kx, (8, Din), dtype=jnp.float32)
    out_small = jax.block_until_ready(simple_net_forward(x_small, weight, bias))
    assert out_small.shape == (8, Dout)
    assert jnp.allclose(out_small, ref(x_small), atol=1e-5, rtol=1e-5)

    # 2) Kernel path: large, 128-aligned batch with a partial last tile
    #    (258 groups -> tbg=32 -> 9 grid steps, last step covers 2 groups).
    B1 = 258 * _LANE  # 33024 rows
    x1 = jax.random.normal(kx, (B1, Din), dtype=jnp.float32)
    out1 = jax.block_until_ready(simple_net_forward(x1, weight, bias))
    assert out1.shape == (B1, Dout)
    assert jnp.allclose(out1, ref(x1), atol=2e-5, rtol=2e-5)

    # 3) Kernel path forced at a small, non-128-aligned batch (exercises the
    #    zero-pad + single-block path).
    B2 = 1000
    x2 = jax.random.normal(kx, (B2, Din), dtype=jnp.float32)
    out2 = jax.block_until_ready(
        simple_net_forward(x2, weight, bias, force_kernel=True))
    assert out2.shape == (B2, Dout)
    assert jnp.allclose(out2, ref(x2), atol=2e-5, rtol=2e-5)

    print("KERNEL_OK")
</pallas_src>

<mosaic_0001>
module attributes {stable_mosaic.version = 11 : i64} {
  func.func @_linear_kernel(%arg0: i32, %arg1: memref<32x1280xf32, #tpu.memory_space<vmem>>, %arg2: memref<1280x128xf32, #tpu.memory_space<vmem>>, %arg3: memref<1x1xf32, #tpu.memory_space<smem>>, %arg4: memref<32x128xf32, #tpu.memory_space<vmem>>) attributes {dimension_semantics = [#tpu.dimension_semantics<parallel>], iteration_bounds = array<i64: 9>, scalar_prefetch = 0 : i64, scratch_operands = 0 : i64, tpu.core_type = #tpu.core_type<tc>, window_params = [{transform_indices = @transform_0, window_bounds = array<i64: 32, 1280>}, {pipeline_mode = #tpu.pipeline_mode<synchronous>, transform_indices = @transform_1, window_bounds = array<i64: 1280, 128>}, {transform_indices = @transform_2, window_bounds = array<i64: 1, 1>}, {transform_indices = @transform_3, window_bounds = array<i64: 32, 128>}]} {
    %c0 = arith.constant 0 : index
    %c0_0 = arith.constant 0 : index
    %0 = vector.load %arg1[%c0, %c0_0] : memref<32x1280xf32, #tpu.memory_space<vmem>>, vector<32x1280xf32>
    %c0_1 = arith.constant 0 : index
    %c0_2 = arith.constant 0 : index
    %1 = vector.load %arg2[%c0_1, %c0_2] : memref<1280x128xf32, #tpu.memory_space<vmem>>, vector<1280x128xf32>
    %cst = arith.constant dense<0.000000e+00> : vector<32x128xf32>
    %2 = tpu.matmul %0, %1, %cst {dimension_numbers = #tpu.dot_dimension_numbers<[1], [0], [0], [1], [0, 0, 1, 1], [], []>, precision = #tpu.contract_precision<fp32>} : vector<32x1280xf32>, vector<1280x128xf32>, vector<32x128xf32> -> vector<32x128xf32>
    %c0_3 = arith.constant 0 : index
    %c0_4 = arith.constant 0 : index
    %3 = memref.load %arg3[%c0_3, %c0_4] : memref<1x1xf32, #tpu.memory_space<smem>>
    %4 = vector.broadcast %3 : f32 to vector<32x128xf32>
    %5 = arith.addf %2, %4 : vector<32x128xf32>
    %c0_5 = arith.constant 0 : index
    %c0_6 = arith.constant 0 : index
    %6 = vector.load %arg4[%c0_5, %c0_6] : memref<32x128xf32, #tpu.memory_space<vmem>>, vector<32x128xf32>
    tpu.vector_store %arg4[%c0_5, %c0_6], %5 {strides = array<i32>} : memref<32x128xf32, #tpu.memory_space<vmem>>, vector<32x128xf32>,
    return
  }
  func.func @transform_0(%arg0: i32) -> (i32, i32) {
    %c0_i32 = arith.constant 0 : i32
    %c0_i32_0 = arith.constant 0 : i32
    return %arg0, %c0_i32 : i32, i32
  }
  func.func @transform_1(%arg0: i32) -> (i32, i32) {
    %c0_i32 = arith.constant 0 : i32
    %c0_i32_0 = arith.constant 0 : i32
    %c0_i32_1 = arith.constant 0 : i32
    return %c0_i32, %c0_i32_0 : i32, i32
  }
  func.func @transform_2(%arg0: i32) -> (i32, i32) {
    %c0_i32 = arith.constant 0 : i32
    %c0_i32_0 = arith.constant 0 : i32
    %c0_i32_1 = arith.constant 0 : i32
    return %c0_i32, %c0_i32_0 : i32, i32
  }
  func.func @transform_3(%arg0: i32) -> (i32, i32) {
    %c0_i32 = arith.constant 0 : i32
    %c0_i32_0 = arith.constant 0 : i32
    return %arg0, %c0_i32 : i32, i32
  }
}

</mosaic_0001>

<bundles_post_ra>
// kernel: tpu_custom_call.1
= control target key start
LH: loop header
LB: loop body
LE: loop exit
PB: predicated region body
PF: predicated region fallthrough
CT: control target
= control target key end

     0   :  { %s11406_s0 = inlined_call_operand.hbm [shape: f32[258,1280], index: 0, kind: input, shape index: {}]   ;;  %s11407_s1 = inlined_call_operand.hbm [shape: f32[1280,128], index: 1, kind: input, shape index: {}]   ;;  %s11408_s2 = inlined_call_operand.<no memory space> [shape: f32[1,1], index: 2, kind: input, shape index: {}]   ;;  %s11409_s3 = inlined_call_operand.hbm [shape: f32[258,128], index: 3, kind: output, shape index: {}]  }
   0x1   :  { %8 = sst [smem:[#allocation2]] %s11408_s2 }
   0x2   :  { %9 = vsyncpa [#allocation4], 0 }
   0x3   :  { %11 = vsyncpa [#allocation4 + $0x1], 0 }
   0x4   :  { %12 = vsyncpa [#allocation7], 0 }
   0x5   :  { %13 = vsyncpa [#allocation5], 0 }
   0x6   :  { %15 = vsyncpa [#allocation5 + $0x1], 0  ;;  %s7240_s14 = smov 0   ;;  %s7242_s15 = smov 0  }
   0x7   :  { %s7244_s16 = smov 0   ;;  %s7246_s17 = smov 0  }
   0x8 LB: > { %s7261_s2 = sadd.s32 4294967295, %s7206_s17   ;;  %s5683_s18 = sadd.s32 4294967294, %s7206_s17   ;;  %s7206_s17 = sphi %s7246_s17, %s12973_s17   ;;  %s7202_s16 = sphi %s7244_s16, %s12972_s16   ;;  %s7198_s15 = sphi %s7242_s15, %s12971_s15   ;;  %s7194_s14 = sphi %s7240_s14, %s12970_s14  }
   0x9   : > { %s7265_s19 = sadd.s32 1, %s7206_s17   ;;  %s28_s20 = sadd.s32 1, %s7202_s16 }
   0xa   : > { %s25_s21 = ssub.s32 %s7206_s17, %s7265_s19  ;;  %p35_p0 = scmp.ne.s32.totalorder %s7202_s16, %s7198_s15 }
   0xb   : > { %p26_p1 = scmp.eq.s32.totalorder %s25_s21, 0  ;;  %p36_p2 = scmp.eq.s32.totalorder %s7206_s17, 0 }
   0xc   : > { %p41_p3 = scmp.ne.s32.totalorder %s7198_s15, %s7194_s14  ;;  %p42_p4 = scmp.eq.s32.totalorder %s7261_s2, 0 }
   0xd   : > { %s7277_s22 = scalar_select %p26_p1, %s7202_s16, %s28_s20  }
   0xe   : > { %p7279_p5 = por %p36_p2, %p35_p0  ;;  %p7285_p6 = por %p42_p4, %p41_p3 }
   0xf   : > { %p107_p7 = scmp.eq.s32.totalorder %s7261_s2, 8  ;;  %p113_p8 = scmp.eq.s32.totalorder %s5683_s18, 8 }
  0x10   : > { %s11968_s24 = scalar_select %p7285_p6, 1, 0 }
  0x11   : > { %p5684_p9 = scmp.ge.s32.totalorder %s7206_s17, 1  ;;  %p120_p10 = scmp.lt.s32.totalorder %s7206_s17, 10 }
  0x12   : > { %p7292_p11 = por %p107_p7, %p35_p0  ;;  %p7296_p12 = por %p113_p8, %p41_p3 }
  0x13   : > { %p7300_p13 = pnand %p5684_p9, %p120_p10  ;;  %s7208_s28 = smov [#allocation6]  }
  0x14   : > { %s11969_s25 = scalar_select %p7292_p11, 1, 0 }
  0x15   : > { %s11970_s26 = scalar_select %p7296_p12, 1, 0 }
  0x16   : > { %p7036_p1 = pneg %p7300_p13  ;;  %s132_s29 = sshll.u32 %s7208_s28, 4  ;;  %s133_s29 = int_to_ptr.vmem [resolvable:$true] %s132_s29 }
  0x17   : > { %s7097_s30 = scalar_lea.vmem %s133_s29, 20480  ;;  %p7105_p8 = scmp.lt.s32.totalorder %s133_s29, %s133_s29 }
  0x18   : > { %p7037_p2 = pnand %p7036_p1, %p42_p4  ;;  %p7098_p7 = scmp.ne.s32.totalorder %s133_s29, %s7097_s30 }
  0x19   : > { %p7106_p6 = scmp.lt.s32.totalorder %s7097_s30, %s7097_s30 }
  0x1a   : > { %p7088_p0 = pneg %p7037_p2 }
  0x1b   : > { %p7107_p12 = por %p7106_p6, %p7105_p8 }
  0x1c   : > { %p7100_p11 = pnand %p7098_p7, %p7088_p0 }
  0x1e   : > { %p7101_p3 = pneg %p7100_p11 }
  0x20   : > { %p7108_p9 = pnand %p7107_p12, %p7101_p3 }
  0x22   : > { %7111 = shalt.err (!%p7108_p9)
}
  0x23   : > { %s7209_s4 = smov 128   ;;  %s7210_s5 = smov 8  }
  0x24   : > { %7039 = dma.hbm_to_vmem [thread:$0]  (!%p7037_p2), %s11407_s1, 20480, %s133_s29, [#allocation7], %s7209_s4, %s7209_s4, %s7210_s5  }
  0x25   : > { %p5686_p10 = scmp.ge.s32.totalorder %s7206_s17, 9 }
  0x27   : > { %145 = sbr.rel (%p5686_p10) target bundleno = 78 (0x4e), region = 24 }
  0x2c   : > { %148 = sbr.rel (!%p7279_p5) target bundleno = 78 (0x4e), region = 28  ;;  %s149_s8 = sand.u32 (%p7279_p5), 1, %s7202_s16  }
  0x2d   : > { %s5687_s9 = sshll.u32 (%p7279_p5), %s7206_s17, 2  ;;  %s7027_s10 = smul.u32 (%p7279_p5), 320, %s149_s8 }
  0x2e   : > { %s155_s11 = ssub.s32 (%p7279_p5), 33, %s5687_s9  ;;  %s7319_s18 = scalar_lea.sflag (%p7279_p5), [#allocation4], %s149_s8 }
  0x2f   : > { %p156_p6 = scmp.lt.s32.totalorder (%p7279_p5), %s155_s11, 4  ;;  %s153_s20 = scalar_lea.vmem (%p7279_p5), [#allocation3], %s7027_s10 }
  0x31   : > { %s12975_s11 = smov (!%p156_p6, %s155_s11), 4 }
  0x32   : > { %s7316_s12 = smul.u32 1280, %s12975_s11 }
  0x34   : > { %s161_s13 = ssub.s32 5120, %s7316_s12 }
  0x35   : > { %162 = vsyncadd %s7319_s18, %s161_s13  ;;  %p5690_p5 = scmp.ne.s32.totalorder %s7316_s12, 0  ;;  %s7028_s21 = smul.u32 5120, %s7206_s17 }
  0x36   : > { %s168_s23 = sshll.u32 %s153_s20, 4  ;;  %s7116_s7 = scalar_lea.hbm %s11406_s0, 42240  ;;  %s7329_s23 = int_to_ptr.vmem [resolvable:$true] %s168_s23 }
  0x37   : > { %s7327_s30 = scalar_lea.hbm %s11406_s0, %s7028_s21 }
  0x38   : > { %s7112_s4 = scalar_lea.hbm %s7327_s30, %s7316_s12  ;;  %p7117_p2 = scmp.lt.s32.totalorder %s7327_s30, %s11406_s0 }
  0x39   : > { %p7113_p11 = scmp.ne.s32.totalorder %s7327_s30, %s7112_s4  ;;  %p7118_p0 = scmp.lt.s32.totalorder %s7116_s7, %s7112_s4 }
  0x3b   : > { %p7114_p12 = pnand %p7113_p11, %p5690_p5  ;;  %p7119_p7 = por %p7118_p0, %p7117_p2 }
  0x3d   : > { %p7115_p1 = pneg %p7114_p12 }
  0x3f   : > { %p7120_p3 = pnand %p7119_p7, %p7115_p1 }
  0x41   : > { %7123 = shalt.err (!%p7120_p3)
}
  0x42   : > { %s7124_s10 = scalar_lea.vmem %s7329_s23, %s7316_s12  ;;  %s7211_s11 = smov [#allocation3]  }
  0x43   : > { %p7125_p8 = scmp.ne.s32.totalorder %s7329_s23, %s7124_s10  ;;  %s7128_s13 = sshll.u32 %s7211_s11, 4  ;;  %s7129_s13 = int_to_ptr.vmem [resolvable:$false] %s7128_s13 }
  0x44   : > { %s7130_s20 = scalar_lea.vmem %s7129_s13, 10240  ;;  %p7131_p6 = scmp.lt.s32.totalorder %s7329_s23, %s7129_s13 }
  0x45   : > { %p7126_p9 = pnand %p7125_p8, %p5690_p5  ;;  %p7132_p11 = scmp.lt.s32.totalorder %s7130_s20, %s7124_s10 }
  0x47   : > { %p7127_p10 = pneg %p7126_p9  ;;  %p7133_p12 = por %p7132_p11, %p7131_p6 }
  0x49   : > { %p7134_p2 = pnand %p7133_p12, %p7127_p10 }
  0x4b   : > { %7137 = shalt.err (!%p7134_p2)
}
  0x4c   : > { %s7212_s21 = smov 1280   ;;  %s7213_s28 = smov 80  }
  0x4d   : > { %174 = dma.hbm_to_vmem [thread:$0]  (%p5690_p5), %s7327_s30, %s7316_s12, %s7329_s23, %s7319_s18, %s7212_s21, %s7212_s21, %s7213_s28  }
  0x4e PF: > { %180 = sbr.rel (%p7300_p13) target bundleno = 943 (0x3af), region = 32 }
  0x53   : > { %s7358_s29 = sand.u32 1, %s7198_s15   ;;  %p11972_p1 = scmp.ne.s32.totalorder %s11968_s24, 0 }
  0x54   : > { %s7029_s4 = smul.u32 320, %s7358_s29  ;;  %s183_s5 = scalar_lea.sflag [#allocation4], %s7358_s29 }
  0x56   : > { %s7362_s6 = scalar_lea.vmem [#allocation3], %s7029_s4 }
  0x57   : > { %7181 = dma.done.wait (%p11972_p1), %s183_s5, 5120  }
  0x58   : > { %7183 = vsyncadd (%p11972_p1), %s183_s5, 4294962176 }
  0x59   : > { %7185 = dma.done.wait (%p42_p4), [#allocation7], 20480  }
  0x5a   : > { %7187 = vsyncadd (%p42_p4), [#allocation7], 4294946816  ;;  %v295_v0 = vld [vmem:[#allocation6 + $0xf8] sm:$0xff]  ;;  %v294_v2 = vld [vmem:[#allocation6 + $0xf0] sm:$0xff]  ;;  %s8768_s24 = sld [smem:[#allocation2]]  ;;  %s5696_s27 = sshll.u32 %s7358_s29, 5 }
  0x5b   : > { %v279_v1 = vld [vmem:[#allocation6 + $0x78] sm:$0xff]  ;;  %v7372_v3 = vand.u32 4294901760, %v295_v0  ;;  %v7376_v5 = vand.u32 4294901760, %v294_v2  ;;  %v278_v6 = vld [vmem:[#allocation6 + $0x70] sm:$0xff]  ;;  %v293_v7 = vld [vmem:[#allocation6 + $0xe8] sm:$0xff]  ;;  %s11338_s12 = scalar_lea.vmem [#allocation8], %s5696_s27 }
  0x5c   : > { %v7374_v4 = vand.u32 4294901760, %v279_v1  ;;  %v277_v8 = vld [vmem:[#allocation6 + $0x68] sm:$0xff]  ;;  %v7378_v9 = vand.u32 4294901760, %v278_v6  ;;  %v7380_v10 = vand.u32 4294901760, %v293_v7  ;;  %v292_v12 = vld [vmem:[#allocation6 + $0xe0] sm:$0xff]  ;;  %v291_v14 = vld [vmem:[#allocation6 + $0xd8] sm:$0xff] }
  0x5d   : > { %v7382_v11 = vand.u32 4294901760, %v277_v8  ;;  %v276_v13 = vld [vmem:[#allocation6 + $0x60] sm:$0xff]  ;;  %5707 = vmatprep.subr.mxu0 %v7372_v3  ;;  %v7385_v15 = vand.u32 4294901760, %v292_v12  ;;  %v7389_v17 = vand.u32 4294901760, %v291_v14  ;;  %v7392_v18 = vsub.f32 %v295_v0, %v7372_v3  ;;  %v7394_v19 = vld [vmem:[#allocation6 + $0x58] sm:$0xff]  ;;  %v7396_v20 = vld [vmem:[#allocation6 + $0xd0] sm:$0xff] }
  0x5e   : > { %v7387_v16 = vand.u32 4294901760, %v276_v13  ;;  %v7398_v21 = vld [vmem:[#allocation6 + $0x50] sm:$0xff]  ;;  %5708 = vmatpush3.msra.mxu0 %v7374_v4  ;;  %v7402_v22 = vand.u32 4294901760, %v7394_v19  ;;  %v7405_v23 = vsub.f32 %v279_v1, %v7374_v4  ;;  %v7408_v24 = vand.u32 4294901760, %v7396_v20  ;;  %v7413_v26 = vld [vmem:[#allocation6 + $0xc8] sm:$0xff]  ;;  %v7417_v28 = vld [vmem:[#allocation6 + $0xc0] sm:$0xff] }
  0x5f   : > { %11973 = vst [vmem:[#allocation12_spill] sm:$0xff] %v7382_v11  ;;  %11975 = vst [vmem:[#allocation14_spill] sm:$0xff] %v7392_v18  ;;  %v7411_v25 = vsub.f32 %v294_v2, %v7376_v5  ;;  %v7415_v27 = vld [vmem:[#allocation6 + $0x48] sm:$0xff]  ;;  %5709 = vmatprep.subr.mxu0 %v7376_v5  ;;  %v11424_v29 = vand.u32 4294901760, %v7392_v18  ;;  %v7422_v30 = vand.u32 4294901760, %v7398_v21  ;;  %v7425_v31 = vsub.f32 %v278_v6, %v7378_v9  ;;  %v7439_v37 = vld [vmem:[#allocation6 + $0x40] sm:$0xff] }
  0x60   : > { %11974 = vst [vmem:[#allocation13_spill] sm:$0xff] %v7387_v16  ;;  %11976 = vst [vmem:[#allocation15_spill] sm:$0xff] %v7402_v22  ;;  %v7428_v32 = vand.u32 4294901760, %v7413_v26  ;;  %5710 = vmatpush3.msra.mxu0 %v7378_v9  ;;  %v11422_v33 = vand.u32 4294901760, %v7405_v23  ;;  %v7434_v35 = vsub.f32 %v293_v7, %v7380_v10  ;;  %v7437_v36 = vand.u32 4294901760, %v7415_v27  ;;  %v7463_v46 = vld [vmem:[#allocation6 + $0xb8] sm:$0xff] }
  0x61   : > { %11977 = vst [vmem:[#allocation16_spill] sm:$0xff] %v7408_v24  ;;  %11978 = vst [vmem:[#allocation17_spill] sm:$0xff] %v7422_v30  ;;  %v11421_v34 = vand.u32 4294901760, %v7411_v25  ;;  %5711 = vmatprep.subr.mxu0 %v7380_v10  ;;  %v699_v38 = vsub.f32 %v7392_v18, %v11424_v29  ;;  %v11419_v39 = vand.u32 4294901760, %v7425_v31  ;;  %v7447_v40 = vsub.f32 %v277_v8, %v7382_v11  ;;  %v7473_v51 = vld [vmem:[#allocation6 + $0x38] sm:$0xff]  ;;  %v7480_v56 = vld [vmem:[#allocation6 + $0xb0] sm:$0xff] }
  0x62   : > { %11979 = vst [vmem:[#allocation18_spill] sm:$0xff] %v7428_v32  ;;  %11980 = vst [vmem:[#allocation19_spill] sm:$0xff] %v7437_v36  ;;  %v7450_v41 = vand.u32 4294901760, %v7417_v28  ;;  %5712 = vmatpush3.msra.mxu0 %v7382_v11  ;;  %v587_v42 = vsub.f32 %v7405_v23, %v11422_v33  ;;  %v11417_v44 = vand.u32 4294901760, %v7434_v35  ;;  %v7461_v45 = vsub.f32 %v292_v12, %v7385_v15  ;;  %v7492_v61 = vld [vmem:[#allocation6 + $0x30] sm:$0xff]  ;;  %v7504_v2 = vld [vmem:[#allocation6 + $0xa8] sm:$0xff] }
  0x63   : > { %v706_v43 = vsub.f32 %v7411_v25, %v11421_v34  ;;  %5713 = vmatprep.subr.mxu0 %v7385_v15  ;;  %v700_v47 = vand.u32 4294901760, %v699_v38  ;;  %v594_v48 = vsub.f32 %v7425_v31, %v11419_v39  ;;  %v11416_v49 = vand.u32 4294901760, %v7447_v40  ;;  %v7595_v39 = vld [vmem:[#allocation6 + $0x90] sm:$0xff]  ;;  %s5581_s18 = scalar_lea.sflag [#allocation5], %s7358_s29  ;;  %p12968_p4 = scmp.ne.s32.totalorder %s11969_s25, 0 }
  0x64   : > { %11981 = vst [vmem:[#allocation20_spill] sm:$0xff] %v7450_v41  ;;  %v7471_v50 = vand.u32 4294901760, %v7439_v37  ;;  %5714 = vmatpush3.msra.mxu0 %v7387_v16  ;;  %v588_v52 = vand.u32 4294901760, %v587_v42  ;;  %v713_v54 = vsub.f32 %v7434_v35, %v11417_v44  ;;  %v11414_v55 = vand.u32 4294901760, %v7461_v45  ;;  %v7605_v34 = vld [vmem:[#allocation6 + $0x10] sm:$0xff]  ;;  %s5698_s23 = sshll.u32 (%p12968_p4), %s7261_s2, 2 }
  0x65   : > { %v707_v53 = vand.u32 4294901760, %v706_v43  ;;  %5715 = vmatprep.subr.mxu0 %v7389_v17  ;;  %5751 = vmatprep.subr.mxu1 %v700_v47  ;;  %v595_v57 = vand.u32 4294901760, %v594_v48  ;;  %v601_v58 = vsub.f32 %v7447_v40, %v11416_v49  ;;  %v7487_v59 = vsub.f32 %v276_v13, %v7387_v16  ;;  %v7515_v13 = vld [vmem:[#allocation6 + $0x28] sm:$0xff]  ;;  %v7582_v49 = vld [vmem:[#allocation6 + $0x18] sm:$0xff]  ;;  %s5589_s30 = ssub.s32 (%p12968_p4), 33, %s5698_s23 }
  0x66   : > { %11982 = vst [vmem:[#allocation21_spill] sm:$0xff] %v7471_v50  ;;  %v7490_v60 = vand.u32 4294901760, %v7463_v46  ;;  %5716 = vmatpush3.msra.mxu0 %v7402_v22  ;;  %5752 = vmatpush3.msra.mxu1 %v588_v52  ;;  %v714_v62 = vand.u32 4294901760, %v713_v54  ;;  %v720_v63 = vsub.f32 %v7461_v45, %v11414_v55  ;;  %v7499_v0 = vsub.f32 %v291_v14, %v7389_v17  ;;  %p5590_p13 = scmp.lt.s32.totalorder (%p12968_p4), %s5589_s30, 4 }
  0x67   : > { %v7502_v1 = vand.u32 4294901760, %v7473_v51  ;;  %5717 = vmatprep.subr.mxu0 %v7408_v24  ;;  %5753 = vmatprep.subr.mxu1 %v707_v53  ;;  %v602_v6 = vand.u32 4294901760, %v601_v58  ;;  %v11412_v7 = vand.u32 4294901760, %v7487_v59  ;;  %v7510_v8 = vsub.f32 %v7394_v19, %v7402_v22 }
  0x68   : > { %11983 = vst [vmem:[#allocation22_spill] sm:$0xff] %v7490_v60  ;;  %v7513_v12 = vand.u32 4294901760, %v7480_v56  ;;  %5718 = vmatpush3.msra.mxu0 %v7422_v30  ;;  %5754 = vmatpush3.msra.mxu1 %v595_v57  ;;  %v721_v14 = vand.u32 4294901760, %v720_v63  ;;  %v11411_v38 = vand.u32 4294901760, %v7499_v0  ;;  %v7521_v42 = vsub.f32 %v7396_v20, %v7408_v24  ;;  %v7538_v20 = vld [vmem:[#allocation6 + $0xa0] sm:$0xff] }
  0x69   : > { %11984 = vst [vmem:[#allocation23_spill] sm:$0xff] %v7502_v1  ;;  %v7524_v43 = vand.u32 4294901760, %v7492_v61  ;;  %5719 = vmatprep.subr.mxu0 %v7428_v32  ;;  %5755 = vmatprep.subr.mxu1 %v714_v62  ;;  %v608_v19 = vsub.f32 %v7487_v59, %v11412_v7  ;;  %v11413_v47 = vand.u32 4294901760, %v7510_v8  ;;  %v7533_v48 = vsub.f32 %v7398_v21, %v7422_v30 }
  0x6a   : > { %11985 = vst [vmem:[#allocation24_spill] sm:$0xff] %v7513_v12  ;;  %v7536_v52 = vand.u32 4294901760, %v7504_v2  ;;  %5720 = vmatpush3.msra.mxu0 %v7437_v36  ;;  %5756 = vmatpush3.msra.mxu1 %v602_v6  ;;  %v727_v53 = vsub.f32 %v7499_v0, %v11411_v38  ;;  %v11415_v54 = vand.u32 4294901760, %v7521_v42  ;;  %v7547_v57 = vsub.f32 %v7413_v26, %v7428_v32  ;;  %v7561_v38 = vld [vmem:[#allocation6 + $0x20] sm:$0xff] }
  0x6b   : > { %11986 = vst [vmem:[#allocation25_spill] sm:$0xff] %v7524_v43  ;;  %v7550_v21 = vand.u32 4294901760, %v7515_v13  ;;  %5721 = vmatprep.subr.mxu0 %v7450_v41  ;;  %5757 = vmatprep.subr.mxu1 %v721_v14  ;;  %v609_v58 = vand.u32 4294901760, %v608_v19  ;;  %v615_v62 = vsub.f32 %v7510_v8, %v11413_v47  ;;  %v11418_v63 = vand.u32 4294901760, %v7533_v48  ;;  %v7571_v47 = vld [vmem:[#allocation6 + $0x98] sm:$0xff] }
  0x6c   : > { %11987 = vst [vmem:[#allocation26_spill] sm:$0xff] %v7536_v52  ;;  %11988 = vst [vmem:[#allocation27_spill] sm:$0xff] %v7547_v57  ;;  %v7559_v6 = vsub.f32 %v7415_v27, %v7437_v36  ;;  %5722 = vmatpush3.msra.mxu0 %v7471_v50  ;;  %v728_v26 = vand.u32 4294901760, %v727_v53  ;;  %v734_v14 = vsub.f32 %v7521_v42, %v11415_v54  ;;  %v11420_v19 = vand.u32 4294901760, %v7547_v57  ;;  %v225_v36 = vld [vmem:[%s7362_s6 + $0x8] sm:$0xff] }
  0x6d   : > { %11989 = vst [vmem:[#allocation28_spill] sm:$0xff] %v7550_v21  ;;  %v7569_v7 = vand.u32 4294901760, %v7538_v20  ;;  %5758 = vmatpush3.msra.mxu1 %v609_v58  ;;  %5723 = vmatprep.subr.mxu0 %v7490_v60  ;;  %v616_v27 = vand.u32 4294901760, %v615_v62  ;;  %v622_v55 = vsub.f32 %v7533_v48, %v11418_v63  ;;  %v7580_v54 = vsub.f32 %v7417_v28, %v7450_v41 }
  0x6e   : > { %v11423_v53 = vand.u32 4294901760, %v7559_v6  ;;  %5759 = vmatprep.subr.mxu1 %v728_v26  ;;  %5724 = vmatpush3.msra.mxu0 %v7502_v1  ;;  %v735_v44 = vand.u32 4294901760, %v734_v14  ;;  %v741_v58 = vsub.f32 %v7547_v57, %v11420_v19  ;;  %v7589_v62 = vand.u32 4294901760, %v7561_v38 }
  0x6f   : > { %11990 = vst [vmem:[#allocation29_spill] sm:$0xff] %v7569_v7  ;;  %11991 = vst [vmem:[#allocation30_spill] sm:$0xff] %v7580_v54  ;;  %v7593_v63 = vsub.f32 %v7439_v37, %v7471_v50  ;;  %5760 = vmatpush3.msra.mxu1 %v616_v27  ;;  %5725 = vmatprep.subr.mxu0 %v7513_v12  ;;  %v623_v28 = vand.u32 4294901760, %v622_v55  ;;  %v11427_v14 = vand.u32 4294901760, %v7580_v54  ;;  %v7603_v19 = vand.u32 4294901760, %v7571_v47 }
  0x70   : > { %v629_v26 = vsub.f32 %v7559_v6, %v11423_v53  ;;  %5761 = vmatprep.subr.mxu1 %v735_v44  ;;  %5726 = vmatpush3.msra.mxu0 %v7524_v43  ;;  %v742_v37 = vand.u32 4294901760, %v741_v58  ;;  %v7611_v55 = vsub.f32 %v7463_v46, %v7490_v60  ;;  %v7614_v33 = vand.u32 4294901760, %v7582_v49  ;;  %v7616_v53 = vld [vmem:[#allocation6 + $0x88] sm:$0xff] }
  0x71   : > { %11992 = vst [vmem:[#allocation31_spill] sm:$0xff] %v7603_v19  ;;  %v11430_v27 = vand.u32 4294901760, %v7593_v63  ;;  %5762 = vmatpush3.msra.mxu1 %v623_v28  ;;  %5727 = vmatprep.subr.mxu0 %v7536_v52  ;;  %v748_v44 = vsub.f32 %v7580_v54, %v11427_v14  ;;  %v7624_v58 = vsub.f32 %v7473_v51, %v7502_v1  ;;  %v7627_v46 = vand.u32 4294901760, %v7595_v39  ;;  %v7641_v51 = vld [vmem:[#allocation6 + $0x8] sm:$0xff] }
  0x72   : > { %11993 = vst [vmem:[#allocation32_spill] sm:$0xff] %v7611_v55  ;;  %11994 = vst [vmem:[#allocation33_spill] sm:$0xff] %v7614_v33  ;;  %v630_v29 = vand.u32 4294901760, %v629_v26  ;;  %5763 = vmatprep.subr.mxu1 %v742_v37  ;;  %5728 = vmatpush3.msra.mxu0 %v7550_v21  ;;  %v7636_v60 = vsub.f32 %v7480_v56, %v7513_v12  ;;  %v7639_v14 = vand.u32 4294901760, %v7605_v34  ;;  %v7650_v26 = vand.u32 4294901760, %v7616_v53  ;;  %v7652_v56 = vld [vmem:[#allocation6 + $0x80] sm:$0xff] }
  0x73   : > { %11995 = vst [vmem:[#allocation34_spill] sm:$0xff] %v7627_v46  ;;  %v636_v28 = vsub.f32 %v7593_v63, %v11430_v27  ;;  %5729 = vmatprep.subr.mxu0 %v7569_v7  ;;  %v749_v37 = vand.u32 4294901760, %v748_v44  ;;  %v7647_v27 = vsub.f32 %v7492_v61, %v7524_v43  ;;  %v11999_v50 = vand.u32 4294901760, %v7611_v55  ;;  %v7675_v44 = vld [vmem:[#allocation6] sm:$0xff] }
  0x74   : > { %11996 = vst [vmem:[#allocation35_spill] sm:$0xff] %v7636_v60  ;;  %11997 = vst [vmem:[#allocation36_spill] sm:$0xff] %v7639_v14  ;;  %5764 = vmatpush3.msra.mxu1 %v630_v29  ;;  %5730 = vmatpush3.msra.mxu0 %v7589_v62  ;;  %v7661_v1 = vsub.f32 %v7504_v2, %v7536_v52  ;;  %v12001_v61 = vand.u32 4294901760, %v7624_v58  ;;  %v7669_v41 = vand.u32 4294901760, %v7641_v51  ;;  %v7683_v52 = vand.u32 4294901760, %v7652_v56 }
  0x75   : > { %11998 = vst [vmem:[#allocation37_spill] sm:$0xff] %v7650_v26  ;;  %v637_v12 = vand.u32 4294901760, %v636_v28  ;;  %v755_v29 = vsub.f32 %v7611_v55, %v11999_v50  ;;  %5765 = vmatprep.subr.mxu1 %v749_v37  ;;  %5731 = vmatprep.subr.mxu0 %v7603_v19  ;;  %v7673_v50 = vsub.f32 %v7515_v13, %v7550_v21  ;;  %v12002_v37 = vand.u32 4294901760, %v7636_v60 }
  0x76   : > { %12000 = vst [vmem:[#allocation38_spill] sm:$0xff] %v7661_v1  ;;  %v643_v43 = vsub.f32 %v7624_v58, %v12001_v61  ;;  %5732 = vmatpush3.msra.mxu0 %v7614_v33  ;;  %v12003_v13 = vand.u32 4294901760, %v7647_v27  ;;  %v7693_v21 = vsub.f32 %v7538_v20, %v7569_v7  ;;  %v12005_v30 = vand.u32 4294901760, %v7661_v1 }
  0x77   : > { %5766 = vmatpush3.msra.mxu1 %v637_v12  ;;  %v756_v2 = vand.u32 4294901760, %v755_v29  ;;  %v762_v61 = vsub.f32 %v7636_v60, %v12002_v37  ;;  %5733 = vmatprep.subr.mxu0 %v7627_v46  ;;  %v224_v37 = vld [vmem:[%s7362_s6] sm:$0xff]  ;;  %v7701_v24 = vand.u32 4294901760, %v7675_v44  ;;  %v12006_v20 = vand.u32 4294901760, %v7673_v50 }
  0x78   : > { %v644_v32 = vand.u32 4294901760, %v643_v43  ;;  %v650_v12 = vsub.f32 %v7647_v27, %v12003_v13  ;;  %12004 = vst [vmem:[#allocation39_spill] sm:$0xff] %v7693_v21  ;;  %5734 = vmatpush3.msra.mxu0 %v7639_v14  ;;  %v769_v43 = vsub.f32 %v7661_v1, %v12005_v30  ;;  %v7705_v13 = vsub.f32 %v7561_v38, %v7589_v62 }
  0x79   : > { %5767 = vmatprep.subr.mxu1 %v756_v2  ;;  %v763_v28 = vand.u32 4294901760, %v762_v61  ;;  %5735 = vmatprep.subr.mxu0 %v7650_v26  ;;  %v657_v2 = vsub.f32 %v7673_v50, %v12006_v20  ;;  %v11455_v61 = vand.u32 4294901760, %v7693_v21  ;;  %v7712_v7 = vand.u32 4294901760, %v225_v36 }
  0x7a   : > { %5768 = vmatpush3.msra.mxu1 %v644_v32  ;;  %v651_v29 = vand.u32 4294901760, %v650_v12  ;;  %v770_v30 = vand.u32 4294901760, %v769_v43  ;;  %5736 = vmatpush3.msra.mxu0 %v7669_v41  ;;  %v11456_v1 = vand.u32 4294901760, %v7705_v13  ;;  %v7718_v32 = vsub.f32 %v7571_v47, %v7603_v19 }
  0x7b   : > { %12007 = vst [vmem:[#allocation40_spill] sm:$0xff] %v7712_v7  ;;  %5769 = vmatprep.subr.mxu1 %v763_v28  ;;  %v7720_v38 = vand.u32 4294901760, %v224_v37  ;;  %v658_v12 = vand.u32 4294901760, %v657_v2  ;;  %5737 = vmatprep.subr.mxu0 %v7683_v52  ;;  %v776_v20 = vsub.f32 %v7693_v21, %v11455_v61  ;;  %v7727_v28 = vsub.f32 %v225_v36, %v7712_v7 }
  0x7c   : > { %5770 = vmatpush3.msra.mxu1 %v651_v29  ;;  %v7731_v43 = vsub.f32 %v7582_v49, %v7614_v33  ;;  %5738 = vmatpush3.msra.mxu0 %v7701_v24  ;;  %v664_v47 = vsub.f32 %v7705_v13, %v11456_v1  ;;  %v7743_v36 = vsub.f32 %v7595_v39, %v7627_v46 }
  0x7d   : > { %12008 = vst [vmem:[#allocation41_spill] sm:$0xff] %v7720_v38  ;;  %5771 = vmatprep.subr.mxu1 %v770_v30  ;;  %v7739_v2 = vsub.f32 %v224_v37, %v7720_v38  ;;  %v777_v61 = vand.u32 4294901760, %v776_v20  ;;  %v11461_v49 = vand.u32 4294901760, %v7727_v28  ;;  %5795 = vmatprep.subr.mxu0 %v7392_v18  ;;  %v7750_v1 = vsub.f32 %v7605_v34, %v7639_v14 }
  0x7e   : > { %5772 = vmatpush3.msra.mxu1 %v658_v12  ;;  %v11462_v30 = vand.u32 4294901760, %v7731_v43  ;;  %v665_v29 = vand.u32 4294901760, %v664_v47  ;;  %v12009_v37 = vand.u32 4294901760, %v7718_v32  ;;  %808 = vmatprep.mubr.f32.mxu1 %v7712_v7  ;;  %v12010_v7 = vand.u32 4294901760, %v7743_v36  ;;  %v235_v47 = vld [vmem:[%s7362_s6 + $0x58] sm:$0xff] }
  0x7f   : > { %v11469_v39 = vand.u32 4294901760, %v7739_v2  ;;  %5773 = vmatprep.subr.mxu1 %v777_v61  ;;  %v525_v20 = vsub.f32 %v7727_v28, %v11461_v49 }
  0x80   : > { %v783_v33 = vsub.f32 %v7718_v32, %v12009_v37  ;;  %v671_v34 = vsub.f32 %v7731_v43, %v11462_v30  ;;  %v7767_v37 = vsub.f32 %v7616_v53, %v7650_v26  ;;  %5774 = vmatpush3.msra.mxu1 %v665_v29  ;;  %v790_v49 = vsub.f32 %v7743_v36, %v12010_v7 }
  0x81   : > { %v531_v61 = vsub.f32 %v7739_v2, %v11469_v39  ;;  %v7777_v30 = vsub.f32 %v7641_v51, %v7669_v41  ;;  %v526_v14 = vand.u32 4294901760, %v525_v20  ;;  %v12011_v53 = vand.u32 4294901760, %v7750_v1  ;;  %v234_v51 = vld [vmem:[%s7362_s6 + $0x50] sm:$0xff] }
  0x82   : > { %v784_v12 = vand.u32 4294901760, %v783_v33  ;;  %v672_v46 = vand.u32 4294901760, %v671_v34  ;;  %v11474_v33 = vand.u32 4294901760, %v7767_v37  ;;  %v791_v39 = vand.u32 4294901760, %v790_v49 }
  0x83   : > { %v678_v29 = vsub.f32 %v7750_v1, %v12011_v53  ;;  %v532_v26 = vand.u32 4294901760, %v531_v61  ;;  %v11471_v18 = vand.u32 4294901760, %v7777_v30  ;;  %v7787_v7 = vsub.f32 %v7652_v56, %v7683_v52  ;;  %527 = vmatprep.mubr.f32.mxu0 %v526_v14 }
  0x84   : > { %5775 = vmatprep.subr.mxu1 %v784_v12  ;;  %v797_v34 = vsub.f32 %v7767_v37, %v11474_v33  ;;  %v7795_v12 = vsub.f32 %v7675_v44, %v7701_v24  ;;  %v7797_v49 = vand.u32 4294901760, %v235_v47  ;;  %v7805_v53 = vand.u32 4294901760, %v234_v51  ;;  %v245_v44 = vld [vmem:[%s7362_s6 + $0xa8] sm:$0xff] }
  0x85   : > { %5776 = vmatpush3.msra.mxu1 %v672_v46  ;;  %v679_v20 = vand.u32 4294901760, %v678_v29  ;;  %533 = vmatmul.mubr.f32.vlgmr.msra.gmra.mxu0 %v532_v26  ;;  %v685_v56 = vsub.f32 %v7777_v30, %v11471_v18  ;;  %v11472_v14 = vand.u32 4294901760, %v7787_v7  ;;  %v7821_v18 = vand.u32 4294901760, %v245_v44 }
  0x86   : > { %12012 = vst [vmem:[#allocation42_spill] sm:$0xff] %v7795_v12  ;;  %12013 = vst [vmem:[#allocation43_spill] sm:$0xff] %v7797_v49  ;;  %5777 = vmatprep.subr.mxu1 %v791_v39  ;;  %5796 = vmatpush3.msra.mxu0 %v7405_v23  ;;  %v798_v46 = vand.u32 4294901760, %v797_v34  ;;  %v11473_v61 = vand.u32 4294901760, %v7795_v12  ;;  %v244_v34 = vld [vmem:[%s7362_s6 + $0xa0] sm:$0xff] }
  0x87   : > { %5778 = vmatpush3.msra.mxu1 %v679_v20  ;;  %12014 = vst [vmem:[#allocation44_spill] sm:$0xff] %v7805_v53  ;;  %5797 = vmatprep.subr.mxu0 %v7411_v25  ;;  %v686_v26 = vand.u32 4294901760, %v685_v56  ;;  %v804_v39 = vsub.f32 %v7787_v7, %v11472_v14  ;;  %v7817_v20 = vsub.f32 %v235_v47, %v7797_v49  ;;  %12015 = vst [vmem:[#allocation45_spill] sm:$0xff] %v7821_v18 }
  0x88   : > { %5798 = vmatpush3.msra.mxu0 %v7425_v31  ;;  %5779 = vmatprep.subr.mxu1 %v798_v46  ;;  %v692_v29 = vsub.f32 %v7795_v12, %v11473_v61  ;;  %v7825_v46 = vsub.f32 %v234_v51, %v7805_v53  ;;  %v7828_v61 = vand.u32 4294901760, %v244_v34 }
  0x89   : > { %5799 = vmatprep.subr.mxu0 %v7434_v35  ;;  %5780 = vmatpush3.msra.mxu1 %v686_v26  ;;  %v805_v56 = vand.u32 4294901760, %v804_v39  ;;  %v11477_v47 = vand.u32 4294901760, %v7817_v20  ;;  %v255_v26 = vld [vmem:[%s7362_s6 + $0xf8] sm:$0xff]  ;;  %v7836_v39 = vsub.f32 %v245_v44, %v7821_v18 }
  0x8a   : > { %5800 = vmatpush3.msra.mxu0 %v7447_v40  ;;  %v693_v14 = vand.u32 4294901760, %v692_v29  ;;  %12016 = vst [vmem:[#allocation46_spill] sm:$0xff] %v7828_v61  ;;  %v254_v29 = vld [vmem:[%s7362_s6 + $0xf0] sm:$0xff] }
  0x8b   : > { %5781 = vmatprep.subr.mxu1 %v805_v56  ;;  %5801 = vmatprep.subr.mxu0 %v7461_v45  ;;  %v7847_v56 = vand.u32 4294901760, %v255_v26  ;;  %v540_v44 = vsub.f32 %v7817_v20, %v11477_v47  ;;  %v7857_v51 = vand.u32 4294901760, %v254_v29 }
  0x8c   : > { %5782 = vmatpush3.msra.mxu1 %v693_v14  ;;  %5802 = vmatpush3.msra.mxu0 %v7487_v59  ;;  %v7845_v14 = vsub.f32 %v244_v34, %v7828_v61  ;;  %v12017_v34 = vand.u32 4294901760, %v7825_v46 }
  0x8d   : > { %810 = vmatmul.mubr.f32.vlgmr.msra.gmra.mxu1 %v7720_v38  ;;  %5803 = vmatprep.subr.mxu0 %v7499_v0  ;;  %v541_v33 = vand.u32 4294901760, %v540_v44 }
  0x8e   : > { %5839 = vmatprep.subr.mxu1 %v7372_v3  ;;  %5804 = vmatpush3.msra.mxu0 %v7510_v8  ;;  %v546_v38 = vsub.f32 %v7825_v46, %v12017_v34  ;;  %v11485_v47 = vand.u32 4294901760, %v7845_v14  ;;  %v12018_v34 = vand.u32 4294901760, %v7836_v39 }
  0x8f   : > { %5840 = vmatpush3.msra.mxu1 %v7374_v4  ;;  %5805 = vmatprep.subr.mxu0 %v7521_v42 }
  0x90   : > { %5841 = vmatprep.subr.mxu1 %v7376_v5  ;;  %5806 = vmatpush3.msra.mxu0 %v7533_v48  ;;  %v561_v44 = vsub.f32 %v7845_v14, %v11485_v47 }
  0x91   : > { %5842 = vmatpush3.msra.mxu1 %v7378_v9  ;;  %5807 = vmatprep.subr.mxu0 %v7547_v57  ;;  %v7868_v57 = vsub.f32 %v255_v26, %v7847_v56  ;;  %v547_v26 = vand.u32 4294901760, %v546_v38 }
  0x92   : > { %5843 = vmatprep.subr.mxu1 %v7380_v10  ;;  %5808 = vmatpush3.msra.mxu0 %v7559_v6  ;;  %v562_v47 = vand.u32 4294901760, %v561_v44 }
  0x93   : > { %5844 = vmatpush3.msra.mxu1 %v7382_v11  ;;  %5809 = vmatprep.subr.mxu0 %v7580_v54  ;;  %v555_v11 = vsub.f32 %v7836_v39, %v12018_v34  ;;  %v7878_v54 = vsub.f32 %v254_v29, %v7857_v51  ;;  %v12020_v29 = vld [vmem:[#allocation17_spill] sm:$0xff] }
  0x94   : > { %5845 = vmatprep.subr.mxu1 %v7385_v15  ;;  %5810 = vmatpush3.msra.mxu0 %v7593_v63 }
  0x95   : > { %5846 = vmatpush3.msra.mxu1 %v7387_v16  ;;  %5811 = vmatprep.subr.mxu0 %v7611_v55  ;;  %v11486_v55 = vand.u32 4294901760, %v7868_v57  ;;  %v12019_v16 = vld [vmem:[#allocation16_spill] sm:$0xff]  ;;  %v556_v34 = vand.u32 4294901760, %v555_v11  ;;  %v11488_v38 = vand.u32 4294901760, %v7878_v54 }
  0x96   : > { %5847 = vmatprep.subr.mxu1 %v7389_v17  ;;  %5812 = vmatpush3.msra.mxu0 %v7624_v58 }
  0x97   : > { %5848 = vmatpush3.msra.mxu1 %v7402_v22  ;;  %5813 = vmatprep.subr.mxu0 %v7636_v60  ;;  %v12021_v22 = vld [vmem:[#allocation38_spill] sm:$0xff]  ;;  %v576_v11 = vsub.f32 %v7878_v54, %v11488_v38  ;;  %v12028_v38 = vld [vmem:[#allocation24_spill] sm:$0xff] }
  0x98   : > { %5849 = vmatprep.subr.mxu1 %v12019_v16  ;;  %542 = vmatprep.mubr.f32.mxu0 %v541_v33  ;;  %v12022_v60 = vld [vmem:[#allocation18_spill] sm:$0xff]  ;;  %v570_v16 = vsub.f32 %v7868_v57, %v11486_v55  ;;  %v12023_v33 = vld [vmem:[#allocation19_spill] sm:$0xff] }
  0x99   : > { %5814 = vmatpush3.msra.mxu0 %v7647_v27  ;;  %5850 = vmatpush3.msra.mxu1 %v12020_v29  ;;  %v12024_v29 = vld [vmem:[#allocation20_spill] sm:$0xff]  ;;  %v12026_v55 = vld [vmem:[#allocation22_spill] sm:$0xff] }
  0x9a   : > { %548 = vmatmul.mubr.f32.gmra.mxu0 %v547_v26  ;;  %5815 = vmatprep.subr.mxu0 %v12021_v22  ;;  %v12025_v26 = vld [vmem:[#allocation21_spill] sm:$0xff]  ;;  %v571_v44 = vand.u32 4294901760, %v570_v16  ;;  %v12030_v16 = vld [vmem:[#allocation26_spill] sm:$0xff] }
  0x9b   : > { %5851 = vmatprep.subr.mxu1 %v12022_v60  ;;  %5816 = vmatpush3.msra.mxu0 %v7673_v50 }
  0x9c   : > { %5852 = vmatpush3.msra.mxu1 %v12023_v33  ;;  %5817 = vmatprep.subr.mxu0 %v7693_v21  ;;  %v12027_v21 = vld [vmem:[#allocation23_spill] sm:$0xff] }
  0x9d   : > { %5853 = vmatprep.subr.mxu1 %v12024_v29  ;;  %557 = vmatprep.mubr.f32.mxu0 %v556_v34  ;;  %v577_v34 = vand.u32 4294901760, %v576_v11  ;;  %v12032_v11 = vld [vmem:[#allocation29_spill] sm:$0xff] }
  0x9e   : > { %5818 = vmatpush3.msra.mxu0 %v7705_v13  ;;  %5854 = vmatpush3.msra.mxu1 %v12025_v26 }
  0x9f   : > { %563 = vmatmul.mubr.f32.gmra.mxu0 %v562_v47  ;;  %5819 = vmatprep.subr.mxu0 %v7718_v32  ;;  %v12029_v47 = vld [vmem:[#allocation25_spill] sm:$0xff] }
  0xa0   : > { %5855 = vmatprep.subr.mxu1 %v12026_v55  ;;  %5820 = vmatpush3.msra.mxu0 %v7731_v43 }
  0xa1   : > { %5856 = vmatpush3.msra.mxu1 %v12027_v21  ;;  %815 = vmatprep.mubr.f32.mxu1 %v7797_v49  ;;  %v12031_v49 = vld [vmem:[#allocation28_spill] sm:$0xff] }
  0xa2   : > { %5821 = vmatprep.subr.mxu0 %v7743_v36  ;;  %5857 = vmatprep.subr.mxu1 %v12028_v38 }
  0xa3   : > { %572 = vmatprep.mubr.f32.mxu0 %v571_v44  ;;  %817 = vmatmul.mubr.f32.gmra.mxu1 %v7805_v53  ;;  %v12033_v44 = vld [vmem:[#allocation14_spill] sm:$0xff]  ;;  %v12036_v53 = vand.u32 4294901760, %v7405_v23  ;;  %v12041_v23 = vld [vmem:[#allocation37_spill] sm:$0xff] }
  0xa4   : > { %5822 = vmatpush3.msra.mxu0 %v7750_v1  ;;  %5858 = vmatpush3.msra.mxu1 %v12029_v47 }
  0xa5   : > { %578 = vmatmul.mubr.f32.gmra.mxu0 %v577_v34  ;;  %5823 = vmatprep.subr.mxu0 %v7767_v37  ;;  %v12034_v34 = vand.u32 4294901760, %v12033_v44  ;;  %v12040_v44 = vand.u32 4294901760, %v7425_v31  ;;  %v12045_v31 = vand.u32 4294901760, %v7727_v28 }
  0xa6   : > { %5859 = vmatprep.subr.mxu1 %v12030_v16  ;;  %5824 = vmatpush3.msra.mxu0 %v7777_v30 }
  0xa7   : > { %5860 = vmatpush3.msra.mxu1 %v12031_v49  ;;  %822 = vmatprep.mubr.f32.mxu1 %v7821_v18  ;;  %v12035_v18 = vld [vmem:[#allocation33_spill] sm:$0xff] }
  0xa8   : > { %5825 = vmatprep.subr.mxu0 %v7787_v7  ;;  %5861 = vmatprep.subr.mxu1 %v12032_v11 }
  0xa9   : > { %824 = vmatmul.mubr.f32.gmra.mxu1 %v7828_v61  ;;  %5826 = vmatpush3.msra.mxu0 %v7795_v12  ;;  %v12037_v61 = vld [vmem:[#allocation34_spill] sm:$0xff]  ;;  %v12038_v12 = vand.u32 4294901760, %v7411_v25  ;;  %v12043_v25 = vand.u32 4294901760, %v7447_v40  ;;  %v12048_v40 = vand.u32 4294901760, %v7499_v0  ;;  %v12052_v0 = vand.u32 4294901760, %v7533_v48 }
  0xaa   : > { %966 = vmatprep.mubr.f32.mxu0 %v7727_v28  ;;  %5862 = vmatpush3.msra.mxu1 %v7589_v62  ;;  %v12050_v28 = vand.u32 4294901760, %v7521_v42  ;;  %v12057_v42 = vld [vmem:[#allocation12_spill] sm:$0xff] }
  0xab   : > { %969 = vmatmul.mubr.f32.vlgmr.msra.gmra.mxu0 %v7739_v2  ;;  %5863 = vmatprep.subr.mxu1 %v7603_v19  ;;  %v12039_v19 = vld [vmem:[#allocation36_spill] sm:$0xff] }
  0xac   : > { %5883 = vmatprep.subr.mxu0 %v12034_v34  ;;  %5864 = vmatpush3.msra.mxu1 %v12035_v18  ;;  %v12047_v34 = vand.u32 4294901760, %v7739_v2  ;;  %v12058_v2 = vld [vmem:[#allocation30_spill] sm:$0xff] }
  0xad   : > { %5884 = vmatpush3.msra.mxu0 %v12036_v53  ;;  %829 = vmatprep.mubr.f32.mxu1 %v7847_v56  ;;  %v12042_v53 = vand.u32 4294901760, %v7434_v35  ;;  %v12046_v35 = vand.u32 4294901760, %v7487_v59  ;;  %v12051_v59 = vand.u32 4294901760, %v7817_v20  ;;  %v12059_v48 = vand.u32 4294901760, %v12058_v2 }
  0xae   : > { %5865 = vmatprep.subr.mxu1 %v12037_v61  ;;  %5885 = vmatprep.subr.mxu0 %v12038_v12  ;;  %v12044_v12 = vand.u32 4294901760, %v7461_v45  ;;  %v12049_v45 = vand.u32 4294901760, %v7510_v8  ;;  %v12087_v2 = vand.u32 4294901760, %v7750_v1 }
  0xaf   : > { %831 = vmatmul.mubr.f32.gmra.mxu1 %v7857_v51  ;;  %975 = vmatprep.mubr.f32.mxu0 %v7817_v20  ;;  %v12061_v20 = vand.u32 4294901760, %v7593_v63  ;;  %v327_v63 = vld [vmem:[#allocation6 + $0x1f8] sm:$0xff] }
  0xb0   : > { %5866 = vmatpush3.msra.mxu1 %v12039_v19  ;;  %5886 = vmatpush3.msra.mxu0 %v12040_v44 }
  0xb1   : > { %978 = vmatmul.mubr.f32.gmra.mxu0 %v7825_v46  ;;  %5867 = vmatprep.subr.mxu1 %v12041_v23 }
  0xb2   : > { %5887 = vmatprep.subr.mxu0 %v12042_v53  ;;  %5868 = vmatpush3.msra.mxu1 %v7669_v41  ;;  %v12066_v53 = vand.u32 4294901760, %v7624_v58  ;;  %v12075_v58 = vand.u32 4294901760, %v12021_v22  ;;  %v12079_v22 = vand.u32 4294901760, %v7705_v13  ;;  %v12083_v13 = vand.u32 4294901760, %v7731_v43 }
  0xb3   : > { %5888 = vmatpush3.msra.mxu0 %v12043_v25  ;;  %5869 = vmatprep.subr.mxu1 %v7683_v52 }
  0xb4   : > { %5889 = vmatprep.subr.mxu0 %v12044_v12  ;;  %984 = vmatprep.mubr.f32.mxu0 %v7836_v39  ;;  %v311_v12 = vld [vmem:[#allocation6 + $0x178] sm:$0xff] }
  0xb5   : > { %5870 = vmatpush3.msra.mxu1 %v7701_v24  ;;  %1100 = vmatprep.mubr.f32.mxu1 %v12045_v31  ;;  %v12070_v31 = vld [vmem:[#allocation16_spill] sm:$0xff] }
  0xb6   : > { %5890 = vmatpush3.msra.mxu0 %v12046_v35  ;;  %1104 = vmatmul.mubr.f32.vlgmr.msra.gmra.mxu1 %v12047_v34  ;;  %v12072_v35 = vand.u32 4294901760, %v7647_v27  ;;  %v12073_v34 = vld [vmem:[#allocation17_spill] sm:$0xff]  ;;  %v12077_v27 = vld [vmem:[#allocation39_spill] sm:$0xff] }
  0xb7   : > { %987 = vmatmul.mubr.f32.gmra.mxu0 %v7845_v14  ;;  %5891 = vmatprep.subr.mxu0 %v12048_v40  ;;  %v8014_v40 = vand.u32 4294901760, %v327_v63 }
  0xb8   : > { %5927 = vmatprep.subr.mxu1 %v7372_v3  ;;  %5892 = vmatpush3.msra.mxu0 %v12049_v45  ;;  %v12053_v3 = vand.u32 4294901760, %v7825_v46  ;;  %v12062_v46 = vld [vmem:[#allocation13_spill] sm:$0xff]  ;;  %v8016_v45 = vand.u32 4294901760, %v311_v12 }
  0xb9   : > { %5928 = vmatpush3.msra.mxu1 %v7374_v4  ;;  %5893 = vmatprep.subr.mxu0 %v12050_v28  ;;  %v12054_v4 = vld [vmem:[#allocation27_spill] sm:$0xff]  ;;  %v326_v28 = vld [vmem:[#allocation6 + $0x1f0] sm:$0xff] }
  0xba   : > { %5929 = vmatprep.subr.mxu1 %v7376_v5  ;;  %993 = vmatprep.mubr.f32.mxu0 %v7868_v57  ;;  %v12055_v8 = vand.u32 4294901760, %v12054_v4  ;;  %v12056_v5 = vand.u32 4294901760, %v7559_v6  ;;  %v12064_v6 = vld [vmem:[#allocation32_spill] sm:$0xff]  ;;  %v8027_v4 = vand.u32 4294901760, %v326_v28 }
  0xbb   : > { %1111 = vmatprep.mubr.f32.mxu1 %v12051_v59  ;;  %5894 = vmatpush3.msra.mxu0 %v12052_v0  ;;  %v12065_v44 = vand.u32 4294901760, %v12064_v6  ;;  %v310_v59 = vld [vmem:[#allocation6 + $0x170] sm:$0xff]  ;;  %v12078_v0 = vand.u32 4294901760, %v12077_v27 }
  0xbc   : > { %5930 = vmatpush3.msra.mxu1 %v7378_v9  ;;  %996 = vmatmul.mubr.f32.gmra.mxu0 %v7878_v54  ;;  %v12060_v9 = vand.u32 4294901760, %v7836_v39  ;;  %v12068_v39 = vld [vmem:[#allocation35_spill] sm:$0xff]  ;;  %12080 = vst [vmem:[#allocation38_spill] sm:$0xff] %v8027_v4 }
  0xbd   : > { %1115 = vmatmul.mubr.f32.gmra.mxu1 %v12053_v3  ;;  %5895 = vmatprep.subr.mxu0 %v12055_v8  ;;  %v12069_v25 = vand.u32 4294901760, %v12068_v39  ;;  %v309_v3 = vld [vmem:[#allocation6 + $0x168] sm:$0xff]  ;;  %v8029_v8 = vand.u32 4294901760, %v310_v59 }
  0xbe   : > { %5931 = vmatprep.subr.mxu1 %v7380_v10  ;;  %5896 = vmatpush3.msra.mxu0 %v12056_v5  ;;  %v12063_v10 = vand.u32 4294901760, %v7845_v14  ;;  %v12071_v14 = vand.u32 4294901760, %v7868_v57  ;;  %v12076_v57 = vand.u32 4294901760, %v7673_v50  ;;  %v8035_v50 = vsub.f32 %v311_v12, %v8016_v45 }
  0xbf   : > { %5932 = vmatpush3.msra.mxu1 %v12057_v42  ;;  %5897 = vmatprep.subr.mxu0 %v12059_v48  ;;  %12081 = vst [vmem:[#allocation18_spill] sm:$0xff] %v8029_v8  ;;  %v8038_v5 = vsub.f32 %v327_v63, %v8014_v40  ;;  %v8045_v42 = vand.u32 4294901760, %v309_v3  ;;  %v323_v48 = vld [vmem:[#allocation6 + $0x1d8] sm:$0xff] }
  0xc0   : > { %5933 = vmatprep.subr.mxu1 %v7385_v15  ;;  %1122 = vmatprep.mubr.f32.mxu1 %v12060_v9  ;;  %v12067_v15 = vld [vmem:[#allocation15_spill] sm:$0xff] }
  0xc1   : > { %5898 = vmatpush3.msra.mxu0 %v12061_v20  ;;  %5934 = vmatpush3.msra.mxu1 %v12062_v46  ;;  %12085 = vst [vmem:[#allocation20_spill] sm:$0xff] %v8045_v42  ;;  %v307_v9 = vld [vmem:[#allocation6 + $0x158] sm:$0xff]  ;;  %v8059_v20 = vsub.f32 %v326_v28, %v8027_v4  ;;  %v11505_v1 = vand.u32 4294901760, %v8038_v5  ;;  %v306_v46 = vld [vmem:[#allocation6 + $0x150] sm:$0xff]  ;;  %v8072_v6 = vsub.f32 %v309_v3, %v8045_v42 }
  0xc2   : > { %1126 = vmatmul.mubr.f32.gmra.mxu1 %v12063_v10  ;;  %5899 = vmatprep.subr.mxu0 %v12065_v44  ;;  %v12091_v10 = vand.u32 4294901760, %v7777_v30  ;;  %v322_v44 = vld [vmem:[#allocation6 + $0x1d0] sm:$0xff]  ;;  %v8091_v12 = vand.u32 4294901760, %v306_v46 }
  0xc3   : > { %5935 = vmatprep.subr.mxu1 %v7389_v17  ;;  %5900 = vmatpush3.msra.mxu0 %v12066_v53  ;;  %v12074_v17 = vand.u32 4294901760, %v7878_v54  ;;  %v325_v54 = vld [vmem:[#allocation6 + $0x1e8] sm:$0xff]  ;;  %v8080_v53 = vand.u32 4294901760, %v323_v48  ;;  %v12095_v30 = vld [vmem:[#allocation42_spill] sm:$0xff]  ;;  %v11503_v63 = vand.u32 4294901760, %v8059_v20 }
  0xc4   : > { %5936 = vmatpush3.msra.mxu1 %v12067_v15  ;;  %5901 = vmatprep.subr.mxu0 %v12069_v25  ;;  %v8082_v15 = vand.u32 4294901760, %v307_v9  ;;  %v12096_v39 = vand.u32 4294901760, %v12095_v30  ;;  %12097 = vst [vmem:[#allocation25_spill] sm:$0xff] %v8091_v12 }
  0xc5   : > { %5937 = vmatprep.subr.mxu1 %v12070_v31  ;;  %1133 = vmatprep.mubr.f32.mxu1 %v12071_v14  ;;  %12093 = vst [vmem:[#allocation23_spill] sm:$0xff] %v8080_v53  ;;  %v12098_v31 = vld [vmem:[#allocation40_spill] sm:$0xff]  ;;  %v8132_v3 = vsub.f32 %v8059_v20, %v11503_v63  ;;  %v12114_v63 = vld [vmem:[#allocation45_spill] sm:$0xff] }
  0xc6   : > { %5902 = vmatpush3.msra.mxu0 %v12072_v35  ;;  %5938 = vmatpush3.msra.mxu1 %v12073_v34  ;;  %12094 = vst [vmem:[#allocation24_spill] sm:$0xff] %v8082_v15  ;;  %v8106_v35 = vand.u32 4294901760, %v322_v44 }
  0xc7   : > { %1137 = vmatmul.mubr.f32.gmra.mxu1 %v12074_v17  ;;  %5903 = vmatprep.subr.mxu0 %v12075_v58  ;;  %v12100_v17 = vld [vmem:[#allocation41_spill] sm:$0xff]  ;;  %v12101_v58 = vld [vmem:[#allocation31_spill] sm:$0xff] }
  0xc8   : > { %5939 = vmatprep.subr.mxu1 %v12022_v60  ;;  %5904 = vmatpush3.msra.mxu0 %v12076_v57  ;;  %v12082_v60 = vand.u32 4294901760, %v7718_v32  ;;  %v12086_v32 = vand.u32 4294901760, %v7743_v36  ;;  %12099 = vst [vmem:[#allocation26_spill] sm:$0xff] %v8106_v35  ;;  %v8120_v57 = vsub.f32 %v307_v9, %v8082_v15 }
  0xc9   : > { %5940 = vmatpush3.msra.mxu1 %v12023_v33  ;;  %5905 = vmatprep.subr.mxu0 %v12078_v0  ;;  %v308_v33 = vld [vmem:[#allocation6 + $0x160] sm:$0xff] }
  0xca   : > { %5941 = vmatprep.subr.mxu1 %v12024_v29  ;;  %5906 = vmatpush3.msra.mxu0 %v12079_v22  ;;  %v8043_v29 = vand.u32 4294901760, %v325_v54  ;;  %v8056_v43 = vand.u32 4294901760, %v308_v33  ;;  %v304_v0 = vld [vmem:[#allocation6 + $0x140] sm:$0xff] }
  0xcb   : > { %5942 = vmatpush3.msra.mxu1 %v12025_v26  ;;  %5907 = vmatprep.subr.mxu0 %v12082_v60  ;;  %v324_v26 = vld [vmem:[#allocation6 + $0x1e0] sm:$0xff] }
  0xcc   : > { %5943 = vmatprep.subr.mxu1 %v12026_v55  ;;  %5908 = vmatpush3.msra.mxu0 %v12083_v13  ;;  %12084 = vst [vmem:[#allocation19_spill] sm:$0xff] %v8043_v29  ;;  %v8054_v55 = vsub.f32 %v310_v59, %v8029_v8  ;;  %12088 = vst [vmem:[#allocation21_spill] sm:$0xff] %v8056_v43  ;;  %v8064_v36 = vand.u32 4294901760, %v324_v26  ;;  %v8088_v25 = vsub.f32 %v308_v33, %v8056_v43  ;;  %v320_v60 = vld [vmem:[#allocation6 + $0x1c0] sm:$0xff]  ;;  %v303_v13 = vld [vmem:[#allocation6 + $0x138] sm:$0xff] }
  0xcd   : > { %5944 = vmatpush3.msra.mxu1 %v12027_v21  ;;  %5909 = vmatprep.subr.mxu0 %v12086_v32  ;;  %v12089_v21 = vand.u32 4294901760, %v7767_v37  ;;  %v12092_v37 = vand.u32 4294901760, %v7787_v7  ;;  %v11499_v59 = vand.u32 4294901760, %v8072_v6 }
  0xce   : > { %5945 = vmatprep.subr.mxu1 %v12028_v38  ;;  %5910 = vmatpush3.msra.mxu0 %v12087_v2  ;;  %12090 = vst [vmem:[#allocation22_spill] sm:$0xff] %v8064_v36  ;;  %v11504_v38 = vand.u32 4294901760, %v8035_v50  ;;  %v11501_v7 = vand.u32 4294901760, %v8054_v55  ;;  %v8109_v34 = vsub.f32 %v324_v26, %v8064_v36  ;;  %v11502_v33 = vand.u32 4294901760, %v8088_v25 }
  0xcf   : > { %5946 = vmatpush3.msra.mxu1 %v12029_v47  ;;  %5911 = vmatprep.subr.mxu0 %v12089_v21  ;;  %v8075_v47 = vsub.f32 %v325_v54, %v8043_v29  ;;  %v8125_v54 = vsub.f32 %v323_v48, %v8080_v53  ;;  %v8149_v48 = vsub.f32 %v322_v44, %v8106_v35  ;;  %v319_v44 = vld [vmem:[#allocation6 + $0x1b8] sm:$0xff] }
  0xd0   : > { %5947 = vmatprep.subr.mxu1 %v12030_v16  ;;  %5912 = vmatpush3.msra.mxu0 %v12091_v10  ;;  %v305_v16 = vld [vmem:[#allocation6 + $0x148] sm:$0xff]  ;;  %v8104_v14 = vsub.f32 %v8035_v50, %v11504_v38  ;;  %v8140_v22 = vsub.f32 %v8054_v55, %v11501_v7  ;;  %v11506_v2 = vand.u32 4294901760, %v8109_v34  ;;  %v8166_v10 = vand.u32 4294901760, %v304_v0  ;;  %v302_v7 = vld [vmem:[#allocation6 + $0x130] sm:$0xff] }
  0xd1   : > { %5948 = vmatpush3.msra.mxu1 %v12031_v49  ;;  %5913 = vmatprep.subr.mxu0 %v12092_v37  ;;  %v321_v49 = vld [vmem:[#allocation6 + $0x1c8] sm:$0xff]  ;;  %v8114_v28 = vand.u32 4294901760, %v305_v16  ;;  %12106 = vst [vmem:[#allocation33_spill] sm:$0xff] %v8149_v48  ;;  %v12109_v37 = vld [vmem:[#allocation44_spill] sm:$0xff]  ;;  %v11507_v30 = vand.u32 4294901760, %v8125_v54 }
  0xd2   : > { %5949 = vmatprep.subr.mxu1 %v12032_v11  ;;  %5914 = vmatpush3.msra.mxu0 %v12096_v39  ;;  %v8099_v11 = vsub.f32 %v8038_v5, %v11505_v1  ;;  %v8122_v27 = vand.u32 4294901760, %v321_v49  ;;  %12108 = vst [vmem:[#allocation36_spill] sm:$0xff] %v8166_v10  ;;  %v8173_v39 = vand.u32 4294901760, %v303_v13  ;;  %v8204_v1 = vsub.f32 %v304_v0, %v8166_v10  ;;  %v301_v0 = vld [vmem:[#allocation6 + $0x128] sm:$0xff] }
  0xd3   : > { %1303 = vmatprep.mubr.f32.mxu0 %v12098_v31  ;;  %5950 = vmatpush3.msra.mxu1 %v7589_v62  ;;  %v11500_v62 = vand.u32 4294901760, %v8075_v47  ;;  %12102 = vst [vmem:[#allocation28_spill] sm:$0xff] %v8114_v28  ;;  %v8159_v21 = vsub.f32 %v305_v16, %v8114_v28  ;;  %v8214_v32 = vsub.f32 %v8125_v54, %v11507_v30  ;;  %v8233_v30 = vand.u32 4294901760, %v302_v7 }
  0xd4   : > { %1305 = vmatmul.mubr.f32.vlgmr.msra.gmra.mxu0 %v12100_v17  ;;  %5951 = vmatprep.subr.mxu1 %v12101_v58  ;;  %12103 = vst [vmem:[#allocation29_spill] sm:$0xff] %v8122_v27  ;;  %v1730_v26 = vand.u32 4294901760, %v8099_v11  ;;  %12111 = vst [vmem:[#allocation27_spill] sm:$0xff] %v8173_v39  ;;  %v8176_v16 = vsub.f32 %v321_v49, %v8122_v27  ;;  %v1737_v11 = vand.u32 4294901760, %v8132_v3  ;;  %v318_v3 = vld [vmem:[#allocation6 + $0x1b0] sm:$0xff]  ;;  %v12121_v58 = vand.u32 4294901760, %v8149_v48 }
  0xd5   : > { %5971 = vmatprep.subr.mxu0 %v8014_v40  ;;  %5952 = vmatpush3.msra.mxu1 %v12035_v18  ;;  %v8135_v18 = vsub.f32 %v306_v46, %v8091_v12  ;;  %v8156_v9 = vsub.f32 %v8075_v47, %v11500_v62  ;;  %12107 = vst [vmem:[#allocation34_spill] sm:$0xff] %v8159_v21  ;;  %12115 = vst [vmem:[#allocation13_spill] sm:$0xff] %v8204_v1  ;;  %v300_v62 = vld [vmem:[#allocation6 + $0x120] sm:$0xff] }
  0xd6   : > { %5972 = vmatpush3.msra.mxu0 %v8016_v45  ;;  %5953 = vmatprep.subr.mxu1 %v12037_v61  ;;  %v12105_v61 = vld [vmem:[#allocation43_spill] sm:$0xff]  ;;  %v8164_v46 = vsub.f32 %v8072_v6, %v11499_v59  ;;  %12112 = vst [vmem:[#allocation12_spill] sm:$0xff] %v8176_v16  ;;  %v11508_v59 = vand.u32 4294901760, %v8120_v57  ;;  %v8193_v49 = vsub.f32 %v8109_v34, %v11506_v2  ;;  %v8206_v2 = vld [vmem:[#allocation6 + $0x1a8] sm:$0xff]  ;;  %12119 = vst [vmem:[#allocation16_spill] sm:$0xff] %v8233_v30 }
  0xd7   : > { %12104 = vst [vmem:[#allocation14_spill] sm:$0xff] %v8135_v18  ;;  %5973 = vmatprep.subr.mxu0 %v8027_v4  ;;  %1310 = vmatprep.mubr.f32.mxu0 %v12105_v61  ;;  %v8217_v38 = vsub.f32 %v303_v13, %v8173_v39  ;;  %v8231_v13 = vand.u32 4294901760, %v318_v3  ;;  %v12136_v4 = vand.u32 4294901760, %v8156_v9 }
  0xd8   : > { %5954 = vmatpush3.msra.mxu1 %v12039_v19  ;;  %5974 = vmatpush3.msra.mxu0 %v8029_v8  ;;  %v8170_v19 = vand.u32 4294901760, %v320_v60  ;;  %v12128_v8 = vand.u32 4294901760, %v8104_v14  ;;  %v315_v14 = vld [vmem:[#allocation6 + $0x198] sm:$0xff]  ;;  %v12138_v9 = vand.u32 4294901760, %v8164_v46 }
  0xd9   : > { %1312 = vmatmul.mubr.f32.gmra.mxu0 %v12109_v37  ;;  %5955 = vmatprep.subr.mxu1 %v12041_v23  ;;  %v8185_v23 = vsub.f32 %v8088_v25, %v11502_v33  ;;  %12116 = vst [vmem:[#allocation32_spill] sm:$0xff] %v8217_v38  ;;  %12118 = vst [vmem:[#allocation35_spill] sm:$0xff] %v8231_v13 }
  0xda   : > { %12110 = vst [vmem:[#allocation37_spill] sm:$0xff] %v8170_v19  ;;  %5975 = vmatprep.subr.mxu0 %v8043_v29  ;;  %5956 = vmatpush3.msra.mxu1 %v7669_v41  ;;  %v8195_v41 = vand.u32 4294901760, %v319_v44  ;;  %v8221_v33 = vsub.f32 %v320_v60, %v8170_v19  ;;  %v1751_v60 = vand.u32 4294901760, %v8193_v49  ;;  %v12125_v49 = vand.u32 4294901760, %v8159_v21 }
  0xdb   : > { %5976 = vmatpush3.msra.mxu0 %v8045_v42  ;;  %5957 = vmatprep.subr.mxu1 %v7683_v52  ;;  %v12120_v52 = vld [vmem:[#allocation46_spill] sm:$0xff]  ;;  %v8259_v29 = vand.u32 4294901760, %v300_v62 }
  0xdc   : > { %12113 = vst [vmem:[#allocation30_spill] sm:$0xff] %v8195_v41  ;;  %5977 = vmatprep.subr.mxu0 %v8064_v36  ;;  %1317 = vmatprep.mubr.f32.mxu0 %v12114_v63  ;;  %12117 = vst [vmem:[#allocation15_spill] sm:$0xff] %v8221_v33  ;;  %v299_v36 = vld [vmem:[#allocation6 + $0x118] sm:$0xff]  ;;  %v8257_v42 = vsub.f32 %v8159_v21, %v12125_v49  ;;  %v12132_v49 = vand.u32 4294901760, %v8140_v22  ;;  %v12137_v22 = vand.u32 4294901760, %v8217_v38 }
  0xdd   : > { %5958 = vmatpush3.msra.mxu1 %v7701_v24  ;;  %1428 = vmatprep.mubr.f32.mxu1 %v12098_v31  ;;  %v8229_v31 = vsub.f32 %v8120_v57, %v11508_v59  ;;  %v12122_v24 = vand.u32 4294901760, %v8135_v18  ;;  %12126 = vst [vmem:[#allocation42_spill] sm:$0xff] %v8259_v29 }
  0xde   : > { %5978 = vmatpush3.msra.mxu0 %v8056_v43  ;;  %1430 = vmatmul.mubr.f32.vlgmr.msra.gmra.mxu1 %v12100_v17  ;;  %v8241_v17 = vsub.f32 %v8149_v48, %v12121_v58  ;;  %v8249_v43 = vand.u32 4294901760, %v8206_v2  ;;  %v316_v58 = vld [vmem:[#allocation6 + $0x1a0] sm:$0xff] }
  0xdf   : > { %1319 = vmatmul.mubr.f32.gmra.mxu0 %v12120_v52  ;;  %5979 = vmatprep.subr.mxu0 %v8080_v53  ;;  %v8246_v59 = vsub.f32 %v8135_v18, %v12122_v24  ;;  %v8252_v53 = vand.u32 4294901760, %v301_v0  ;;  %v8262_v24 = vsub.f32 %v319_v44, %v8195_v41  ;;  %v8287_v21 = vand.u32 4294901760, %v316_v58 }
  0xe0   : > { %12123 = vst [vmem:[#allocation17_spill] sm:$0xff] %v8249_v43  ;;  %6015 = vmatprep.subr.mxu1 %v1730_v26  ;;  %5980 = vmatpush3.msra.mxu0 %v8082_v15  ;;  %v12129_v15 = vand.u32 4294901760, %v8176_v16  ;;  %v8290_v44 = vsub.f32 %v318_v3, %v8231_v13  ;;  %v227_v3 = vld [vmem:[%s7362_s6 + $0x18] sm:$0xff]  ;;  %v12134_v26 = vand.u32 4294901760, %v8204_v1 }
  0xe1   : > { %12124 = vst [vmem:[#allocation39_spill] sm:$0xff] %v8252_v53  ;;  %12127 = vst [vmem:[#allocation40_spill] sm:$0xff] %v8262_v24  ;;  %6016 = vmatpush3.msra.mxu1 %v12128_v8  ;;  %5981 = vmatprep.subr.mxu0 %v8106_v35  ;;  %v8278_v8 = vsub.f32 %v302_v7, %v8233_v30  ;;  %v8280_v35 = vand.u32 4294901760, %v299_v36  ;;  %v298_v7 = vld [vmem:[#allocation6 + $0x110] sm:$0xff] }
  0xe2   : > { %v8271_v18 = vsub.f32 %v8176_v16, %v12129_v15  ;;  %6017 = vmatprep.subr.mxu1 %v1737_v11  ;;  %1324 = vmatprep.mubr.f32.mxu0 %v7847_v56  ;;  %v8300_v15 = vsub.f32 %v300_v62, %v8259_v29  ;;  %v8317_v62 = vsub.f32 %v8204_v1, %v12134_v26  ;;  %v8319_v11 = vand.u32 4294901760, %v315_v14  ;;  %v226_v16 = vld [vmem:[%s7362_s6 + $0x10] sm:$0xff]  ;;  %v8335_v26 = vld [vmem:[#allocation6 + $0x188] sm:$0xff] }
  0xe3   : > { %12130 = vst [vmem:[#allocation41_spill] sm:$0xff] %v8278_v8  ;;  %12131 = vst [vmem:[#allocation31_spill] sm:$0xff] %v8280_v35  ;;  %1435 = vmatprep.mubr.f32.mxu1 %v12105_v61  ;;  %5982 = vmatpush3.msra.mxu0 %v8091_v12  ;;  %v8296_v61 = vsub.f32 %v301_v0, %v8252_v53  ;;  %v8303_v12 = vld [vmem:[#allocation6 + $0x190] sm:$0xff]  ;;  %v8339_v1 = vsub.f32 %v8206_v2, %v8249_v43  ;;  %v12140_v2 = vand.u32 4294901760, %v8262_v24 }
  0xe4   : > { %6018 = vmatpush3.msra.mxu1 %v12132_v49  ;;  %1326 = vmatmul.mubr.f32.gmra.mxu0 %v7857_v51  ;;  %v12133_v49 = vand.u32 4294901760, %v8221_v33  ;;  %12135 = vst [vmem:[#allocation43_spill] sm:$0xff] %v8319_v11 }
  0xe5   : > { %1437 = vmatmul.mubr.f32.gmra.mxu1 %v12109_v37  ;;  %5983 = vmatprep.subr.mxu0 %v8122_v27  ;;  %v8326_v37 = vsub.f32 %v299_v36, %v8280_v35  ;;  %v8333_v27 = vand.u32 4294901760, %v298_v7  ;;  %v8345_v36 = vand.u32 4294901760, %v8303_v12 }
  0xe6   : > { %v8312_v0 = vsub.f32 %v8221_v33, %v12133_v49  ;;  %6019 = vmatprep.subr.mxu1 %v12136_v4  ;;  %5984 = vmatpush3.msra.mxu0 %v8114_v28  ;;  %v8331_v49 = vsub.f32 %v8217_v38, %v12137_v22  ;;  %v297_v4 = vld [vmem:[#allocation6 + $0x108] sm:$0xff]  ;;  %v8349_v38 = vand.u32 4294901760, %v227_v3  ;;  %v8355_v33 = vsub.f32 %v8262_v24, %v12140_v2 }
  0xe7   : > { %6020 = vmatpush3.msra.mxu1 %v12138_v9  ;;  %5985 = vmatprep.subr.mxu0 %v8170_v19  ;;  %v8359_v9 = vsub.f32 %v316_v58, %v8287_v21  ;;  %v8361_v19 = vand.u32 4294901760, %v226_v16  ;;  %v237_v22 = vld [vmem:[%s7362_s6 + $0x68] sm:$0xff]  ;;  %v1667_v28 = vand.u32 4294901760, %v8317_v62  ;;  %v8370_v2 = vand.u32 4294901760, %v8335_v26  ;;  %v236_v62 = vld [vmem:[%s7362_s6 + $0x60] sm:$0xff] }
  0xe8   : > { %12139 = vst [vmem:[#allocation44_spill] sm:$0xff] %v8349_v38  ;;  %6021 = vmatprep.subr.mxu1 %v1751_v60  ;;  %1442 = vmatprep.mubr.f32.mxu1 %v12114_v63  ;;  %v12142_v60 = vand.u32 4294901760, %v8185_v23  ;;  %v1779_v63 = vand.u32 4294901760, %v8312_v0  ;;  %v8372_v46 = vand.u32 4294901760, %v297_v4  ;;  %v8382_v0 = vsub.f32 %v315_v14, %v8319_v11  ;;  %v296_v23 = vld [vmem:[#allocation6 + $0x100] sm:$0xff] }
  0xe9   : > { %12141 = vst [vmem:[#allocation45_spill] sm:$0xff] %v8361_v19  ;;  %5986 = vmatpush3.msra.mxu0 %v8166_v10  ;;  %12143 = vst [vmem:[#allocation46_spill] sm:$0xff] %v8370_v2  ;;  %1444 = vmatmul.mubr.f32.gmra.mxu1 %v12120_v52  ;;  %v8378_v10 = vsub.f32 %v298_v7, %v8333_v27  ;;  %v12145_v24 = vand.u32 4294901760, %v8214_v32  ;;  %v12146_v52 = vand.u32 4294901760, %v8290_v44  ;;  %v12147_v7 = vand.u32 4294901760, %v8278_v8 }
  0xea   : > { %6022 = vmatpush3.msra.mxu1 %v12142_v60  ;;  %12144 = vst [vmem:[#allocation47_spill] sm:$0xff] %v8372_v46  ;;  %5987 = vmatprep.subr.mxu0 %v8195_v41  ;;  %v312_v60 = vld [vmem:[#allocation6 + $0x180] sm:$0xff]  ;;  %v8399_v14 = vsub.f32 %v227_v3, %v8349_v38  ;;  %v8401_v48 = vand.u32 4294901760, %v237_v22  ;;  %v12150_v32 = vand.u32 4294901760, %v8229_v31  ;;  %v12152_v3 = vand.u32 4294901760, %v8241_v17 }
  0xeb   : > { %6023 = vmatprep.subr.mxu1 %v12145_v24  ;;  %5988 = vmatpush3.msra.mxu0 %v8173_v39  ;;  %v8391_v41 = vsub.f32 %v8290_v44, %v12146_v52  ;;  %v8396_v58 = vsub.f32 %v8278_v8, %v12147_v7  ;;  %v1786_v24 = vand.u32 4294901760, %v8355_v33  ;;  %v12151_v52 = vand.u32 4294901760, %v8296_v61 }
  0xec   : > { %12148 = vst [vmem:[#allocation48_spill] sm:$0xff] %v8399_v14  ;;  %12149 = vst [vmem:[#allocation49_spill] sm:$0xff] %v8401_v48  ;;  %6024 = vmatpush3.msra.mxu1 %v12150_v32  ;;  %5989 = vmatprep.subr.mxu0 %v8231_v13  ;;  %v8414_v8 = vsub.f32 %v226_v16, %v8361_v19  ;;  %v8420_v31 = vsub.f32 %v297_v4, %v8372_v46  ;;  %v8422_v32 = vand.u32 4294901760, %v312_v60 }
  0xed   : > { %v8410_v39 = vsub.f32 %v8296_v61, %v12151_v52  ;;  %6025 = vmatprep.subr.mxu1 %v12152_v3  ;;  %1449 = vmatprep.mubr.f32.mxu1 %v7847_v56  ;;  %v8425_v13 = vand.u32 4294901760, %v236_v62  ;;  %v247_v52 = vld [vmem:[%s7362_s6 + $0xb8] sm:$0xff]  ;;  %v12156_v16 = vand.u32 4294901760, %v8246_v59  ;;  %v12157_v17 = vand.u32 4294901760, %v8339_v1 }
  0xee   : > { %12153 = vst [vmem:[#allocation50_spill] sm:$0xff] %v8420_v31  ;;  %12154 = vst [vmem:[#allocation51_spill] sm:$0xff] %v8422_v32  ;;  %5990 = vmatpush3.msra.mxu0 %v8233_v30  ;;  %v8434_v56 = vand.u32 4294901760, %v296_v23  ;;  %v8439_v33 = vsub.f32 %v8303_v12, %v8345_v36  ;;  %1451 = vmatmul.mubr.f32.gmra.mxu1 %v7857_v51  ;;  %v1793_v59 = vand.u32 4294901760, %v8391_v41  ;;  %v12160_v30 = vand.u32 4294901760, %v8271_v18 }
  0xef   : > { %12155 = vst [vmem:[#allocation52_spill] sm:$0xff] %v8425_v13  ;;  %6026 = vmatpush3.msra.mxu1 %v12156_v16  ;;  %v1799_v3 = vsub.f32 %v8339_v1, %v12157_v17  ;;  %5991 = vmatprep.subr.mxu0 %v8249_v43  ;;  %v1681_v16 = vand.u32 4294901760, %v8396_v58  ;;  %v8447_v17 = vsub.f32 %v237_v22, %v8401_v48  ;;  %v1688_v12 = vand.u32 4294901760, %v8410_v39  ;;  %v246_v58 = vld [vmem:[%s7362_s6 + $0xb0] sm:$0xff] }
  0xf0   : > { %12158 = vst [vmem:[#allocation53_spill] sm:$0xff] %v8434_v56  ;;  %12159 = vst [vmem:[#allocation54_spill] sm:$0xff] %v8439_v33  ;;  %6027 = vmatprep.subr.mxu1 %v12160_v30  ;;  %5992 = vmatpush3.msra.mxu0 %v8252_v53  ;;  %v12161_v51 = vand.u32 4294901760, %v8359_v9  ;;  %v8457_v43 = vand.u32 4294901760, %v247_v52  ;;  %v12163_v7 = vand.u32 4294901760, %v8257_v42  ;;  %v12164_v18 = vand.u32 4294901760, %v8300_v15 }
  0xf1   : > { %5993 = vmatprep.subr.mxu0 %v8287_v21  ;;  %v8468_v22 = vsub.f32 %v236_v62, %v8425_v13  ;;  %v1800_v42 = vand.u32 4294901760, %v1799_v3  ;;  %v12166_v41 = vand.u32 4294901760, %v8382_v0  ;;  %v12167_v62 = vand.u32 4294901760, %v8399_v14  ;;  %1838 = vmatprep.mubr.f32.mxu1 %v8349_v38  ;;  %v12210_v38 = vld [vmem:[#allocation17_spill] sm:$0xff] }
  0xf2   : > { %v1806_v4 = vsub.f32 %v8359_v9, %v12161_v51  ;;  %12162 = vst [vmem:[#allocation55_spill] sm:$0xff] %v8457_v43  ;;  %6028 = vmatpush3.msra.mxu1 %v12163_v7  ;;  %v1694_v30 = vsub.f32 %v8300_v15, %v12164_v18  ;;  %v8472_v51 = vsub.f32 %v8335_v26, %v8370_v2 }
  0xf3   : > { %6029 = vmatprep.subr.mxu1 %v1779_v63  ;;  %5994 = vmatpush3.msra.mxu0 %v8259_v29  ;;  %v8476_v7 = vsub.f32 %v296_v23, %v8434_v56  ;;  %v1813_v18 = vsub.f32 %v8382_v0, %v12166_v41  ;;  %v1555_v26 = vsub.f32 %v8399_v14, %v12167_v62  ;;  %v8490_v23 = vand.u32 4294901760, %v246_v58  ;;  %v257_v29 = vld [vmem:[%s7362_s6 + $0x108] sm:$0xff] }
  0xf4   : > { %6030 = vmatpush3.msra.mxu1 %v1667_v28  ;;  %5995 = vmatprep.subr.mxu0 %v8319_v11  ;;  %v8488_v3 = vsub.f32 %v312_v60, %v8422_v32  ;;  %v1807_v41 = vand.u32 4294901760, %v1806_v4  ;;  %v12169_v28 = vand.u32 4294901760, %v8414_v8  ;;  %v8499_v62 = vsub.f32 %v247_v52, %v8457_v43 }
  0xf5   : > { %12165 = vst [vmem:[#allocation56_spill] sm:$0xff] %v8476_v7  ;;  %12168 = vst [vmem:[#allocation57_spill] sm:$0xff] %v8490_v23  ;;  %6031 = vmatprep.subr.mxu1 %v1786_v24  ;;  %5996 = vmatpush3.msra.mxu0 %v8280_v35  ;;  %v12170_v63 = vand.u32 4294901760, %v8331_v49  ;;  %v1695_v60 = vand.u32 4294901760, %v1694_v30  ;;  %v12171_v24 = vand.u32 4294901760, %v8326_v37  ;;  %v1814_v52 = vand.u32 4294901760, %v1813_v18 }
  0xf6   : > { %v1561_v39 = vsub.f32 %v8414_v8, %v12169_v28  ;;  %5997 = vmatprep.subr.mxu0 %v8345_v36  ;;  %v256_v28 = vld [vmem:[%s7362_s6 + $0x100] sm:$0xff]  ;;  %v12172_v11 = vand.u32 4294901760, %v8439_v33  ;;  %v8515_v30 = vand.u32 4294901760, %v257_v29  ;;  %v12174_v4 = vand.u32 4294901760, %v8447_v17 }
  0xf7   : > { %6032 = vmatpush3.msra.mxu1 %v12170_v63  ;;  %v1701_v35 = vsub.f32 %v8326_v37, %v12171_v24  ;;  %5998 = vmatpush3.msra.mxu0 %v8333_v27  ;;  %v1556_v24 = vand.u32 4294901760, %v1555_v26  ;;  %v8523_v18 = vsub.f32 %v246_v58, %v8490_v23  ;;  %v12175_v63 = vand.u32 4294901760, %v8378_v10 }
  0xf8   : > { %6033 = vmatprep.subr.mxu1 %v1793_v59  ;;  %v1820_v49 = vsub.f32 %v8439_v33, %v12172_v11  ;;  %12173 = vst [vmem:[#allocation58_spill] sm:$0xff] %v8515_v30  ;;  %5999 = vmatprep.subr.mxu0 %v8370_v2  ;;  %v1570_v14 = vsub.f32 %v8447_v17, %v12174_v4  ;;  %v1562_v11 = vand.u32 4294901760, %v1561_v39  ;;  %v8530_v26 = vand.u32 4294901760, %v256_v28 }
  0xf9   : > { %6034 = vmatpush3.msra.mxu1 %v1681_v16  ;;  %6000 = vmatpush3.msra.mxu0 %v8372_v46  ;;  %v1708_v16 = vsub.f32 %v8378_v10, %v12175_v63  ;;  %v1702_v4 = vand.u32 4294901760, %v1701_v35  ;;  %v12177_v59 = vand.u32 4294901760, %v8468_v22  ;;  %v12179_v2 = vand.u32 4294901760, %v8420_v31 }
  0xfa   : > { %6035 = vmatprep.subr.mxu1 %v1800_v42  ;;  %12176 = vst [vmem:[#allocation59_spill] sm:$0xff] %v8530_v26  ;;  %6001 = vmatprep.subr.mxu0 %v8422_v32  ;;  %v12178_v42 = vand.u32 4294901760, %v8472_v51  ;;  %v1821_v63 = vand.u32 4294901760, %v1820_v49  ;;  %v8545_v35 = vsub.f32 %v257_v29, %v8515_v30  ;;  %v12180_v32 = vand.u32 4294901760, %v8488_v3 }
  0xfb   : > { %6036 = vmatpush3.msra.mxu1 %v1688_v12  ;;  %v1576_v58 = vsub.f32 %v8468_v22, %v12177_v59  ;;  %6002 = vmatpush3.msra.mxu0 %v8434_v56  ;;  %v1715_v12 = vsub.f32 %v8420_v31, %v12179_v2  ;;  %v1571_v59 = vand.u32 4294901760, %v1570_v14  ;;  %v11583_v46 = vand.u32 4294901760, %v8523_v18 }
  0xfc   : > { %v1827_v39 = vsub.f32 %v8472_v51, %v12178_v42  ;;  %6037 = vmatprep.subr.mxu1 %v1807_v41  ;;  %1557 = vmatprep.mubr.f32.mxu0 %v1556_v24  ;;  %v1834_v42 = vsub.f32 %v8488_v3, %v12180_v32  ;;  %v1709_v41 = vand.u32 4294901760, %v1708_v16  ;;  %v12181_v49 = vand.u32 4294901760, %v8499_v62 }
  0xfd   : > { %6038 = vmatpush3.msra.mxu1 %v1695_v60  ;;  %1563 = vmatmul.mubr.f32.vlgmr.msra.gmra.mxu0 %v1562_v11  ;;  %v8555_v2 = vsub.f32 %v256_v28, %v8530_v26  ;;  %v1577_v29 = vand.u32 4294901760, %v1576_v58  ;;  %v12182_v60 = vand.u32 4294901760, %v8476_v7  ;;  %v11582_v24 = vand.u32 4294901760, %v8545_v35 }
  0xfe   : > { %6039 = vmatprep.subr.mxu1 %v1814_v52  ;;  %v1585_v56 = vsub.f32 %v8499_v62, %v12181_v49  ;;  %6059 = vmatprep.subr.mxu0 %v8038_v5  ;;  %v1828_v14 = vand.u32 4294901760, %v1827_v39  ;;  %v1716_v52 = vand.u32 4294901760, %v1715_v12  ;;  %v1835_v28 = vand.u32 4294901760, %v1834_v42  ;;  %v12183_v42 = vld [vmem:[#allocation33_spill] sm:$0xff]  ;;  %v12185_v49 = vld [vmem:[#allocation14_spill] sm:$0xff] }
  0xff   : > { %6040 = vmatpush3.msra.mxu1 %v1702_v4  ;;  %v1722_v32 = vsub.f32 %v8476_v7, %v12182_v60  ;;  %6060 = vmatpush3.msra.mxu0 %v8035_v50  ;;  %v1591_v11 = vsub.f32 %v8523_v18, %v11583_v46  ;;  %v11581_v4 = vand.u32 4294901760, %v8555_v2  ;;  %v1600_v39 = vsub.f32 %v8545_v35, %v11582_v24  ;;  %v12188_v60 = vld [vmem:[#allocation19_spill] sm:$0xff]  ;;  %v12201_v24 = vld [vmem:[#allocation25_spill] sm:$0xff] }
 0x100   : > { %6041 = vmatprep.subr.mxu1 %v1821_v63  ;;  %6061 = vmatprep.subr.mxu0 %v8059_v20  ;;  %v1586_v16 = vand.u32 4294901760, %v1585_v56  ;;  %v12202_v46 = vld [vmem:[#allocation29_spill] sm:$0xff] }
 0x101   : > { %1572 = vmatprep.mubr.f32.mxu0 %v1571_v59  ;;  %6042 = vmatpush3.msra.mxu1 %v1709_v41  ;;  %v1723_v58 = vand.u32 4294901760, %v1722_v32  ;;  %v1592_v63 = vand.u32 4294901760, %v1591_v11  ;;  %v1606_v56 = vsub.f32 %v8555_v2, %v11581_v4  ;;  %v1601_v12 = vand.u32 4294901760, %v1600_v39  ;;  %v12184_v41 = vld [vmem:[#allocation38_spill] sm:$0xff]  ;;  %v12195_v39 = vld [vmem:[#allocation40_spill] sm:$0xff]  ;;  %v12200_v4 = vld [vmem:[#allocation41_spill] sm:$0xff] }
 0x102   : > { %6062 = vmatpush3.msra.mxu0 %v8054_v55  ;;  %6043 = vmatprep.subr.mxu1 %v1828_v14  ;;  %v12187_v14 = vld [vmem:[#allocation12_spill] sm:$0xff]  ;;  %v12189_v32 = vld [vmem:[#allocation34_spill] sm:$0xff] }
 0x103   : > { %1578 = vmatmul.mubr.f32.gmra.mxu0 %v1577_v29  ;;  %6063 = vmatprep.subr.mxu0 %v8075_v47  ;;  %v1607_v59 = vand.u32 4294901760, %v1606_v56  ;;  %v12186_v29 = vld [vmem:[#allocation18_spill] sm:$0xff]  ;;  %v12197_v56 = vld [vmem:[#allocation32_spill] sm:$0xff] }
 0x104   : > { %6044 = vmatpush3.msra.mxu1 %v1716_v52  ;;  %6064 = vmatpush3.msra.mxu0 %v8072_v6  ;;  %v12190_v52 = vld [vmem:[#allocation20_spill] sm:$0xff]  ;;  %v12192_v11 = vld [vmem:[#allocation22_spill] sm:$0xff] }
 0x105   : > { %6045 = vmatprep.subr.mxu1 %v1835_v28  ;;  %6065 = vmatprep.subr.mxu0 %v8109_v34  ;;  %v12191_v28 = vld [vmem:[#allocation15_spill] sm:$0xff] }
 0x106   : > { %1587 = vmatprep.mubr.f32.mxu0 %v1586_v16  ;;  %6046 = vmatpush3.msra.mxu1 %v1723_v58  ;;  %v12193_v16 = vld [vmem:[#allocation13_spill] sm:$0xff] }
 0x107   : > { %6066 = vmatpush3.msra.mxu0 %v8088_v25  ;;  %1840 = vmatmul.mubr.f32.vlgmr.msra.gmra.mxu1 %v8361_v19  ;;  %v12194_v58 = vld [vmem:[#allocation21_spill] sm:$0xff]  ;;  %v12209_v19 = vld [vmem:[#allocation16_spill] sm:$0xff] }
 0x108   : > { %1593 = vmatmul.mubr.f32.gmra.mxu0 %v1592_v63  ;;  %6067 = vmatprep.subr.mxu0 %v8125_v54  ;;  %v12196_v63 = vld [vmem:[#allocation23_spill] sm:$0xff] }
 0x109   : > { %6103 = vmatprep.subr.mxu1 %v8014_v40  ;;  %6068 = vmatpush3.msra.mxu0 %v8120_v57 }
 0x10a   : > { %6104 = vmatpush3.msra.mxu1 %v8016_v45  ;;  %6069 = vmatprep.subr.mxu0 %v12183_v42 }
 0x10b   : > { %6105 = vmatprep.subr.mxu1 %v12184_v41  ;;  %1602 = vmatprep.mubr.f32.mxu0 %v1601_v12  ;;  %v12198_v12 = vld [vmem:[#allocation24_spill] sm:$0xff] }
 0x10c   : > { %1845 = vmatprep.mubr.f32.mxu1 %v8401_v48  ;;  %6070 = vmatpush3.msra.mxu0 %v12185_v49  ;;  %v12208_v48 = vld [vmem:[#allocation35_spill] sm:$0xff] }
 0x10d   : > { %6106 = vmatpush3.msra.mxu1 %v12186_v29  ;;  %1608 = vmatmul.mubr.f32.gmra.mxu0 %v1607_v59  ;;  %v12199_v59 = vld [vmem:[#allocation26_spill] sm:$0xff] }
 0x10e   : > { %1847 = vmatmul.mubr.f32.gmra.mxu1 %v8425_v13  ;;  %6071 = vmatprep.subr.mxu0 %v12187_v14  ;;  %v12206_v13 = vld [vmem:[#allocation30_spill] sm:$0xff] }
 0x10f   : > { %6107 = vmatprep.subr.mxu1 %v12188_v60  ;;  %6072 = vmatpush3.msra.mxu0 %v12189_v32 }
 0x110   : > { %6108 = vmatpush3.msra.mxu1 %v12190_v52  ;;  %6073 = vmatprep.subr.mxu0 %v12191_v28 }
 0x111   : > { %6109 = vmatprep.subr.mxu1 %v12192_v11  ;;  %1852 = vmatprep.mubr.f32.mxu1 %v8457_v43  ;;  %v12204_v43 = vld [vmem:[#allocation37_spill] sm:$0xff] }
 0x112   : > { %6074 = vmatpush3.msra.mxu0 %v12193_v16  ;;  %6110 = vmatpush3.msra.mxu1 %v12194_v58 }
 0x113   : > { %1854 = vmatmul.mubr.f32.gmra.mxu1 %v8490_v23  ;;  %6075 = vmatprep.subr.mxu0 %v12195_v39  ;;  %v12203_v23 = vld [vmem:[#allocation28_spill] sm:$0xff] }
 0x114   : > { %6111 = vmatprep.subr.mxu1 %v12196_v63  ;;  %6076 = vmatpush3.msra.mxu0 %v12197_v56 }
 0x115   : > { %6112 = vmatpush3.msra.mxu1 %v12198_v12  ;;  %6077 = vmatprep.subr.mxu0 %v8290_v44 }
 0x116   : > { %6113 = vmatprep.subr.mxu1 %v12199_v59  ;;  %1859 = vmatprep.mubr.f32.mxu1 %v8515_v30  ;;  %v12205_v30 = vld [vmem:[#allocation36_spill] sm:$0xff] }
 0x117   : > { %6078 = vmatpush3.msra.mxu0 %v12200_v4  ;;  %6114 = vmatpush3.msra.mxu1 %v12201_v24 }
 0x118   : > { %1861 = vmatmul.mubr.f32.gmra.mxu1 %v8530_v26  ;;  %6079 = vmatprep.subr.mxu0 %v8339_v1  ;;  %v12207_v26 = vld [vmem:[#allocation27_spill] sm:$0xff] }
 0x119   : > { %6115 = vmatprep.subr.mxu1 %v12202_v46  ;;  %6080 = vmatpush3.msra.mxu0 %v8296_v61 }
 0x11a   : > { %6116 = vmatpush3.msra.mxu1 %v12203_v23  ;;  %6081 = vmatprep.subr.mxu0 %v8359_v9 }
 0x11b   : > { %6117 = vmatprep.subr.mxu1 %v12204_v43  ;;  %6082 = vmatpush3.msra.mxu0 %v8300_v15 }
 0x11c   : > { %6118 = vmatpush3.msra.mxu1 %v12205_v30  ;;  %6083 = vmatprep.subr.mxu0 %v8382_v0 }
 0x11d   : > { %6119 = vmatprep.subr.mxu1 %v12206_v13  ;;  %6084 = vmatpush3.msra.mxu0 %v8326_v37 }
 0x11e   : > { %6120 = vmatpush3.msra.mxu1 %v12207_v26  ;;  %6085 = vmatprep.subr.mxu0 %v8439_v33  ;;  %v12211_v33 = vld [vmem:[#allocation48_spill] sm:$0xff] }
 0x11f   : > { %6121 = vmatprep.subr.mxu1 %v12208_v48  ;;  %6086 = vmatpush3.msra.mxu0 %v8378_v10  ;;  %v12212_v48 = vld [vmem:[#allocation42_spill] sm:$0xff] }
 0x120   : > { %6122 = vmatpush3.msra.mxu1 %v12209_v19  ;;  %6087 = vmatprep.subr.mxu0 %v8472_v51  ;;  %v12213_v19 = vld [vmem:[#allocation43_spill] sm:$0xff] }
 0x121   : > { %6123 = vmatprep.subr.mxu1 %v12210_v38  ;;  %6088 = vmatpush3.msra.mxu0 %v8420_v31  ;;  %v12214_v38 = vand.u32 4294901760, %v8038_v5  ;;  %v12215_v31 = vld [vmem:[#allocation31_spill] sm:$0xff]  ;;  %v12219_v5 = vld [vmem:[#allocation46_spill] sm:$0xff] }
 0x122   : > { %6124 = vmatpush3.msra.mxu1 %v8252_v53  ;;  %6089 = vmatprep.subr.mxu0 %v8488_v3  ;;  %v12216_v53 = vand.u32 4294901760, %v8035_v50  ;;  %v12221_v50 = vld [vmem:[#allocation47_spill] sm:$0xff] }
 0x123   : > { %6125 = vmatprep.subr.mxu1 %v8287_v21  ;;  %6090 = vmatpush3.msra.mxu0 %v8476_v7  ;;  %v12217_v7 = vand.u32 4294901760, %v8059_v20  ;;  %v12223_v20 = vld [vmem:[#allocation51_spill] sm:$0xff] }
 0x124   : > { %1996 = vmatprep.mubr.f32.mxu0 %v12211_v33  ;;  %6126 = vmatpush3.msra.mxu1 %v12212_v48  ;;  %v12218_v48 = vand.u32 4294901760, %v8054_v55  ;;  %v12225_v55 = vld [vmem:[#allocation53_spill] sm:$0xff] }
 0x125   : > { %1999 = vmatmul.mubr.f32.vlgmr.msra.gmra.mxu0 %v8414_v8  ;;  %6127 = vmatprep.subr.mxu1 %v12213_v19 }
 0x126   : > { %6147 = vmatprep.subr.mxu0 %v12214_v38  ;;  %6128 = vmatpush3.msra.mxu1 %v12215_v31  ;;  %v12220_v38 = vand.u32 4294901760, %v8075_v47  ;;  %v12227_v47 = vand.u32 4294901760, %v8088_v25  ;;  %v12232_v25 = vand.u32 4294901760, %v8447_v17 }
 0x127   : > { %6148 = vmatpush3.msra.mxu0 %v12216_v53  ;;  %6129 = vmatprep.subr.mxu1 %v8345_v36  ;;  %v12222_v53 = vand.u32 4294901760, %v8072_v6  ;;  %v12229_v6 = vand.u32 4294901760, %v8125_v54  ;;  %v12233_v54 = vand.u32 4294901760, %v12185_v49 }
 0x128   : > { %6149 = vmatprep.subr.mxu0 %v12217_v7  ;;  %2005 = vmatprep.mubr.f32.mxu0 %v8447_v17  ;;  %v12224_v7 = vand.u32 4294901760, %v8109_v34  ;;  %v12230_v34 = vand.u32 4294901760, %v8120_v57  ;;  %v359_v57 = vld [vmem:[#allocation6 + $0x2f8] sm:$0xff] }
 0x129   : > { %6130 = vmatpush3.msra.mxu1 %v8333_v27  ;;  %6150 = vmatpush3.msra.mxu0 %v12218_v48  ;;  %v12226_v48 = vand.u32 4294901760, %v12211_v33  ;;  %v12231_v33 = vand.u32 4294901760, %v12183_v42  ;;  %v343_v17 = vld [vmem:[#allocation6 + $0x278] sm:$0xff]  ;;  %v358_v42 = vld [vmem:[#allocation6 + $0x2f0] sm:$0xff]  ;;  %v8698_v49 = vand.u32 4294901760, %v359_v57 }
 0x12a   : > { %2008 = vmatmul.mubr.f32.gmra.mxu0 %v8468_v22  ;;  %6131 = vmatprep.subr.mxu1 %v12219_v5 }
 0x12b   : > { %6151 = vmatprep.subr.mxu0 %v12220_v38  ;;  %6132 = vmatpush3.msra.mxu1 %v12221_v50  ;;  %v12228_v38 = vand.u32 4294901760, %v8414_v8  ;;  %v12236_v8 = vand.u32 4294901760, %v12189_v32  ;;  %12239 = vst [vmem:[#allocation33_spill] sm:$0xff] %v8698_v49  ;;  %v342_v32 = vld [vmem:[#allocation6 + $0x270] sm:$0xff] }
 0x12c   : > { %6152 = vmatpush3.msra.mxu0 %v12222_v53  ;;  %6133 = vmatprep.subr.mxu1 %v12223_v20  ;;  %v341_v53 = vld [vmem:[#allocation6 + $0x268] sm:$0xff] }
 0x12d   : > { %6153 = vmatprep.subr.mxu0 %v12224_v7  ;;  %2014 = vmatprep.mubr.f32.mxu0 %v8499_v62  ;;  %v12251_v7 = vand.u32 4294901760, %v8555_v2 }
 0x12e   : > { %6134 = vmatpush3.msra.mxu1 %v12225_v55  ;;  %2130 = vmatprep.mubr.f32.mxu1 %v12226_v48  ;;  %v356_v48 = vld [vmem:[#allocation6 + $0x2e0] sm:$0xff] }
 0x12f   : > { %6154 = vmatpush3.msra.mxu0 %v12227_v47  ;;  %2134 = vmatmul.mubr.f32.vlgmr.msra.gmra.mxu1 %v12228_v38  ;;  %v12254_v47 = vand.u32 4294901760, %v8296_v61  ;;  %v8757_v61 = vand.u32 4294901760, %v356_v48 }
 0x130   : > { %2017 = vmatmul.mubr.f32.gmra.mxu0 %v8523_v18  ;;  %6155 = vmatprep.subr.mxu0 %v12229_v6  ;;  %v340_v6 = vld [vmem:[#allocation6 + $0x260] sm:$0xff] }
 0x131   : > { %6191 = vmatprep.subr.mxu1 %v8014_v40  ;;  %6156 = vmatpush3.msra.mxu0 %v12230_v34  ;;  %v12234_v40 = vand.u32 4294901760, %v8468_v22  ;;  %v12238_v22 = vand.u32 4294901760, %v8499_v62  ;;  %v12245_v62 = vand.u32 4294901760, %v12197_v56  ;;  %12257 = vst [vmem:[#allocation34_spill] sm:$0xff] %v8757_v61 }
 0x132   : > { %6192 = vmatpush3.msra.mxu1 %v8016_v45  ;;  %6157 = vmatprep.subr.mxu0 %v12231_v33  ;;  %v12235_v45 = vand.u32 4294901760, %v12187_v14  ;;  %v8703_v14 = vand.u32 4294901760, %v343_v17 }
 0x133   : > { %6193 = vmatprep.subr.mxu1 %v12184_v41  ;;  %2023 = vmatprep.mubr.f32.mxu0 %v8545_v35  ;;  %v12237_v41 = vand.u32 4294901760, %v12191_v28  ;;  %v12244_v28 = vand.u32 4294901760, %v12195_v39  ;;  %v12248_v39 = vand.u32 4294901760, %v8545_v35  ;;  %v8740_v35 = vand.u32 4294901760, %v341_v53 }
 0x134   : > { %2141 = vmatprep.mubr.f32.mxu1 %v12232_v25  ;;  %6158 = vmatpush3.msra.mxu0 %v12233_v54  ;;  %12241 = vst [vmem:[#allocation38_spill] sm:$0xff] %v8703_v14  ;;  %v8782_v54 = vand.u32 4294901760, %v340_v6 }
 0x135   : > { %6194 = vmatpush3.msra.mxu1 %v12186_v29  ;;  %2026 = vmatmul.mubr.f32.gmra.mxu0 %v8555_v2  ;;  %v12240_v29 = vand.u32 4294901760, %v12193_v16  ;;  %v12246_v16 = vand.u32 4294901760, %v8290_v44  ;;  %v12249_v44 = vand.u32 4294901760, %v12200_v4  ;;  %12253 = vst [vmem:[#allocation19_spill] sm:$0xff] %v8740_v35  ;;  %v12255_v2 = vand.u32 4294901760, %v8359_v9 }
 0x136   : > { %2145 = vmatmul.mubr.f32.gmra.mxu1 %v12234_v40  ;;  %6159 = vmatprep.subr.mxu0 %v12235_v45  ;;  %v12258_v9 = vand.u32 4294901760, %v8382_v0  ;;  %v12261_v0 = vld [vmem:[#allocation54_spill] sm:$0xff]  ;;  %12263 = vst [vmem:[#allocation15_spill] sm:$0xff] %v8782_v54  ;;  %v339_v40 = vld [vmem:[#allocation6 + $0x258] sm:$0xff] }
 0x137   : > { %6195 = vmatprep.subr.mxu1 %v12188_v60  ;;  %6160 = vmatpush3.msra.mxu0 %v12236_v8  ;;  %v8705_v60 = vand.u32 4294901760, %v358_v42  ;;  %v12262_v25 = vand.u32 4294901760, %v12261_v0  ;;  %v338_v45 = vld [vmem:[#allocation6 + $0x250] sm:$0xff]  ;;  %v12264_v8 = vld [vmem:[#allocation35_spill] sm:$0xff]  ;;  %v12279_v0 = vld [vmem:[#allocation56_spill] sm:$0xff] }
 0x138   : > { %6196 = vmatpush3.msra.mxu1 %v12190_v52  ;;  %6161 = vmatprep.subr.mxu0 %v12237_v41  ;;  %v12243_v52 = vand.u32 4294901760, %v8523_v18  ;;  %v8720_v18 = vsub.f32 %v359_v57, %v8698_v49  ;;  %v8799_v41 = vsub.f32 %v356_v48, %v8757_v61  ;;  %v12276_v48 = vand.u32 4294901760, %v8488_v3 }
 0x139   : > { %6197 = vmatprep.subr.mxu1 %v12192_v11  ;;  %2152 = vmatprep.mubr.f32.mxu1 %v12238_v22  ;;  %12242 = vst [vmem:[#allocation14_spill] sm:$0xff] %v8705_v60  ;;  %v357_v11 = vld [vmem:[#allocation6 + $0x2e8] sm:$0xff]  ;;  %v8729_v56 = vsub.f32 %v358_v42, %v8705_v60  ;;  %v12267_v22 = vld [vmem:[#allocation16_spill] sm:$0xff] }
 0x13a   : > { %6162 = vmatpush3.msra.mxu0 %v12240_v29  ;;  %6198 = vmatpush3.msra.mxu1 %v12194_v58  ;;  %v8717_v58 = vand.u32 4294901760, %v342_v32  ;;  %12266 = vst [vmem:[#allocation22_spill] sm:$0xff] %v8799_v41  ;;  %v12268_v29 = vand.u32 4294901760, %v8472_v51 }
 0x13b   : > { %2156 = vmatmul.mubr.f32.gmra.mxu1 %v12243_v52  ;;  %6163 = vmatprep.subr.mxu0 %v12244_v28  ;;  %v11607_v38 = vand.u32 4294901760, %v8729_v56  ;;  %v353_v52 = vld [vmem:[#allocation6 + $0x2c8] sm:$0xff] }
 0x13c   : > { %6199 = vmatprep.subr.mxu1 %v12196_v63  ;;  %6164 = vmatpush3.msra.mxu0 %v12245_v62  ;;  %12247 = vst [vmem:[#allocation18_spill] sm:$0xff] %v8717_v58  ;;  %v8726_v63 = vsub.f32 %v343_v17, %v8703_v14  ;;  %v8746_v4 = vsub.f32 %v342_v32, %v8717_v58  ;;  %v354_v17 = vld [vmem:[#allocation6 + $0x2d0] sm:$0xff] }
 0x13d   : > { %6200 = vmatpush3.msra.mxu1 %v12198_v12  ;;  %6165 = vmatprep.subr.mxu0 %v12246_v16  ;;  %v8734_v12 = vand.u32 4294901760, %v357_v11 }
 0x13e   : > { %6201 = vmatprep.subr.mxu1 %v12199_v59  ;;  %2163 = vmatprep.mubr.f32.mxu1 %v12248_v39  ;;  %v12252_v59 = vand.u32 4294901760, %v8339_v1  ;;  %v11608_v1 = vand.u32 4294901760, %v8726_v63  ;;  %v8811_v39 = vand.u32 4294901760, %v339_v40 }
 0x13f   : > { %6166 = vmatpush3.msra.mxu0 %v12249_v44  ;;  %6202 = vmatpush3.msra.mxu1 %v12201_v24  ;;  %12250 = vst [vmem:[#allocation12_spill] sm:$0xff] %v8734_v12  ;;  %v11609_v24 = vand.u32 4294901760, %v8720_v18  ;;  %v8760_v34 = vsub.f32 %v357_v11, %v8734_v12  ;;  %v12270_v11 = vld [vmem:[#allocation17_spill] sm:$0xff]  ;;  %v8813_v44 = vand.u32 4294901760, %v338_v45 }
 0x140   : > { %2167 = vmatmul.mubr.f32.gmra.mxu1 %v12251_v7  ;;  %6167 = vmatprep.subr.mxu0 %v12252_v59  ;;  %12273 = vst [vmem:[#allocation21_spill] sm:$0xff] %v8811_v39  ;;  %v337_v7 = vld [vmem:[#allocation6 + $0x248] sm:$0xff]  ;;  %v12275_v59 = vld [vmem:[#allocation39_spill] sm:$0xff] }
 0x141   : > { %6203 = vmatprep.subr.mxu1 %v12202_v46  ;;  %6168 = vmatpush3.msra.mxu0 %v12254_v47  ;;  %v12256_v46 = vand.u32 4294901760, %v8300_v15  ;;  %v355_v15 = vld [vmem:[#allocation6 + $0x2d8] sm:$0xff]  ;;  %v8776_v33 = vsub.f32 %v8720_v18, %v11609_v24  ;;  %v11605_v42 = vand.u32 4294901760, %v8760_v34  ;;  %12274 = vst [vmem:[#allocation40_spill] sm:$0xff] %v8813_v44  ;;  %v8824_v47 = vsub.f32 %v340_v6, %v8782_v54 }
 0x142   : > { %6204 = vmatpush3.msra.mxu1 %v12203_v23  ;;  %6169 = vmatprep.subr.mxu0 %v12255_v2  ;;  %v8766_v23 = vsub.f32 %v341_v53, %v8740_v35  ;;  %v8804_v32 = vand.u32 4294901760, %v355_v15  ;;  %v11610_v6 = vand.u32 4294901760, %v8799_v41  ;;  %v349_v53 = vld [vmem:[#allocation6 + $0x2a8] sm:$0xff] }
 0x143   : > { %6205 = vmatprep.subr.mxu1 %v12204_v43  ;;  %6170 = vmatpush3.msra.mxu0 %v12256_v46  ;;  %v12260_v43 = vand.u32 4294901760, %v8326_v37  ;;  %v8792_v37 = vsub.f32 %v8729_v56, %v11607_v38  ;;  %12277 = vst [vmem:[#allocation23_spill] sm:$0xff] %v8824_v47  ;;  %v8827_v46 = vand.u32 4294901760, %v354_v17  ;;  %v8838_v3 = vsub.f32 %v8760_v34, %v11605_v42 }
 0x144   : > { %6206 = vmatpush3.msra.mxu1 %v12205_v30  ;;  %6171 = vmatprep.subr.mxu0 %v12258_v9  ;;  %12259 = vst [vmem:[#allocation20_spill] sm:$0xff] %v8766_v23  ;;  %v11606_v30 = vand.u32 4294901760, %v8746_v4  ;;  %12269 = vst [vmem:[#allocation13_spill] sm:$0xff] %v8804_v32  ;;  %v11604_v28 = vand.u32 4294901760, %v8766_v23 }
 0x145   : > { %6207 = vmatprep.subr.mxu1 %v12206_v13  ;;  %6172 = vmatpush3.msra.mxu0 %v12260_v43  ;;  %v8787_v13 = vsub.f32 %v8726_v63, %v11608_v1  ;;  %v5739_v57 = vpop.f32.mrf.mxu0  ;;  %12278 = vst [vmem:[#allocation32_spill] sm:$0xff] %v8827_v46  ;;  %v352_v43 = vld [vmem:[#allocation6 + $0x2c0] sm:$0xff] }
 0x146   : > { %6208 = vmatpush3.msra.mxu1 %v12207_v26  ;;  %6173 = vmatprep.subr.mxu0 %v12262_v25  ;;  %v12265_v26 = vand.u32 4294901760, %v8378_v10  ;;  %v12271_v10 = vld [vmem:[#allocation50_spill] sm:$0xff]  ;;  %v8818_v51 = vsub.f32 %v8746_v4, %v11606_v30  ;;  %v12280_v25 = vand.u32 4294901760, %v12279_v0  ;;  %v12286_v0 = vld [vmem:[#allocation45_spill] sm:$0xff] }
 0x147   : > { %6209 = vmatprep.subr.mxu1 %v12264_v8  ;;  %v5740_v62 = vpop.f32.mrf.mxu0  ;;  %v12272_v16 = vand.u32 4294901760, %v12271_v10  ;;  %v8833_v8 = vand.u32 4294901760, %v353_v52  ;;  %v12283_v10 = vld [vmem:[#allocation42_spill] sm:$0xff] }
 0x148   : > { %6174 = vmatpush3.msra.mxu0 %v12265_v26  ;;  %6210 = vmatpush3.msra.mxu1 %v12267_v22  ;;  %v336_v26 = vld [vmem:[#allocation6 + $0x240] sm:$0xff]  ;;  %v351_v22 = vld [vmem:[#allocation6 + $0x2b8] sm:$0xff] }
 0x149   : > { %6175 = vmatprep.subr.mxu0 %v12268_v29  ;;  %6211 = vmatprep.subr.mxu1 %v12270_v11  ;;  %12281 = vst [vmem:[#allocation24_spill] sm:$0xff] %v8833_v8  ;;  %v5741_v29 = vadd.f32 %v5740_v62, %v5739_v57  ;;  %v12282_v11 = vld [vmem:[#allocation44_spill] sm:$0xff]  ;;  %v8859_v57 = vsub.f32 %v339_v40, %v8811_v39 }
 0x14a   : > { %6176 = vmatpush3.msra.mxu0 %v12272_v16  ;;  %6212 = vmatpush3.msra.mxu1 %v12275_v59  ;;  %v8848_v16 = vsub.f32 %v8766_v23, %v11604_v28  ;;  %v8851_v59 = vsub.f32 %v355_v15, %v8804_v32  ;;  %v8862_v62 = vsub.f32 %v338_v45, %v8813_v44  ;;  %v335_v28 = vld [vmem:[#allocation6 + $0x238] sm:$0xff]  ;;  %v8869_v15 = vand.u32 4294901760, %v336_v26  ;;  %v334_v45 = vld [vmem:[#allocation6 + $0x230] sm:$0xff] }
 0x14b   : > { %6177 = vmatprep.subr.mxu0 %v12276_v48  ;;  %6213 = vmatprep.subr.mxu1 %v8287_v21  ;;  %v8843_v21 = vand.u32 4294901760, %v337_v7  ;;  %v8854_v48 = vstv %s8768_s24  ;;  %12287 = vst [vmem:[#allocation25_spill] sm:$0xff] %v8859_v57  ;;  %v8875_v40 = vsub.f32 %v354_v17, %v8827_v46  ;;  %v8886_v1 = vsub.f32 %v353_v52, %v8833_v8  ;;  %v12294_v17 = vld [vmem:[#allocation49_spill] sm:$0xff]  ;;  %v239_v23 = vld [vmem:[%s7362_s6 + $0x78] sm:$0xff] }
 0x14c   : > { %6178 = vmatpush3.msra.mxu0 %v12280_v25  ;;  %2333 = vmatprep.mubr.f32.mxu0 %v12282_v11  ;;  %12285 = vst [vmem:[#allocation41_spill] sm:$0xff] %v8851_v59  ;;  %12288 = vst [vmem:[#allocation29_spill] sm:$0xff] %v8862_v62  ;;  %v535_v24 = vadd.f32 %v5741_v29, %v8854_v48  ;;  %v8896_v9 = vand.u32 4294901760, %v335_v28  ;;  %v8901_v29 = vand.u32 4294901760, %v334_v45  ;;  %v333_v52 = vld [vmem:[#allocation6 + $0x228] sm:$0xff] }
 0x14d   : > { %6214 = vmatpush3.msra.mxu1 %v12283_v10  ;;  %12284 = vst [vmem:[#allocation26_spill] sm:$0xff] %v8843_v21  ;;  %2335 = vmatmul.mubr.f32.vlgmr.msra.gmra.mxu0 %v12286_v0  ;;  %v8865_v10 = vand.u32 4294901760, %v352_v43  ;;  %12290 = vst [vmem:[#allocation37_spill] sm:$0xff] %v8869_v15  ;;  %v5783_v30 = vpop.f32.mrf.mxu1  ;;  %v8892_v25 = vsub.f32 %v337_v7, %v8843_v21  ;;  %v8909_v38 = vsub.f32 %v336_v26, %v8869_v15 }
 0x14e   : > { %6215 = vmatprep.subr.mxu1 %v12213_v19  ;;  %6235 = vmatprep.subr.mxu0 %v8698_v49  ;;  %v8872_v19 = vand.u32 4294901760, %v351_v22  ;;  %12292 = vst [vmem:[#allocation30_spill] sm:$0xff] %v8875_v40  ;;  %12293 = vst [vmem:[#allocation27_spill] sm:$0xff] %v8886_v1  ;;  %v12304_v26 = vand.u32 4294901760, %v8851_v59 }
 0x14f   : > { %12289 = vst [vmem:[#allocation28_spill] sm:$0xff] %v8865_v10  ;;  %6216 = vmatpush3.msra.mxu1 %v12215_v31  ;;  %6236 = vmatpush3.msra.mxu0 %v8703_v14  ;;  %v8883_v31 = vsub.f32 %v8799_v41, %v11610_v6  ;;  %12295 = vst [vmem:[#allocation48_spill] sm:$0xff] %v8892_v25  ;;  %v350_v6 = vld [vmem:[#allocation6 + $0x2b0] sm:$0xff]  ;;  %v5784_v2 = vpop.f32.mrf.mxu1  ;;  %v8904_v7 = vsub.f32 %v352_v43, %v8865_v10 }
 0x150   : > { %12291 = vst [vmem:[#allocation36_spill] sm:$0xff] %v8872_v19  ;;  %6217 = vmatprep.subr.mxu1 %v8345_v36  ;;  %6237 = vmatprep.subr.mxu0 %v8705_v60  ;;  %12296 = vst [vmem:[#allocation43_spill] sm:$0xff] %v8896_v9  ;;  %v5785_v42 = vadd.f32 %v5784_v2, %v5783_v30  ;;  %v12299_v36 = vld [vmem:[#allocation52_spill] sm:$0xff]  ;;  %v8918_v60 = vsub.f32 %v351_v22, %v8872_v19  ;;  %v8922_v30 = vand.u32 4294901760, %v350_v6 }
 0x151   : > { %2340 = vmatprep.mubr.f32.mxu0 %v12294_v17  ;;  %6218 = vmatpush3.msra.mxu1 %v8333_v27  ;;  %12297 = vst [vmem:[#allocation31_spill] sm:$0xff] %v8901_v29  ;;  %12298 = vst [vmem:[#allocation46_spill] sm:$0xff] %v8904_v7  ;;  %v12301_v27 = vand.u32 4294901760, %v8824_v47  ;;  %v8933_v22 = vsub.f32 %v8851_v59, %v12304_v26  ;;  %v8950_v26 = vsub.f32 %v334_v45, %v8901_v29  ;;  %v329_v59 = vld [vmem:[#allocation6 + $0x208] sm:$0xff] }
 0x152   : > { %6238 = vmatpush3.msra.mxu0 %v8717_v58  ;;  %6219 = vmatprep.subr.mxu1 %v12219_v5  ;;  %12300 = vst [vmem:[#allocation47_spill] sm:$0xff] %v8909_v38  ;;  %12302 = vst [vmem:[#allocation51_spill] sm:$0xff] %v8918_v60  ;;  %v8926_v43 = vadd.f32 %v5785_v42, %v535_v24  ;;  %v12307_v24 = vld [vmem:[#allocation55_spill] sm:$0xff]  ;;  %v12312_v45 = vand.u32 4294901760, %v8886_v1  ;;  %v12340_v41 = vand.u32 4294901760, %v8883_v31 }
 0x153   : > { %2342 = vmatmul.mubr.f32.gmra.mxu0 %v12299_v36  ;;  %v8914_v58 = vsub.f32 %v8824_v47, %v12301_v27  ;;  %6239 = vmatprep.subr.mxu0 %v8734_v12  ;;  %12303 = vst [vmem:[#allocation53_spill] sm:$0xff] %v8922_v30  ;;  %v8936_v27 = vsub.f32 %v335_v28, %v8896_v9  ;;  %12309 = vst [vmem:[#allocation16_spill] sm:$0xff] %v8950_v26  ;;  %v332_v28 = vld [vmem:[#allocation6 + $0x220] sm:$0xff]  ;;  %v12315_v12 = vld [vmem:[#allocation57_spill] sm:$0xff] }
 0x154   : > { %6220 = vmatpush3.msra.mxu1 %v12221_v50  ;;  %6240 = vmatpush3.msra.mxu0 %v8740_v35  ;;  %v8938_v50 = vand.u32 4294901760, %v349_v53  ;;  %v348_v35 = vld [vmem:[#allocation6 + $0x2a0] sm:$0xff]  ;;  %v8973_v5 = vsub.f32 %v8886_v1, %v12312_v45  ;;  %v229_v45 = vld [vmem:[%s7362_s6 + $0x28] sm:$0xff] }
 0x155   : > { %6221 = vmatprep.subr.mxu1 %v12223_v20  ;;  %12305 = vst [vmem:[#allocation54_spill] sm:$0xff] %v8936_v27  ;;  %6241 = vmatprep.subr.mxu0 %v8757_v61  ;;  %v12308_v20 = vand.u32 4294901760, %v8859_v57  ;;  %v12310_v61 = vand.u32 4294901760, %v8875_v40  ;;  %v12342_v31 = vand.u32 4294901760, %v8914_v58 }
 0x156   : > { %12306 = vst [vmem:[#allocation35_spill] sm:$0xff] %v8938_v50  ;;  %2347 = vmatprep.mubr.f32.mxu0 %v12307_v24  ;;  %6222 = vmatpush3.msra.mxu1 %v12225_v55  ;;  %v12311_v55 = vand.u32 4294901760, %v8862_v62  ;;  %v8990_v1 = vsub.f32 %v349_v53, %v8938_v50  ;;  %v12320_v53 = vand.u32 4294901760, %v8787_v13  ;;  %v12324_v13 = vand.u32 4294901760, %v8792_v37 }
 0x157   : > { %v8947_v2 = vsub.f32 %v8859_v57, %v12308_v20  ;;  %2458 = vmatprep.mubr.f32.mxu1 %v12282_v11  ;;  %v8959_v42 = vsub.f32 %v8875_v40, %v12310_v61  ;;  %6242 = vmatpush3.msra.mxu0 %v8782_v54  ;;  %v8975_v61 = vand.u32 4294901760, %v333_v52  ;;  %v8978_v20 = vsub.f32 %v350_v6, %v8922_v30  ;;  %v12330_v57 = vld [vmem:[#allocation59_spill] sm:$0xff] }
 0x158   : > { %2460 = vmatmul.mubr.f32.vlgmr.msra.gmra.mxu1 %v12286_v0  ;;  %v8968_v11 = vsub.f32 %v8862_v62, %v12311_v55  ;;  %2349 = vmatmul.mubr.f32.gmra.mxu0 %v12315_v12  ;;  %v12316_v55 = vand.u32 4294901760, %v8892_v25  ;;  %12317 = vst [vmem:[#allocation39_spill] sm:$0xff] %v8990_v1  ;;  %v12318_v6 = vand.u32 4294901760, %v8776_v33  ;;  %v8996_v62 = vand.u32 4294901760, %v348_v35 }
 0x159   : > { %12313 = vst [vmem:[#allocation17_spill] sm:$0xff] %v8975_v61  ;;  %12314 = vst [vmem:[#allocation50_spill] sm:$0xff] %v8978_v20  ;;  %6243 = vmatprep.subr.mxu0 %v8804_v32  ;;  %v12319_v0 = vand.u32 4294901760, %v8904_v7  ;;  %v12322_v32 = vand.u32 4294901760, %v8909_v38  ;;  %v9027_v40 = vsub.f32 %v333_v52, %v8975_v61  ;;  %2465 = vmatprep.mubr.f32.mxu1 %v12294_v17  ;;  %v12331_v37 = vand.u32 4294901760, %v8950_v26 }
 0x15a   : > { %v8986_v54 = vsub.f32 %v8892_v25, %v12316_v55  ;;  %6279 = vmatprep.subr.mxu1 %v12318_v6  ;;  %6244 = vmatpush3.msra.mxu0 %v8811_v39  ;;  %v331_v25 = vld [vmem:[#allocation6 + $0x218] sm:$0xff]  ;;  %v9008_v6 = vand.u32 4294901760, %v332_v28  ;;  %v5742_v14 = vpop.f32.mrf.mxu0 }
 0x15b   : > { %v9001_v55 = vsub.f32 %v8904_v7, %v12319_v0  ;;  %6280 = vmatpush3.msra.mxu1 %v12320_v53  ;;  %6245 = vmatprep.subr.mxu0 %v8827_v46  ;;  %v9013_v39 = vsub.f32 %v8909_v38, %v12322_v32  ;;  %v12323_v0 = vand.u32 4294901760, %v8918_v60  ;;  %v12325_v53 = vld [vmem:[#allocation58_spill] sm:$0xff]  ;;  %12326 = vst [vmem:[#allocation44_spill] sm:$0xff] %v9027_v40  ;;  %v347_v32 = vld [vmem:[#allocation6 + $0x298] sm:$0xff]  ;;  %v12329_v38 = vand.u32 4294901760, %v8818_v51 }
 0x15c   : > { %12321 = vst [vmem:[#allocation56_spill] sm:$0xff] %v9008_v6  ;;  %6281 = vmatprep.subr.mxu1 %v12324_v13  ;;  %2354 = vmatprep.mubr.f32.mxu0 %v12325_v53  ;;  %v12328_v13 = vand.u32 4294901760, %v8936_v27  ;;  %v330_v46 = vld [vmem:[#allocation6 + $0x210] sm:$0xff]  ;;  %v9049_v49 = vsub.f32 %v8950_v26, %v12331_v37  ;;  %v5743_v52 = vpop.f32.mrf.mxu0  ;;  %v9062_v17 = vand.u32 4294901760, %v347_v32  ;;  %v12335_v26 = vand.u32 4294901760, %v8838_v3 }
 0x15d   : > { %v9018_v7 = vsub.f32 %v8918_v60, %v12323_v0  ;;  %6246 = vmatpush3.msra.mxu0 %v8813_v44  ;;  %v9033_v0 = vand.u32 4294901760, %v331_v25  ;;  %v228_v60 = vld [vmem:[%s7362_s6 + $0x20] sm:$0xff]  ;;  %6282 = vmatpush3.msra.mxu1 %v12329_v38  ;;  %v346_v44 = vld [vmem:[#allocation6 + $0x290] sm:$0xff]  ;;  %v9059_v38 = vsub.f32 %v332_v28, %v9008_v6  ;;  %v9075_v28 = vld [vmem:[#allocation6 + $0x288] sm:$0xff]  ;;  %v12338_v3 = vand.u32 4294901760, %v8848_v16 }
 0x15e   : > { %v9038_v33 = vsub.f32 %v8936_v27, %v12328_v13  ;;  %2356 = vmatmul.mubr.f32.gmra.mxu0 %v12330_v57  ;;  %v9052_v13 = vsub.f32 %v348_v35, %v8996_v62  ;;  %v9054_v27 = vand.u32 4294901760, %v229_v45  ;;  %2467 = vmatmul.mubr.f32.gmra.mxu1 %v12299_v36  ;;  %12334 = vst [vmem:[#allocation52_spill] sm:$0xff] %v9062_v17  ;;  %v12336_v35 = vand.u32 4294901760, %v8978_v20 }
 0x15f   : > { %12327 = vst [vmem:[#allocation42_spill] sm:$0xff] %v9033_v0  ;;  %6247 = vmatprep.subr.mxu0 %v8833_v8  ;;  %6283 = vmatprep.subr.mxu1 %v12335_v26  ;;  %v9073_v8 = vand.u32 4294901760, %v330_v46  ;;  %v9078_v47 = vand.u32 4294901760, %v228_v60  ;;  %v9084_v26 = vsub.f32 %v331_v25, %v9033_v0  ;;  %v9087_v37 = vand.u32 4294901760, %v346_v44  ;;  %v5745_v51 = vpop.f32.mrf.mxu0 }
 0x160   : > { %12332 = vst [vmem:[#allocation45_spill] sm:$0xff] %v9052_v13  ;;  %12333 = vst [vmem:[#allocation49_spill] sm:$0xff] %v9054_v27  ;;  %6248 = vmatpush3.msra.mxu0 %v8843_v21  ;;  %v9071_v36 = vsub.f32 %v8978_v20, %v12336_v35  ;;  %6284 = vmatpush3.msra.mxu1 %v12338_v3  ;;  %v12339_v21 = vand.u32 4294901760, %v8990_v1  ;;  %v9098_v3 = vld [vmem:[#allocation6 + $0x280] sm:$0xff]  ;;  %v9115_v25 = vsub.f32 %v347_v32, %v9062_v17  ;;  %v238_v32 = vld [vmem:[%s7362_s6 + $0x70] sm:$0xff] }
 0x161   : > { %12337 = vst [vmem:[#allocation55_spill] sm:$0xff] %v9078_v47  ;;  %6249 = vmatprep.subr.mxu0 %v8865_v10  ;;  %6285 = vmatprep.subr.mxu1 %v12340_v41  ;;  %v328_v35 = vld [vmem:[#allocation6 + $0x200] sm:$0xff]  ;;  %v9102_v10 = vsub.f32 %v229_v45, %v9054_v27  ;;  %v9109_v41 = vand.u32 4294901760, %v9075_v28  ;;  %v5746_v45 = vpop.f32.mrf.mxu0  ;;  %v9121_v58 = vsub.f32 %v330_v46, %v9073_v8  ;;  %v9137_v46 = vand.u32 4294901760, %v9098_v3 }
 0x162   : > { %v9092_v20 = vsub.f32 %v8990_v1, %v12339_v21  ;;  %2472 = vmatprep.mubr.f32.mxu1 %v12307_v24  ;;  %v5744_v21 = vadd.f32 %v5743_v52, %v5742_v14  ;;  %6250 = vmatpush3.msra.mxu0 %v8869_v15  ;;  %v9111_v24 = vand.u32 4294901760, %v329_v59  ;;  %v12344_v52 = vand.u32 4294901760, %v9027_v40 }
 0x163   : > { %12341 = vst [vmem:[#allocation57_spill] sm:$0xff] %v9102_v10  ;;  %6286 = vmatpush3.msra.mxu1 %v12342_v31  ;;  %6251 = vmatprep.subr.mxu0 %v8872_v19  ;;  %12343 = vst [vmem:[#allocation58_spill] sm:$0xff] %v9121_v58  ;;  %v9129_v16 = vsub.f32 %v228_v60, %v9078_v47  ;;  %v12346_v15 = vand.u32 4294901760, %v8933_v22  ;;  %v9139_v14 = vand.u32 4294901760, %v328_v35  ;;  %v9141_v19 = vand.u32 4294901760, %v239_v23 }
 0x164   : > { %2474 = vmatmul.mubr.f32.gmra.mxu1 %v12315_v12  ;;  %v9126_v31 = vsub.f32 %v9027_v40, %v12344_v52  ;;  %6252 = vmatpush3.msra.mxu0 %v8896_v9  ;;  %v5786_v52 = vpop.f32.mrf.mxu1  ;;  %v12348_v40 = vand.u32 4294901760, %v8947_v2  ;;  %v12349_v60 = vand.u32 4294901760, %v9052_v13  ;;  %v9153_v12 = vsub.f32 %v346_v44, %v9087_v37  ;;  %v249_v9 = vld [vmem:[%s7362_s6 + $0xc8] sm:$0xff] }
 0x165   : > { %12345 = vst [vmem:[#allocation59_spill] sm:$0xff] %v9129_v16  ;;  %6287 = vmatprep.subr.mxu1 %v12346_v15  ;;  %12347 = vst [vmem:[#allocation60_spill] sm:$0xff] %v9141_v19  ;;  %6253 = vmatprep.subr.mxu0 %v8922_v30  ;;  %v550_v1 = vadd.f32 %v5744_v21, %v8854_v48  ;;  %v12351_v47 = vand.u32 4294901760, %v8959_v42  ;;  %v12353_v2 = vand.u32 4294901760, %v9059_v38  ;;  %v9169_v44 = vand.u32 4294901760, %v238_v32  ;;  %v5748_v30 = vpop.f32.mrf.mxu0 }
 0x166   : > { %6288 = vmatpush3.msra.mxu1 %v12348_v40  ;;  %v9149_v15 = vsub.f32 %v9052_v13, %v12349_v60  ;;  %12350 = vst [vmem:[#allocation61_spill] sm:$0xff] %v9153_v12  ;;  %2479 = vmatprep.mubr.f32.mxu1 %v12325_v53  ;;  %v9161_v40 = vsub.f32 %v329_v59, %v9111_v24  ;;  %v5787_v13 = vpop.f32.mrf.mxu1  ;;  %v11689_v59 = vand.u32 4294901760, %v9084_v26  ;;  %v12358_v42 = vand.u32 4294901760, %v8973_v5 }
 0x167   : > { %6289 = vmatprep.subr.mxu1 %v12351_v47  ;;  %v9166_v60 = vsub.f32 %v9059_v38, %v12353_v2  ;;  %12354 = vst [vmem:[#allocation63_spill] sm:$0xff] %v9169_v44  ;;  %6254 = vmatpush3.msra.mxu0 %v8901_v29  ;;  %v12355_v47 = vand.u32 4294901760, %v8968_v11  ;;  %v5747_v53 = vadd.f32 %v5746_v45, %v5745_v51  ;;  %v9185_v11 = vand.u32 4294901760, %v249_v9  ;;  %v248_v45 = vld [vmem:[%s7362_s6 + $0xc0] sm:$0xff] }
 0x168   : > { %12352 = vst [vmem:[#allocation62_spill] sm:$0xff] %v9161_v40  ;;  %v5788_v21 = vadd.f32 %v5787_v13, %v5786_v52  ;;  %2481 = vmatmul.mubr.f32.gmra.mxu1 %v12330_v57  ;;  %6255 = vmatprep.subr.mxu0 %v8938_v50  ;;  %v9180_v22 = vsub.f32 %v328_v35, %v9139_v14  ;;  %v12359_v13 = vand.u32 4294901760, %v9102_v10  ;;  %v12360_v52 = vand.u32 4294901760, %v8986_v54 }
 0x169   : > { %6290 = vmatpush3.msra.mxu1 %v12355_v47  ;;  %v9183_v29 = vsub.f32 %v239_v23, %v9141_v19  ;;  %12357 = vst [vmem:[#allocation65_spill] sm:$0xff] %v9185_v11  ;;  %v5749_v47 = vpop.f32.mrf.mxu0  ;;  %6256 = vmatpush3.msra.mxu0 %v8975_v61  ;;  %v12361_v5 = vand.u32 4294901760, %v9115_v25  ;;  %v12362_v54 = vand.u32 4294901760, %v9001_v55  ;;  %v12364_v57 = vand.u32 4294901760, %v9013_v39 }
 0x16a   : > { %12356 = vst [vmem:[#allocation64_spill] sm:$0xff] %v9180_v22  ;;  %6291 = vmatprep.subr.mxu1 %v12358_v42  ;;  %v9194_v51 = vsub.f32 %v9102_v10, %v12359_v13  ;;  %v9198_v23 = vadd.f32 %v5788_v21, %v550_v1  ;;  %6257 = vmatprep.subr.mxu0 %v8996_v62  ;;  %v5789_v21 = vpop.f32.mrf.mxu1  ;;  %v12367_v39 = vand.u32 4294901760, %v9018_v7  ;;  %v12368_v55 = vand.u32 4294901760, %v9153_v12 }
 0x16b   : > { %6292 = vmatpush3.msra.mxu1 %v12360_v52  ;;  %v9206_v42 = vsub.f32 %v9115_v25, %v12361_v5  ;;  %v9210_v13 = vsub.f32 %v238_v32, %v9169_v44  ;;  %v9214_v1 = vsub.f32 %v9075_v28, %v9109_v41  ;;  %6258 = vmatpush3.msra.mxu0 %v9008_v6  ;;  %v2725_v52 = vand.u32 4294901760, %v9166_v60  ;;  %v5827_v35 = vpop.f32.mrf.mxu0 }
 0x16c   : > { %6293 = vmatprep.subr.mxu1 %v12362_v54  ;;  %v12363_v5 = vand.u32 4294901760, %v9129_v16  ;;  %v9228_v32 = vsub.f32 %v9084_v26, %v11689_v59  ;;  %v565_v28 = vadd.f32 %v5747_v53, %v8854_v48  ;;  %6259 = vmatprep.subr.mxu0 %v9062_v17  ;;  %v9237_v60 = vsub.f32 %v9098_v3, %v9137_v46  ;;  %v259_v59 = vld [vmem:[%s7362_s6 + $0x118] sm:$0xff]  ;;  %v5790_v53 = vpop.f32.mrf.mxu1 }
 0x16d   : > { %6294 = vmatpush3.msra.mxu1 %v12364_v57  ;;  %v9240_v54 = vsub.f32 %v249_v9, %v9185_v11  ;;  %6260 = vmatpush3.msra.mxu0 %v9033_v0  ;;  %v2586_v57 = vand.u32 4294901760, %v9194_v51  ;;  %v9252_v3 = vsub.f32 %v9153_v12, %v12368_v55  ;;  %v5750_v9 = vadd.f32 %v5749_v47, %v5748_v30  ;;  %v258_v55 = vld [vmem:[%s7362_s6 + $0x110] sm:$0xff]  ;;  %v5828_v10 = vpop.f32.mrf.mxu0 }
 0x16e   : > { %v9223_v2 = vsub.f32 %v9129_v16, %v12363_v5  ;;  %12365 = vst [vmem:[#allocation66_spill] sm:$0xff] %v9237_v60  ;;  %v9242_v5 = vand.u32 4294901760, %v248_v45  ;;  %6295 = vmatprep.subr.mxu1 %v12367_v39  ;;  %v5791_v17 = vadd.f32 %v5790_v53, %v5789_v21  ;;  %v12369_v16 = vand.u32 4294901760, %v9038_v33  ;;  %6261 = vmatprep.subr.mxu0 %v9087_v37 }
 0x16f   : > { %v2844_v6 = vand.u32 4294901760, %v9206_v42  ;;  %v12370_v7 = vand.u32 4294901760, %v9121_v58  ;;  %v11700_v51 = vand.u32 4294901760, %v9210_v13  ;;  %v12371_v30 = vand.u32 4294901760, %v9071_v36  ;;  %6262 = vmatpush3.msra.mxu0 %v9073_v8  ;;  %v5792_v0 = vpop.f32.mrf.mxu1  ;;  %2587 = vmatprep.mubr.f32.mxu0 %v2586_v57 }
 0x170   : > { %12366 = vst [vmem:[#allocation67_spill] sm:$0xff] %v9242_v5  ;;  %6296 = vmatpush3.msra.mxu1 %v12369_v16  ;;  %v9270_v16 = vand.u32 4294901760, %v259_v59  ;;  %v9272_v47 = vadd.f32 %v5791_v17, %v565_v28  ;;  %v5829_v42 = vadd.f32 %v5828_v10, %v5827_v35  ;;  %v12373_v21 = vand.u32 4294901760, %v9049_v49  ;;  %6263 = vmatprep.subr.mxu0 %v9109_v41 }
 0x171   : > { %v9261_v39 = vsub.f32 %v9121_v58, %v12370_v7  ;;  %6297 = vmatprep.subr.mxu1 %v12371_v30  ;;  %v12374_v53 = vand.u32 4294901760, %v9183_v29  ;;  %v11701_v36 = vand.u32 4294901760, %v9237_v60  ;;  %v11705_v30 = vand.u32 4294901760, %v9240_v54  ;;  %6264 = vmatpush3.msra.mxu0 %v9111_v24 }
 0x172   : > { %12372 = vst [vmem:[#allocation68_spill] sm:$0xff] %v9270_v16  ;;  %6298 = vmatpush3.msra.mxu1 %v12373_v21  ;;  %v9283_v33 = vsub.f32 %v248_v45, %v9242_v5  ;;  %v12375_v17 = vand.u32 4294901760, %v9092_v20  ;;  %v2592_v49 = vand.u32 4294901760, %v9223_v2  ;;  %v9289_v10 = vand.u32 4294901760, %v258_v55  ;;  %6265 = vmatprep.subr.mxu0 %v9137_v46 }
 0x173   : > { %v2600_v7 = vsub.f32 %v9183_v29, %v12374_v53  ;;  %v580_v35 = vadd.f32 %v5750_v9, %v8854_v48  ;;  %v971_v28 = vadd.f32 %v5829_v42, %v8926_v43  ;;  %v12377_v21 = vand.u32 4294901760, %v9126_v31  ;;  %v5830_v48 = vpop.f32.mrf.mxu0  ;;  %v5793_v9 = vpop.f32.mrf.mxu1  ;;  %6266 = vmatpush3.msra.mxu0 %v9139_v14  ;;  %2868 = vmatprep.mubr.f32.mxu1 %v9054_v27  ;;  %v12404_v27 = vld [vmem:[#allocation54_spill] sm:$0xff] }
 0x174   : > { %6299 = vmatprep.subr.mxu1 %v12375_v17  ;;  %12376 = vst [vmem:[#allocation69_spill] sm:$0xff] %v9289_v10  ;;  %v2732_v45 = vand.u32 4294901760, %v9228_v32  ;;  %v2606_v20 = vsub.f32 %v9210_v13, %v11700_v51  ;;  %v12378_v53 = vand.u32 4294901760, %v9214_v1  ;;  %v12379_v43 = vand.u32 4294901760, %v9149_v15  ;;  %2593 = vmatmul.mubr.f32.vlgmr.msra.gmra.mxu0 %v2592_v49 }
 0x175   : > { %6300 = vmatpush3.msra.mxu1 %v12377_v21  ;;  %v2851_v31 = vand.u32 4294901760, %v9252_v3  ;;  %v12380_v32 = vand.u32 4294901760, %v9161_v40  ;;  %v9312_v21 = vsub.f32 %v259_v59, %v9270_v16  ;;  %v5794_v51 = vadd.f32 %v5793_v9, %v5792_v0  ;;  %v5831_v17 = vpop.f32.mrf.mxu0  ;;  %6323 = vmatprep.subr.mxu0 %v8720_v18 }
 0x176   : > { %v2857_v2 = vsub.f32 %v9214_v1, %v12378_v53  ;;  %6301 = vmatprep.subr.mxu1 %v12379_v43  ;;  %v2601_v53 = vand.u32 4294901760, %v2600_v7  ;;  %v2864_v15 = vsub.f32 %v9237_v60, %v11701_v36  ;;  %v2615_v43 = vsub.f32 %v9240_v54, %v11705_v30  ;;  %6324 = vmatpush3.msra.mxu0 %v8726_v63  ;;  %v5871_v49 = vpop.f32.mrf.mxu1  ;;  %v12399_v30 = vld [vmem:[#allocation34_spill] sm:$0xff] }
 0x177   : > { %v2745_v42 = vsub.f32 %v9161_v40, %v12380_v32  ;;  %6302 = vmatpush3.msra.mxu1 %v2725_v52  ;;  %v11704_v3 = vand.u32 4294901760, %v9283_v33  ;;  %v2739_v59 = vand.u32 4294901760, %v9261_v39  ;;  %v9323_v0 = vsub.f32 %v258_v55, %v9289_v10  ;;  %6325 = vmatprep.subr.mxu0 %v8729_v56 }
 0x178   : > { %6303 = vmatprep.subr.mxu1 %v2844_v6  ;;  %v833_v52 = vadd.f32 %v5794_v51, %v580_v35  ;;  %v5832_v57 = vadd.f32 %v5831_v17, %v5830_v48  ;;  %v2607_v7 = vand.u32 4294901760, %v2606_v20  ;;  %v2858_v9 = vand.u32 4294901760, %v2857_v2  ;;  %2602 = vmatprep.mubr.f32.mxu0 %v2601_v53  ;;  %v5872_v17 = vpop.f32.mrf.mxu1 }
 0x179   : > { %6304 = vmatpush3.msra.mxu1 %v2732_v45  ;;  %v12381_v32 = vand.u32 4294901760, %v9180_v22  ;;  %v2746_v6 = vand.u32 4294901760, %v2745_v42  ;;  %v11703_v39 = vand.u32 4294901760, %v9312_v21  ;;  %v2865_v51 = vand.u32 4294901760, %v2864_v15  ;;  %v5833_v45 = vpop.f32.mrf.mxu0  ;;  %6326 = vmatpush3.msra.mxu0 %v8746_v4  ;;  %v12382_v15 = vld [vmem:[#allocation20_spill] sm:$0xff] }
 0x17a   : > { %6305 = vmatprep.subr.mxu1 %v2851_v31  ;;  %v980_v55 = vadd.f32 %v5832_v57, %v9198_v23  ;;  %v2621_v35 = vsub.f32 %v9283_v33, %v11704_v3  ;;  %v2616_v20 = vand.u32 4294901760, %v2615_v43  ;;  %v11702_v2 = vand.u32 4294901760, %v9323_v0  ;;  %2608 = vmatmul.mubr.f32.gmra.mxu0 %v2607_v7  ;;  %v12383_v57 = vld [vmem:[#allocation22_spill] sm:$0xff] }
 0x17b   : > { %v2752_v36 = vsub.f32 %v9180_v22, %v12381_v32  ;;  %6306 = vmatpush3.msra.mxu1 %v2739_v59  ;;  %v5834_v48 = vpop.f32.mrf.mxu0  ;;  %v5873_v31 = vadd.f32 %v5872_v17, %v5871_v49  ;;  %6327 = vmatprep.subr.mxu0 %v8760_v34  ;;  %v2630_v42 = vsub.f32 %v9312_v21, %v11703_v39  ;;  %v12385_v49 = vld [vmem:[#allocation55_spill] sm:$0xff]  ;;  %v12387_v17 = vld [vmem:[#allocation33_spill] sm:$0xff]  ;;  %v12391_v39 = vld [vmem:[#allocation14_spill] sm:$0xff] }
 0x17c   : > { %6307 = vmatprep.subr.mxu1 %v2858_v9  ;;  %v5835_v53 = vadd.f32 %v5834_v48, %v5833_v45  ;;  %6328 = vmatpush3.msra.mxu0 %v12382_v15  ;;  %v2622_v43 = vand.u32 4294901760, %v2621_v35  ;;  %v12386_v35 = vld [vmem:[#allocation41_spill] sm:$0xff] }
 0x17d   : > { %v2753_v23 = vand.u32 4294901760, %v2752_v36  ;;  %6308 = vmatpush3.msra.mxu1 %v2746_v6  ;;  %v9343_v59 = vadd.f32 %v5873_v31, %v971_v28  ;;  %6329 = vmatprep.subr.mxu0 %v12383_v57  ;;  %v2636_v36 = vsub.f32 %v9323_v0, %v11702_v2  ;;  %v5836_v9 = vpop.f32.mrf.mxu0  ;;  %v5874_v32 = vpop.f32.mrf.mxu1  ;;  %v12384_v6 = vld [vmem:[#allocation23_spill] sm:$0xff]  ;;  %v2631_v28 = vand.u32 4294901760, %v2630_v42  ;;  %v12388_v48 = vld [vmem:[#allocation25_spill] sm:$0xff]  ;;  %v12389_v31 = vld [vmem:[#allocation38_spill] sm:$0xff] }
 0x17e   : > { %6309 = vmatprep.subr.mxu1 %v2865_v51  ;;  %2617 = vmatprep.mubr.f32.mxu0 %v2616_v20  ;;  %v989_v7 = vadd.f32 %v5835_v53, %v9272_v47  ;;  %v12390_v53 = vld [vmem:[#allocation30_spill] sm:$0xff] }
 0x17f   : > { %6310 = vmatpush3.msra.mxu1 %v2753_v23  ;;  %6330 = vmatpush3.msra.mxu0 %v12384_v6  ;;  %v5837_v51 = vpop.f32.mrf.mxu0  ;;  %v5875_v20 = vpop.f32.mrf.mxu1  ;;  %v2637_v47 = vand.u32 4294901760, %v2636_v36 }
 0x180   : > { %2870 = vmatmul.mubr.f32.vlgmr.msra.gmra.mxu1 %v12385_v49  ;;  %2623 = vmatmul.mubr.f32.gmra.mxu0 %v2622_v43  ;;  %v5838_v45 = vadd.f32 %v5837_v51, %v5836_v9  ;;  %v5876_v23 = vadd.f32 %v5875_v20, %v5874_v32  ;;  %v12392_v9 = vld [vmem:[#allocation29_spill] sm:$0xff]  ;;  %v12393_v51 = vld [vmem:[#allocation18_spill] sm:$0xff]  ;;  %v12394_v32 = vld [vmem:[#allocation27_spill] sm:$0xff] }
 0x181   : > { %6331 = vmatprep.subr.mxu0 %v12386_v35  ;;  %6367 = vmatprep.subr.mxu1 %v12387_v17  ;;  %v12403_v49 = vld [vmem:[#allocation13_spill] sm:$0xff] }
 0x182   : > { %6332 = vmatpush3.msra.mxu0 %v12388_v48  ;;  %6368 = vmatpush3.msra.mxu1 %v12389_v31  ;;  %v998_v2 = vadd.f32 %v5838_v45, %v833_v52  ;;  %v9359_v42 = vadd.f32 %v5876_v23, %v980_v55  ;;  %v5877_v43 = vpop.f32.mrf.mxu1  ;;  %v12395_v52 = vld [vmem:[#allocation12_spill] sm:$0xff]  ;;  %v12397_v55 = vld [vmem:[#allocation19_spill] sm:$0xff] }
 0x183   : > { %6333 = vmatprep.subr.mxu0 %v12390_v53  ;;  %6369 = vmatprep.subr.mxu1 %v12391_v39  ;;  %v12396_v45 = vld [vmem:[#allocation48_spill] sm:$0xff] }
 0x184   : > { %2632 = vmatprep.mubr.f32.mxu0 %v2631_v28  ;;  %2875 = vmatprep.mubr.f32.mxu1 %v9141_v19  ;;  %v5878_v36 = vpop.f32.mrf.mxu1  ;;  %v12398_v28 = vld [vmem:[#allocation46_spill] sm:$0xff] }
 0x185   : > { %6334 = vmatpush3.msra.mxu0 %v12392_v9  ;;  %6370 = vmatpush3.msra.mxu1 %v12393_v51  ;;  %v5879_v20 = vadd.f32 %v5878_v36, %v5877_v43  ;;  %v12402_v36 = vld [vmem:[#allocation51_spill] sm:$0xff] }
 0x186   : > { %2638 = vmatmul.mubr.f32.gmra.mxu0 %v2637_v47  ;;  %2877 = vmatmul.mubr.f32.gmra.mxu1 %v9169_v44  ;;  %v12400_v47 = vld [vmem:[#allocation47_spill] sm:$0xff] }
 0x187   : > { %6335 = vmatprep.subr.mxu0 %v12394_v32  ;;  %6371 = vmatprep.subr.mxu1 %v12395_v52  ;;  %v9370_v23 = vadd.f32 %v5879_v20, %v989_v7  ;;  %v5880_v3 = vpop.f32.mrf.mxu1  ;;  %v12401_v44 = vld [vmem:[#allocation15_spill] sm:$0xff]  ;;  %v12405_v7 = vld [vmem:[#allocation21_spill] sm:$0xff]  ;;  %v12406_v20 = vld [vmem:[#allocation50_spill] sm:$0xff] }
 0x188   : > { %6336 = vmatpush3.msra.mxu0 %v12396_v45  ;;  %6372 = vmatpush3.msra.mxu1 %v12397_v55 }
 0x189   : > { %6337 = vmatprep.subr.mxu0 %v12398_v28  ;;  %6373 = vmatprep.subr.mxu1 %v12399_v30  ;;  %v5881_v43 = vpop.f32.mrf.mxu1 }
 0x18a   : > { %2882 = vmatprep.mubr.f32.mxu1 %v9185_v11  ;;  %6338 = vmatpush3.msra.mxu0 %v12400_v47  ;;  %v5882_v19 = vadd.f32 %v5881_v43, %v5880_v3  ;;  %v12407_v11 = vld [vmem:[#allocation32_spill] sm:$0xff]  ;;  %v12410_v3 = vld [vmem:[#allocation39_spill] sm:$0xff] }
 0x18b   : > { %6374 = vmatpush3.msra.mxu1 %v12401_v44  ;;  %6339 = vmatprep.subr.mxu0 %v12402_v36  ;;  %v12408_v44 = vld [vmem:[#allocation16_spill] sm:$0xff] }
 0x18c   : > { %2884 = vmatmul.mubr.f32.gmra.mxu1 %v9242_v5  ;;  %6375 = vmatprep.subr.mxu1 %v12403_v49  ;;  %v9382_v30 = vadd.f32 %v5882_v19, %v998_v2  ;;  %v12409_v5 = vld [vmem:[#allocation40_spill] sm:$0xff]  ;;  %v12414_v19 = vld [vmem:[#allocation45_spill] sm:$0xff] }
 0x18d   : > { %6340 = vmatpush3.msra.mxu0 %v12404_v27  ;;  %6376 = vmatpush3.msra.mxu1 %v12405_v7  ;;  %v12411_v43 = vld [vmem:[#allocation24_spill] sm:$0xff]  ;;  %v12413_v7 = vld [vmem:[#allocation26_spill] sm:$0xff] }
 0x18e   : > { %6341 = vmatprep.subr.mxu0 %v12406_v20  ;;  %6377 = vmatprep.subr.mxu1 %v12407_v11  ;;  %v12412_v27 = vld [vmem:[#allocation44_spill] sm:$0xff] }
 0x18f   : > { %2889 = vmatprep.mubr.f32.mxu1 %v9270_v16  ;;  %6342 = vmatpush3.msra.mxu0 %v12408_v44  ;;  %v12415_v2 = vld [vmem:[#allocation28_spill] sm:$0xff]  ;;  %v12416_v16 = vld [vmem:[#allocation37_spill] sm:$0xff] }
 0x190   : > { %6378 = vmatpush3.msra.mxu1 %v12409_v5  ;;  %6343 = vmatprep.subr.mxu0 %v12410_v3  ;;  %v12417_v5 = vld [vmem:[#allocation36_spill] sm:$0xff] }
 0x191   : > { %2891 = vmatmul.mubr.f32.gmra.mxu1 %v9289_v10  ;;  %6379 = vmatprep.subr.mxu1 %v12411_v43  ;;  %v12418_v43 = vld [vmem:[#allocation43_spill] sm:$0xff] }
 0x192   : > { %6344 = vmatpush3.msra.mxu0 %v12412_v27  ;;  %6380 = vmatpush3.msra.mxu1 %v12413_v7  ;;  %v12419_v7 = vld [vmem:[#allocation53_spill] sm:$0xff] }
 0x193   : > { %6345 = vmatprep.subr.mxu0 %v12414_v19  ;;  %6381 = vmatprep.subr.mxu1 %v12415_v2  ;;  %v12420_v19 = vld [vmem:[#allocation31_spill] sm:$0xff] }
 0x194   : > { %6346 = vmatpush3.msra.mxu0 %v9059_v38  ;;  %6382 = vmatpush3.msra.mxu1 %v12416_v16  ;;  %v5915_v10 = vpop.f32.mrf.mxu0 }
 0x195   : > { %6347 = vmatprep.subr.mxu0 %v9115_v25  ;;  %6383 = vmatprep.subr.mxu1 %v12417_v5 }
 0x196   : > { %6348 = vmatpush3.msra.mxu0 %v9084_v26  ;;  %6384 = vmatpush3.msra.mxu1 %v12418_v43  ;;  %v5916_v2 = vpop.f32.mrf.mxu0 }
 0x197   : > { %6349 = vmatprep.subr.mxu0 %v9153_v12  ;;  %6385 = vmatprep.subr.mxu1 %v12419_v7  ;;  %v5917_v16 = vadd.f32 %v5916_v2, %v5915_v10  ;;  %v12423_v2 = vld [vmem:[#allocation59_spill] sm:$0xff] }
 0x198   : > { %6350 = vmatpush3.msra.mxu0 %v9121_v58  ;;  %6386 = vmatpush3.msra.mxu1 %v12420_v19  ;;  %v12421_v58 = vld [vmem:[#allocation57_spill] sm:$0xff]  ;;  %v12422_v19 = vld [vmem:[#allocation56_spill] sm:$0xff] }
 0x199   : > { %6351 = vmatprep.subr.mxu0 %v9214_v1  ;;  %6387 = vmatprep.subr.mxu1 %v8938_v50  ;;  %v1307_v12 = vadd.f32 %v5917_v16, %v9343_v59  ;;  %v5918_v43 = vpop.f32.mrf.mxu0  ;;  %v12424_v50 = vld [vmem:[#allocation52_spill] sm:$0xff]  ;;  %v12427_v16 = vand.u32 4294901760, %v8726_v63 }
 0x19a   : > { %6352 = vmatpush3.msra.mxu0 %v9161_v40  ;;  %6388 = vmatpush3.msra.mxu1 %v8975_v61  ;;  %v12425_v61 = vand.u32 4294901760, %v8720_v18  ;;  %v12429_v18 = vand.u32 4294901760, %v8746_v4 }
 0x19b   : > { %6353 = vmatprep.subr.mxu0 %v9237_v60  ;;  %6389 = vmatprep.subr.mxu1 %v8996_v62  ;;  %v5919_v10 = vpop.f32.mrf.mxu0  ;;  %v12426_v60 = vld [vmem:[#allocation42_spill] sm:$0xff] }
 0x19c   : > { %6354 = vmatpush3.msra.mxu0 %v9180_v22  ;;  %3026 = vmatprep.mubr.f32.mxu0 %v12421_v58  ;;  %v5920_v40 = vadd.f32 %v5919_v10, %v5918_v43 }
 0x19d   : > { %6390 = vmatpush3.msra.mxu1 %v12422_v19  ;;  %3029 = vmatmul.mubr.f32.vlgmr.msra.gmra.mxu0 %v12423_v2  ;;  %v12428_v19 = vand.u32 4294901760, %v8729_v56 }
 0x19e   : > { %6391 = vmatprep.subr.mxu1 %v12424_v50  ;;  %6411 = vmatprep.subr.mxu0 %v12425_v61  ;;  %v1314_v59 = vadd.f32 %v5920_v40, %v9359_v42  ;;  %v5959_v22 = vpop.f32.mrf.mxu1  ;;  %v12430_v40 = vand.u32 4294901760, %v8760_v34  ;;  %v12431_v42 = vand.u32 4294901760, %v12382_v15  ;;  %v12433_v34 = vand.u32 4294901760, %v12421_v58 }
 0x19f   : > { %6392 = vmatpush3.msra.mxu1 %v12426_v60  ;;  %6412 = vmatpush3.msra.mxu0 %v12427_v16  ;;  %v5921_v50 = vpop.f32.mrf.mxu0  ;;  %v12434_v15 = vand.u32 4294901760, %v12384_v6  ;;  %v12437_v58 = vand.u32 4294901760, %v12388_v48  ;;  %v12438_v6 = vand.u32 4294901760, %v12390_v53  ;;  %v12440_v48 = vand.u32 4294901760, %v12392_v9 }
 0x1a0   : > { %6393 = vmatprep.subr.mxu1 %v9087_v37  ;;  %6413 = vmatprep.subr.mxu0 %v12428_v19  ;;  %v5960_v61 = vpop.f32.mrf.mxu1  ;;  %v12432_v19 = vand.u32 4294901760, %v12383_v57  ;;  %v12436_v57 = vand.u32 4294901760, %v12386_v35  ;;  %v12444_v9 = vand.u32 4294901760, %v12398_v28  ;;  %v12449_v28 = vand.u32 4294901760, %v9283_v33 }
 0x1a1   : > { %3035 = vmatprep.mubr.f32.mxu0 %v9183_v29  ;;  %6394 = vmatpush3.msra.mxu1 %v9073_v8  ;;  %v5922_v63 = vpop.f32.mrf.mxu0  ;;  %v5961_v43 = vadd.f32 %v5960_v61, %v5959_v22 }
 0x1a2   : > { %6414 = vmatpush3.msra.mxu0 %v12429_v18  ;;  %6395 = vmatprep.subr.mxu1 %v9109_v41  ;;  %v5923_v56 = vadd.f32 %v5922_v63, %v5921_v50 }
 0x1a3   : > { %3038 = vmatmul.mubr.f32.gmra.mxu0 %v9210_v13  ;;  %6415 = vmatprep.subr.mxu0 %v12430_v40  ;;  %v9438_v4 = vadd.f32 %v5961_v43, %v1307_v12  ;;  %v12435_v12 = vand.u32 4294901760, %v12423_v2  ;;  %v12445_v40 = vld [vmem:[#allocation34_spill] sm:$0xff] }
 0x1a4   : > { %6396 = vmatpush3.msra.mxu1 %v9111_v24  ;;  %6416 = vmatpush3.msra.mxu0 %v12431_v42  ;;  %v1321_v22 = vadd.f32 %v5923_v56, %v9370_v23  ;;  %v5924_v10 = vpop.f32.mrf.mxu0  ;;  %v390_v56 = vld [vmem:[#allocation6 + $0x3f0] sm:$0xff] }
 0x1a5   : > { %6397 = vmatprep.subr.mxu1 %v9137_v46  ;;  %6417 = vmatprep.subr.mxu0 %v12432_v19  ;;  %v5962_v50 = vpop.f32.mrf.mxu1  ;;  %v12450_v19 = vand.u32 4294901760, %v12402_v36  ;;  %v389_v36 = vld [vmem:[#allocation6 + $0x3e8] sm:$0xff] }
 0x1a6   : > { %3044 = vmatprep.mubr.f32.mxu0 %v9240_v54  ;;  %6398 = vmatpush3.msra.mxu1 %v9139_v14  ;;  %v5925_v16 = vpop.f32.mrf.mxu0 }
 0x1a7   : > { %3160 = vmatprep.mubr.f32.mxu1 %v12433_v34  ;;  %6418 = vmatpush3.msra.mxu0 %v12434_v15  ;;  %v5926_v23 = vadd.f32 %v5925_v16, %v5924_v10  ;;  %v5963_v18 = vpop.f32.mrf.mxu1  ;;  %v12456_v15 = vand.u32 4294901760, %v12406_v20 }
 0x1a8   : > { %3164 = vmatmul.mubr.f32.vlgmr.msra.gmra.mxu1 %v12435_v12  ;;  %3047 = vmatmul.mubr.f32.gmra.mxu0 %v9283_v33  ;;  %v5964_v61 = vadd.f32 %v5963_v18, %v5962_v50  ;;  %v12455_v50 = vld [vmem:[#allocation21_spill] sm:$0xff]  ;;  %v9503_v33 = vand.u32 4294901760, %v390_v56  ;;  %v12461_v18 = vld [vmem:[#allocation40_spill] sm:$0xff] }
 0x1a9   : > { %6419 = vmatprep.subr.mxu0 %v12436_v57  ;;  %6455 = vmatprep.subr.mxu1 %v12387_v17  ;;  %v1328_v2 = vadd.f32 %v5926_v23, %v9382_v30  ;;  %v5965_v63 = vpop.f32.mrf.mxu1  ;;  %v12439_v17 = vand.u32 4294901760, %v9183_v29  ;;  %v12441_v30 = vand.u32 4294901760, %v9210_v13  ;;  %v12443_v29 = vand.u32 4294901760, %v12396_v45  ;;  %v12448_v45 = vld [vmem:[#allocation15_spill] sm:$0xff] }
 0x1aa   : > { %6420 = vmatpush3.msra.mxu0 %v12437_v58  ;;  %6456 = vmatpush3.msra.mxu1 %v12389_v31  ;;  %v9463_v35 = vadd.f32 %v5964_v61, %v1314_v59  ;;  %v375_v59 = vld [vmem:[#allocation6 + $0x378] sm:$0xff]  ;;  %12457 = vst [vmem:[#allocation23_spill] sm:$0xff] %v9503_v33  ;;  %v12459_v57 = vand.u32 4294901760, %v9312_v21  ;;  %v12460_v23 = vand.u32 4294901760, %v12408_v44  ;;  %v12462_v61 = vand.u32 4294901760, %v9323_v0 }
 0x1ab   : > { %6421 = vmatprep.subr.mxu0 %v12438_v6  ;;  %6457 = vmatprep.subr.mxu1 %v12391_v39  ;;  %v5966_v31 = vpop.f32.mrf.mxu1  ;;  %v12442_v39 = vand.u32 4294901760, %v12394_v32  ;;  %v12446_v32 = vand.u32 4294901760, %v9240_v54  ;;  %v9495_v10 = vand.u32 4294901760, %v375_v59  ;;  %v12465_v6 = vld [vmem:[#allocation24_spill] sm:$0xff]  ;;  %v12466_v44 = vand.u32 4294901760, %v12412_v27 }
 0x1ac   : > { %3053 = vmatprep.mubr.f32.mxu0 %v9312_v21  ;;  %3171 = vmatprep.mubr.f32.mxu1 %v12439_v17  ;;  %v5967_v53 = vadd.f32 %v5966_v31, %v5965_v63  ;;  %v9525_v21 = vand.u32 4294901760, %v389_v36  ;;  %v372_v17 = vld [vmem:[#allocation6 + $0x360] sm:$0xff]  ;;  %v12472_v27 = vand.u32 4294901760, %v9059_v38  ;;  %v12476_v38 = vand.u32 4294901760, %v9084_v26 }
 0x1ad   : > { %6422 = vmatpush3.msra.mxu0 %v12440_v48  ;;  %6458 = vmatpush3.msra.mxu1 %v12393_v51  ;;  %v391_v51 = vld [vmem:[#allocation6 + $0x3f8] sm:$0xff]  ;;  %12452 = vst [vmem:[#allocation22_spill] sm:$0xff] %v9495_v10  ;;  %v9516_v20 = vsub.f32 %v375_v59, %v9495_v10  ;;  %v9536_v48 = vsub.f32 %v390_v56, %v9503_v33  ;;  %v12473_v59 = vld [vmem:[#allocation37_spill] sm:$0xff] }
 0x1ae   : > { %3056 = vmatmul.mubr.f32.gmra.mxu0 %v9323_v0  ;;  %3175 = vmatmul.mubr.f32.gmra.mxu1 %v12441_v30  ;;  %v9481_v43 = vadd.f32 %v5967_v53, %v1321_v22  ;;  %v5968_v13 = vpop.f32.mrf.mxu1  ;;  %v9493_v22 = vand.u32 4294901760, %v391_v51  ;;  %12464 = vst [vmem:[#allocation33_spill] sm:$0xff] %v9525_v21  ;;  %v12468_v0 = vld [vmem:[#allocation26_spill] sm:$0xff]  ;;  %v388_v30 = vld [vmem:[#allocation6 + $0x3e0] sm:$0xff]  ;;  %v387_v53 = vld [vmem:[#allocation6 + $0x3d8] sm:$0xff] }
 0x1af   : > { %6423 = vmatprep.subr.mxu0 %v12442_v39  ;;  %6459 = vmatprep.subr.mxu1 %v12395_v52  ;;  %v12447_v52 = vand.u32 4294901760, %v12400_v47  ;;  %v12453_v47 = vld [vmem:[#allocation54_spill] sm:$0xff]  ;;  %v12471_v39 = vld [vmem:[#allocation28_spill] sm:$0xff]  ;;  %v9560_v56 = vand.u32 4294901760, %v388_v30 }
 0x1b0   : > { %6424 = vmatpush3.msra.mxu0 %v12443_v29  ;;  %6460 = vmatpush3.msra.mxu1 %v12397_v55  ;;  %v374_v55 = vld [vmem:[#allocation6 + $0x370] sm:$0xff]  ;;  %v5969_v42 = vpop.f32.mrf.mxu1  ;;  %12451 = vst [vmem:[#allocation20_spill] sm:$0xff] %v9493_v22  ;;  %v12454_v34 = vand.u32 4294901760, %v12453_v47  ;;  %v9519_v58 = vsub.f32 %v391_v51, %v9493_v22  ;;  %v11730_v51 = vand.u32 4294901760, %v9516_v20 }
 0x1b1   : > { %6425 = vmatprep.subr.mxu0 %v12444_v9  ;;  %6461 = vmatprep.subr.mxu1 %v12445_v40  ;;  %v5970_v54 = vadd.f32 %v5969_v42, %v5968_v13  ;;  %v9505_v12 = vand.u32 4294901760, %v374_v55  ;;  %v371_v9 = vld [vmem:[#allocation6 + $0x358] sm:$0xff]  ;;  %v12474_v13 = vand.u32 4294901760, %v9115_v25  ;;  %v9549_v40 = vand.u32 4294901760, %v372_v17  ;;  %12477 = vst [vmem:[#allocation30_spill] sm:$0xff] %v9560_v56  ;;  %v370_v25 = vld [vmem:[#allocation6 + $0x350] sm:$0xff] }
 0x1b2   : > { %3182 = vmatprep.mubr.f32.mxu1 %v12446_v32  ;;  %6426 = vmatpush3.msra.mxu0 %v12447_v52  ;;  %v11732_v29 = vand.u32 4294901760, %v9519_v58  ;;  %v386_v32 = vld [vmem:[#allocation6 + $0x3d0] sm:$0xff]  ;;  %v9552_v52 = vsub.f32 %v389_v36, %v9525_v21  ;;  %v9569_v26 = vand.u32 4294901760, %v371_v9  ;;  %v9582_v36 = vsub.f32 %v9516_v20, %v11730_v51 }
 0x1b3   : > { %6462 = vmatpush3.msra.mxu1 %v12448_v45  ;;  %6427 = vmatprep.subr.mxu0 %v12450_v19  ;;  %12458 = vst [vmem:[#allocation41_spill] sm:$0xff] %v9505_v12  ;;  %v9507_v16 = vadd.f32 %v5970_v54, %v1328_v2  ;;  %v9531_v2 = vsub.f32 %v374_v55, %v9505_v12  ;;  %12475 = vst [vmem:[#allocation38_spill] sm:$0xff] %v9549_v40  ;;  %v11729_v55 = vand.u32 4294901760, %v9536_v48  ;;  %v12478_v19 = vld [vmem:[#allocation43_spill] sm:$0xff]  ;;  %v12479_v54 = vld [vmem:[#allocation61_spill] sm:$0xff] }
 0x1b4   : > { %3186 = vmatmul.mubr.f32.gmra.mxu1 %v12449_v28  ;;  %6463 = vmatprep.subr.mxu1 %v12403_v49  ;;  %v373_v49 = vld [vmem:[#allocation6 + $0x368] sm:$0xff]  ;;  %v12480_v47 = vand.u32 4294901760, %v12479_v54  ;;  %12482 = vst [vmem:[#allocation29_spill] sm:$0xff] %v9569_v26  ;;  %v9616_v54 = vsub.f32 %v371_v9, %v9569_v26 }
 0x1b5   : > { %6428 = vmatpush3.msra.mxu0 %v12454_v34  ;;  %6464 = vmatpush3.msra.mxu1 %v12455_v50  ;;  %v9533_v63 = vand.u32 4294901760, %v373_v49  ;;  %v11728_v42 = vand.u32 4294901760, %v9531_v2  ;;  %v12483_v34 = vld [vmem:[#allocation58_spill] sm:$0xff] }
 0x1b6   : > { %6429 = vmatprep.subr.mxu0 %v12456_v15  ;;  %6465 = vmatprep.subr.mxu1 %v12407_v11  ;;  %v12463_v11 = vand.u32 4294901760, %v12410_v3  ;;  %v12469_v3 = vld [vmem:[#allocation45_spill] sm:$0xff]  ;;  %v12484_v50 = vand.u32 4294901760, %v12483_v34  ;;  %v9577_v15 = vsub.f32 %v9519_v58, %v11732_v29  ;;  %12497 = vst [vmem:[#allocation19_spill] sm:$0xff] %v9616_v54  ;;  %v11746_v51 = vand.u32 4294901760, %v9616_v54 }
 0x1b7   : > { %3193 = vmatprep.mubr.f32.mxu1 %v12459_v57  ;;  %6430 = vmatpush3.msra.mxu0 %v12460_v23  ;;  %12467 = vst [vmem:[#allocation25_spill] sm:$0xff] %v9533_v63  ;;  %v12470_v31 = vand.u32 4294901760, %v12469_v3  ;;  %v9558_v45 = vsub.f32 %v373_v49, %v9533_v63  ;;  %v9584_v57 = vand.u32 4294901760, %v386_v32  ;;  %v12486_v23 = vld [vmem:[#allocation31_spill] sm:$0xff]  ;;  %v12491_v3 = vld [vmem:[#allocation62_spill] sm:$0xff] }
 0x1b8   : > { %6466 = vmatpush3.msra.mxu1 %v12461_v18  ;;  %6431 = vmatprep.subr.mxu0 %v12463_v11  ;;  %v9590_v18 = vsub.f32 %v372_v17, %v9549_v40  ;;  %v385_v11 = vld [vmem:[#allocation6 + $0x3c8] sm:$0xff] }
 0x1b9   : > { %3197 = vmatmul.mubr.f32.gmra.mxu1 %v12462_v61  ;;  %6467 = vmatprep.subr.mxu1 %v12465_v6  ;;  %12485 = vst [vmem:[#allocation18_spill] sm:$0xff] %v9584_v57  ;;  %v9592_v61 = vand.u32 4294901760, %v370_v25  ;;  %v11727_v6 = vand.u32 4294901760, %v9552_v52  ;;  %v369_v17 = vld [vmem:[#allocation6 + $0x348] sm:$0xff]  ;;  %v9632_v9 = vsub.f32 %v386_v32, %v9584_v57  ;;  %v12508_v32 = vld [vmem:[#allocation55_spill] sm:$0xff] }
 0x1ba   : > { %6432 = vmatpush3.msra.mxu0 %v12466_v44  ;;  %6468 = vmatpush3.msra.mxu1 %v12468_v0  ;;  %12488 = vst [vmem:[#allocation27_spill] sm:$0xff] %v9590_v18  ;;  %v12490_v0 = vld [vmem:[#allocation35_spill] sm:$0xff] }
 0x1bb   : > { %6433 = vmatprep.subr.mxu0 %v12470_v31  ;;  %6469 = vmatprep.subr.mxu1 %v12471_v39  ;;  %12489 = vst [vmem:[#allocation12_spill] sm:$0xff] %v9592_v61  ;;  %v12492_v31 = vand.u32 4294901760, %v12491_v3  ;;  %v9601_v39 = vsub.f32 %v9536_v48, %v11729_v55  ;;  %12502 = vst [vmem:[#allocation51_spill] sm:$0xff] %v9632_v9  ;;  %v12504_v3 = vld [vmem:[#allocation56_spill] sm:$0xff]  ;;  %v383_v55 = vld [vmem:[#allocation6 + $0x3b8] sm:$0xff] }
 0x1bc   : > { %6434 = vmatpush3.msra.mxu0 %v12472_v27  ;;  %6470 = vmatpush3.msra.mxu1 %v12473_v59  ;;  %v11731_v27 = vand.u32 4294901760, %v9558_v45  ;;  %v384_v59 = vld [vmem:[#allocation6 + $0x3c0] sm:$0xff] }
 0x1bd   : > { %6435 = vmatprep.subr.mxu0 %v12474_v13  ;;  %6471 = vmatprep.subr.mxu1 %v12417_v5  ;;  %v6003_v28 = vpop.f32.mrf.mxu0  ;;  %v9567_v5 = vand.u32 4294901760, %v387_v53  ;;  %v9610_v13 = vsub.f32 %v388_v30, %v9560_v56 }
 0x1be   : > { %6436 = vmatpush3.msra.mxu0 %v12476_v38  ;;  %6472 = vmatpush3.msra.mxu1 %v12478_v19  ;;  %v12494_v38 = vld [vmem:[#allocation17_spill] sm:$0xff] }
 0x1bf   : > { %6437 = vmatprep.subr.mxu0 %v12480_v47  ;;  %12481 = vst [vmem:[#allocation14_spill] sm:$0xff] %v9567_v5  ;;  %6473 = vmatprep.subr.mxu1 %v12419_v7  ;;  %v6004_v49 = vpop.f32.mrf.mxu0  ;;  %v12487_v7 = vand.u32 4294901760, %v9214_v1  ;;  %v9606_v1 = vsub.f32 %v9531_v2, %v11728_v42  ;;  %12493 = vst [vmem:[#allocation48_spill] sm:$0xff] %v9610_v13  ;;  %v9619_v47 = vsub.f32 %v387_v53, %v9567_v5  ;;  %v12503_v53 = vld [vmem:[#allocation49_spill] sm:$0xff] }
 0x1c0   : > { %6438 = vmatpush3.msra.mxu0 %v12484_v50  ;;  %6474 = vmatpush3.msra.mxu1 %v12486_v23  ;;  %v6005_v44 = vadd.f32 %v6004_v49, %v6003_v28  ;;  %v12495_v28 = vld [vmem:[#allocation66_spill] sm:$0xff]  ;;  %v12499_v49 = vld [vmem:[#allocation64_spill] sm:$0xff]  ;;  %v12516_v23 = vld [vmem:[#allocation63_spill] sm:$0xff] }
 0x1c1   : > { %6439 = vmatprep.subr.mxu0 %v12487_v7  ;;  %6475 = vmatprep.subr.mxu1 %v12490_v0  ;;  %v12496_v19 = vand.u32 4294901760, %v12495_v28  ;;  %12498 = vst [vmem:[#allocation46_spill] sm:$0xff] %v9619_v47  ;;  %v12500_v30 = vand.u32 4294901760, %v12499_v49  ;;  %v9629_v0 = vand.u32 4294901760, %v385_v11  ;;  %v11733_v49 = vand.u32 4294901760, %v9610_v13 }
 0x1c2   : > { %6440 = vmatpush3.msra.mxu0 %v12492_v31  ;;  %6476 = vmatpush3.msra.mxu1 %v12494_v38  ;;  %v9622_v34 = vadd.f32 %v6005_v44, %v9438_v4  ;;  %v9637_v4 = vsub.f32 %v370_v25, %v9592_v61  ;;  %v9644_v44 = vand.u32 4294901760, %v369_v17  ;;  %v9646_v31 = vand.u32 4294901760, %v384_v59  ;;  %v368_v38 = vld [vmem:[#allocation6 + $0x340] sm:$0xff] }
 0x1c3   : > { %6441 = vmatprep.subr.mxu0 %v12496_v19  ;;  %v6006_v50 = vpop.f32.mrf.mxu0  ;;  %6477 = vmatprep.subr.mxu1 %v8996_v62  ;;  %12501 = vst [vmem:[#allocation47_spill] sm:$0xff] %v9629_v0  ;;  %v9642_v62 = vsub.f32 %v9552_v52, %v11727_v6  ;;  %v12509_v19 = vld [vmem:[#allocation52_spill] sm:$0xff]  ;;  %v9653_v25 = vsub.f32 %v9558_v45, %v11731_v27  ;;  %v9665_v27 = vand.u32 4294901760, %v368_v38  ;;  %v9697_v7 = vand.u32 4294901760, %v383_v55 }
 0x1c4   : > { %6442 = vmatpush3.msra.mxu0 %v12500_v30  ;;  %3363 = vmatprep.mubr.f32.mxu0 %v12503_v53  ;;  %12505 = vst [vmem:[#allocation13_spill] sm:$0xff] %v9637_v4  ;;  %12506 = vst [vmem:[#allocation50_spill] sm:$0xff] %v9644_v44  ;;  %v11734_v30 = vand.u32 4294901760, %v9590_v18  ;;  %v12512_v6 = vld [vmem:[#allocation60_spill] sm:$0xff] }
 0x1c5   : > { %6478 = vmatpush3.msra.mxu1 %v12504_v3  ;;  %12507 = vst [vmem:[#allocation32_spill] sm:$0xff] %v9646_v31  ;;  %v6007_v28 = vpop.f32.mrf.mxu0  ;;  %3365 = vmatmul.mubr.f32.vlgmr.msra.gmra.mxu0 %v12508_v32  ;;  %12510 = vst [vmem:[#allocation16_spill] sm:$0xff] %v9665_v27 }
 0x1c6   : > { %6479 = vmatprep.subr.mxu1 %v12509_v19  ;;  %v6008_v3 = vadd.f32 %v6007_v28, %v6006_v50  ;;  %6499 = vmatprep.subr.mxu0 %v9493_v22  ;;  %v11739_v19 = vand.u32 4294901760, %v9619_v47  ;;  %v367_v50 = vld [vmem:[#allocation6 + $0x338] sm:$0xff]  ;;  %v9682_v28 = vsub.f32 %v384_v59, %v9646_v31  ;;  %12515 = vst [vmem:[#allocation53_spill] sm:$0xff] %v9697_v7  ;;  %v366_v22 = vld [vmem:[#allocation6 + $0x330] sm:$0xff] }
 0x1c7   : > { %6480 = vmatpush3.msra.mxu1 %v12426_v60  ;;  %6500 = vmatpush3.msra.mxu0 %v9495_v10  ;;  %v9669_v60 = vsub.f32 %v385_v11, %v9629_v0  ;;  %v6047_v42 = vpop.f32.mrf.mxu1 }
 0x1c8   : > { %6481 = vmatprep.subr.mxu1 %v9087_v37  ;;  %v9672_v29 = vadd.f32 %v6008_v3, %v9463_v35  ;;  %6501 = vmatprep.subr.mxu0 %v9503_v33  ;;  %v9678_v37 = vsub.f32 %v369_v17, %v9644_v44  ;;  %12514 = vst [vmem:[#allocation36_spill] sm:$0xff] %v9682_v28  ;;  %v6009_v11 = vpop.f32.mrf.mxu0  ;;  %v9706_v35 = vand.u32 4294901760, %v367_v50 }
 0x1c9   : > { %12511 = vst [vmem:[#allocation39_spill] sm:$0xff] %v9669_v60  ;;  %3370 = vmatprep.mubr.f32.mxu0 %v12512_v6  ;;  %6482 = vmatpush3.msra.mxu1 %v9073_v8  ;;  %v9690_v3 = vsub.f32 %v9610_v13, %v11733_v49  ;;  %v9695_v17 = vsub.f32 %v9590_v18, %v11734_v30  ;;  %v6048_v59 = vpop.f32.mrf.mxu1  ;;  %v382_v30 = vld [vmem:[#allocation6 + $0x3b0] sm:$0xff] }
 0x1ca   : > { %12513 = vst [vmem:[#allocation44_spill] sm:$0xff] %v9678_v37  ;;  %6502 = vmatpush3.msra.mxu0 %v9505_v12  ;;  %6483 = vmatprep.subr.mxu1 %v9109_v41  ;;  %v9704_v8 = vsub.f32 %v9619_v47, %v11739_v19  ;;  %12517 = vst [vmem:[#allocation57_spill] sm:$0xff] %v9706_v35  ;;  %v9711_v49 = vsub.f32 %v9616_v54, %v11746_v51  ;;  %v6010_v12 = vpop.f32.mrf.mxu0  ;;  %v12519_v19 = vand.u32 4294901760, %v9632_v9  ;;  %v12521_v47 = vld [vmem:[#allocation65_spill] sm:$0xff] }
 0x1cb   : > { %3372 = vmatmul.mubr.f32.gmra.mxu0 %v12516_v23  ;;  %v6049_v33 = vadd.f32 %v6048_v59, %v6047_v42  ;;  %6503 = vmatprep.subr.mxu0 %v9525_v21  ;;  %v9716_v41 = vsub.f32 %v368_v38, %v9665_v27  ;;  %v6011_v51 = vadd.f32 %v6010_v12, %v6009_v11  ;;  %v12520_v42 = vand.u32 4294901760, %v9637_v4 }
 0x1cc   : > { %6484 = vmatpush3.msra.mxu1 %v9111_v24  ;;  %v9721_v10 = vsub.f32 %v9632_v9, %v12519_v19  ;;  %6504 = vmatpush3.msra.mxu0 %v9533_v63  ;;  %v9739_v11 = vand.u32 4294901760, %v382_v30  ;;  %v9752_v59 = vsub.f32 %v367_v50, %v9706_v35  ;;  %v9754_v12 = vand.u32 4294901760, %v366_v22  ;;  %v12525_v63 = vld [vmem:[#allocation67_spill] sm:$0xff] }
 0x1cd   : > { %12518 = vst [vmem:[#allocation59_spill] sm:$0xff] %v9716_v41  ;;  %6485 = vmatprep.subr.mxu1 %v9137_v46  ;;  %v9729_v24 = vsub.f32 %v9637_v4, %v12520_v42  ;;  %v9734_v19 = vadd.f32 %v6049_v33, %v9622_v34  ;;  %6505 = vmatprep.subr.mxu0 %v9560_v56  ;;  %v6012_v38 = vpop.f32.mrf.mxu0  ;;  %v365_v56 = vld [vmem:[#allocation6 + $0x328] sm:$0xff]  ;;  %v12528_v4 = vand.u32 4294901760, %v9577_v15 }
 0x1ce   : > { %3377 = vmatprep.mubr.f32.mxu0 %v12521_v47  ;;  %v9742_v46 = vsub.f32 %v383_v55, %v9697_v7  ;;  %v9745_v42 = vadd.f32 %v6011_v51, %v9481_v43  ;;  %6486 = vmatpush3.msra.mxu1 %v9139_v14  ;;  %12523 = vst [vmem:[#allocation34_spill] sm:$0xff] %v9754_v12  ;;  %v6050_v55 = vpop.f32.mrf.mxu1  ;;  %v381_v51 = vld [vmem:[#allocation6 + $0x3a8] sm:$0xff]  ;;  %v12527_v14 = vand.u32 4294901760, %v9682_v28 }
 0x1cf   : > { %3488 = vmatprep.mubr.f32.mxu1 %v12503_v53  ;;  %6506 = vmatpush3.msra.mxu0 %v9549_v40  ;;  %v12524_v53 = vand.u32 4294901760, %v9669_v60  ;;  %v6013_v33 = vpop.f32.mrf.mxu0  ;;  %v9782_v40 = vand.u32 4294901760, %v365_v56  ;;  %v9786_v9 = vsub.f32 %v382_v30, %v9739_v11  ;;  %v9792_v15 = vsub.f32 %v366_v22, %v9754_v12 }
 0x1d0   : > { %12522 = vst [vmem:[#allocation42_spill] sm:$0xff] %v9742_v46  ;;  %3490 = vmatmul.mubr.f32.vlgmr.msra.gmra.mxu1 %v12508_v32  ;;  %3379 = vmatmul.mubr.f32.gmra.mxu0 %v12525_v63  ;;  %v12526_v32 = vand.u32 4294901760, %v9678_v37  ;;  %v9777_v21 = vsub.f32 %v9682_v28, %v12527_v14  ;;  %v6014_v50 = vadd.f32 %v6013_v33, %v6012_v38  ;;  %v12530_v28 = vand.u32 4294901760, %v9582_v36  ;;  %v231_v33 = vld [vmem:[%s7362_s6 + $0x38] sm:$0xff] }
 0x1d1   : > { %v9763_v34 = vsub.f32 %v9669_v60, %v12524_v53  ;;  %6507 = vmatprep.subr.mxu0 %v9567_v5  ;;  %v364_v53 = vld [vmem:[#allocation6 + $0x320] sm:$0xff]  ;;  %v6051_v60 = vpop.f32.mrf.mxu1  ;;  %6543 = vmatprep.subr.mxu1 %v12528_v4  ;;  %12529 = vst [vmem:[#allocation15_spill] sm:$0xff] %v9782_v40  ;;  %12531 = vst [vmem:[#allocation54_spill] sm:$0xff] %v9792_v15  ;;  %v9794_v4 = vand.u32 4294901760, %v381_v51  ;;  %v12533_v30 = vand.u32 4294901760, %v9601_v39  ;;  %v12536_v22 = vand.u32 4294901760, %v9716_v41 }
 0x1d2   : > { %v9772_v43 = vsub.f32 %v9678_v37, %v12526_v32  ;;  %6508 = vmatpush3.msra.mxu0 %v9569_v26  ;;  %v380_v5 = vld [vmem:[#allocation6 + $0x3a0] sm:$0xff]  ;;  %v363_v37 = vld [vmem:[#allocation6 + $0x318] sm:$0xff]  ;;  %v6052_v14 = vadd.f32 %v6051_v60, %v6050_v55  ;;  %6544 = vmatpush3.msra.mxu1 %v12530_v28  ;;  %v9799_v32 = vadd.f32 %v6014_v50, %v9507_v16  ;;  %v9805_v28 = vand.u32 4294901760, %v364_v53  ;;  %v9835_v39 = vld [vmem:[#allocation6 + $0x390] sm:$0xff] }
 0x1d3   : > { %6509 = vmatprep.subr.mxu0 %v9584_v57  ;;  %12532 = vst [vmem:[#allocation21_spill] sm:$0xff] %v9794_v4  ;;  %6545 = vmatprep.subr.mxu1 %v12533_v30  ;;  %v12534_v60 = vld [vmem:[#allocation68_spill] sm:$0xff]  ;;  %v9810_v55 = vsub.f32 %v9716_v41, %v12536_v22  ;;  %v230_v57 = vld [vmem:[%s7362_s6 + $0x30] sm:$0xff]  ;;  %v6053_v16 = vpop.f32.mrf.mxu1  ;;  %v9819_v50 = vand.u32 4294901760, %v380_v5  ;;  %v379_v36 = vld [vmem:[#allocation6 + $0x398] sm:$0xff]  ;;  %v9822_v26 = vand.u32 4294901760, %v363_v37 }
 0x1d4   : > { %3384 = vmatprep.mubr.f32.mxu0 %v12534_v60  ;;  %12535 = vst [vmem:[#allocation40_spill] sm:$0xff] %v9805_v28  ;;  %v9814_v38 = vadd.f32 %v6052_v14, %v9672_v29  ;;  %3495 = vmatprep.mubr.f32.mxu1 %v12512_v6  ;;  %v12539_v22 = vand.u32 4294901760, %v9606_v1  ;;  %v12540_v41 = vld [vmem:[#allocation69_spill] sm:$0xff]  ;;  %v9828_v29 = vsub.f32 %v365_v56, %v9782_v40  ;;  %v12541_v6 = vand.u32 4294901760, %v9742_v46 }
 0x1d5   : > { %6510 = vmatpush3.msra.mxu0 %v9592_v61  ;;  %12537 = vst [vmem:[#allocation24_spill] sm:$0xff] %v9819_v50  ;;  %12538 = vst [vmem:[#allocation26_spill] sm:$0xff] %v9822_v26  ;;  %v362_v61 = vld [vmem:[#allocation6 + $0x310] sm:$0xff]  ;;  %v9838_v54 = vand.u32 4294901760, %v231_v33  ;;  %v6054_v18 = vpop.f32.mrf.mxu1  ;;  %3497 = vmatmul.mubr.f32.gmra.mxu1 %v12516_v23  ;;  %v12543_v56 = vand.u32 4294901760, %v9752_v59  ;;  %v12545_v30 = vand.u32 4294901760, %v9642_v62  ;;  %v9854_v13 = vsub.f32 %v364_v53, %v9805_v28 }
 0x1d6   : > { %6546 = vmatpush3.msra.mxu1 %v12539_v22  ;;  %3386 = vmatmul.mubr.f32.gmra.mxu0 %v12540_v41  ;;  %v9833_v14 = vsub.f32 %v9742_v46, %v12541_v6  ;;  %v9848_v6 = vand.u32 4294901760, %v230_v57  ;;  %v6055_v46 = vadd.f32 %v6054_v18, %v6053_v16  ;;  %v12547_v22 = vand.u32 4294901760, %v9653_v25  ;;  %v9873_v16 = vld [vmem:[#allocation6 + $0x388] sm:$0xff] }
 0x1d7   : > { %12542 = vst [vmem:[#allocation45_spill] sm:$0xff] %v9838_v54  ;;  %6511 = vmatprep.subr.mxu0 %v9629_v0  ;;  %v9845_v1 = vsub.f32 %v9752_v59, %v12543_v56  ;;  %6547 = vmatprep.subr.mxu1 %v12545_v30  ;;  %v9857_v0 = vand.u32 4294901760, %v379_v36  ;;  %v9860_v56 = vsub.f32 %v381_v51, %v9794_v4  ;;  %v9869_v62 = vand.u32 4294901760, %v9835_v39 }
 0x1d8   : > { %12544 = vst [vmem:[#allocation28_spill] sm:$0xff] %v9848_v6  ;;  %6512 = vmatpush3.msra.mxu0 %v9644_v44  ;;  %6548 = vmatpush3.msra.mxu1 %v12547_v22  ;;  %v9866_v18 = vsub.f32 %v363_v37, %v9822_v26  ;;  %v9871_v53 = vand.u32 4294901760, %v362_v61  ;;  %v9876_v30 = vadd.f32 %v6055_v46, %v9745_v42  ;;  %v6056_v51 = vpop.f32.mrf.mxu1  ;;  %v12551_v25 = vand.u32 4294901760, %v9690_v3  ;;  %v241_v42 = vld [vmem:[%s7362_s6 + $0x88] sm:$0xff] }
 0x1d9   : > { %12546 = vst [vmem:[#allocation37_spill] sm:$0xff] %v9857_v0  ;;  %6513 = vmatprep.subr.mxu0 %v9646_v31  ;;  %12549 = vst [vmem:[#allocation61_spill] sm:$0xff] %v9869_v62  ;;  %3502 = vmatprep.mubr.f32.mxu1 %v12521_v47  ;;  %v12552_v37 = vand.u32 4294901760, %v9786_v9  ;;  %v361_v31 = vld [vmem:[#allocation6 + $0x308] sm:$0xff]  ;;  %v9888_v44 = vsub.f32 %v380_v5, %v9819_v50  ;;  %v9891_v46 = vsub.f32 %v231_v33, %v9838_v54 }
 0x1da   : > { %12548 = vst [vmem:[#allocation43_spill] sm:$0xff] %v9866_v18  ;;  %12550 = vst [vmem:[#allocation58_spill] sm:$0xff] %v9871_v53  ;;  %6549 = vmatprep.subr.mxu1 %v12551_v25  ;;  %6514 = vmatpush3.msra.mxu0 %v9665_v27  ;;  %v12555_v47 = vand.u32 4294901760, %v9695_v17  ;;  %v12556_v25 = vand.u32 4294901760, %v9792_v15  ;;  %v9905_v5 = vsub.f32 %v230_v57, %v9848_v6  ;;  %v6057_v33 = vpop.f32.mrf.mxu1  ;;  %v9910_v17 = vand.u32 4294901760, %v9873_v16 }
 0x1db   : > { %v9885_v23 = vsub.f32 %v9786_v9, %v12552_v37  ;;  %12553 = vst [vmem:[#allocation31_spill] sm:$0xff] %v9888_v44  ;;  %12554 = vst [vmem:[#allocation35_spill] sm:$0xff] %v9891_v46  ;;  %3504 = vmatmul.mubr.f32.gmra.mxu1 %v12525_v63  ;;  %6515 = vmatprep.subr.mxu0 %v9697_v7  ;;  %v9914_v3 = vsub.f32 %v379_v36, %v9857_v0  ;;  %v12560_v22 = vand.u32 4294901760, %v9704_v8  ;;  %v360_v7 = vld [vmem:[#allocation6 + $0x300] sm:$0xff] }
 0x1dc   : > { %6550 = vmatpush3.msra.mxu1 %v12555_v47  ;;  %v9901_v37 = vsub.f32 %v9792_v15, %v12556_v25  ;;  %12557 = vst [vmem:[#allocation62_spill] sm:$0xff] %v9905_v5  ;;  %12558 = vst [vmem:[#allocation17_spill] sm:$0xff] %v9910_v17  ;;  %v240_v25 = vld [vmem:[%s7362_s6 + $0x80] sm:$0xff]  ;;  %v6058_v27 = vadd.f32 %v6057_v33, %v6056_v51  ;;  %6516 = vmatpush3.msra.mxu0 %v9706_v35  ;;  %v9923_v63 = vand.u32 4294901760, %v361_v31 }
 0x1dd   : > { %12559 = vst [vmem:[#allocation66_spill] sm:$0xff] %v9914_v3  ;;  %6551 = vmatprep.subr.mxu1 %v12560_v22  ;;  %v9921_v57 = vsub.f32 %v362_v61, %v9871_v53  ;;  %v9926_v47 = vand.u32 4294901760, %v241_v42  ;;  %v12563_v36 = vand.u32 4294901760, %v9711_v49  ;;  %6517 = vmatprep.subr.mxu0 %v9739_v11  ;;  %v376_v51 = vld [vmem:[#allocation6 + $0x380] sm:$0xff]  ;;  %v12564_v35 = vand.u32 4294901760, %v9721_v10  ;;  %v251_v61 = vld [vmem:[%s7362_s6 + $0xd8] sm:$0xff] }
 0x1de   : > { %v9935_v33 = vadd.f32 %v6058_v27, %v9799_v32  ;;  %3509 = vmatprep.mubr.f32.mxu1 %v12534_v60  ;;  %v9947_v22 = vand.u32 4294901760, %v240_v25  ;;  %6518 = vmatpush3.msra.mxu0 %v9754_v12  ;;  %v12567_v27 = vand.u32 4294901760, %v9729_v24  ;;  %v12568_v10 = vand.u32 4294901760, %v9860_v56 }
 0x1df   : > { %12561 = vst [vmem:[#allocation64_spill] sm:$0xff] %v9921_v57  ;;  %12562 = vst [vmem:[#allocation49_spill] sm:$0xff] %v9926_v47  ;;  %6552 = vmatpush3.msra.mxu1 %v12563_v36  ;;  %v12565_v36 = vand.u32 4294901760, %v9828_v29  ;;  %v9958_v32 = vand.u32 4294901760, %v360_v7  ;;  %6519 = vmatprep.subr.mxu0 %v9794_v4  ;;  %v9968_v24 = vsub.f32 %v361_v31, %v9923_v63  ;;  %v12575_v8 = vand.u32 4294901760, %v9891_v46 }
 0x1e0   : > { %6553 = vmatprep.subr.mxu1 %v12564_v35  ;;  %12566 = vst [vmem:[#allocation56_spill] sm:$0xff] %v9947_v22  ;;  %v9956_v35 = vsub.f32 %v9860_v56, %v12568_v10  ;;  %3511 = vmatmul.mubr.f32.gmra.mxu1 %v12540_v41  ;;  %v12572_v10 = vand.u32 4294901760, %v9854_v13  ;;  %v9978_v60 = vsub.f32 %v241_v42, %v9926_v47  ;;  %v12574_v41 = vand.u32 4294901760, %v9888_v44  ;;  %v250_v42 = vld [vmem:[%s7362_s6 + $0xd0] sm:$0xff] }
 0x1e1   : > { %v9944_v15 = vsub.f32 %v9828_v29, %v12565_v36  ;;  %6554 = vmatpush3.msra.mxu1 %v12567_v27  ;;  %v9963_v36 = vsub.f32 %v9835_v39, %v9869_v62  ;;  %12570 = vst [vmem:[#allocation52_spill] sm:$0xff] %v9968_v24  ;;  %v9970_v27 = vand.u32 4294901760, %v376_v51  ;;  %v12573_v39 = vand.u32 4294901760, %v9763_v34  ;;  %6520 = vmatpush3.msra.mxu0 %v9782_v40 }
 0x1e2   : > { %v9975_v49 = vsub.f32 %v9854_v13, %v12572_v10  ;;  %v9986_v31 = vsub.f32 %v9888_v44, %v12574_v41  ;;  %v9991_v4 = vsub.f32 %v9891_v46, %v12575_v8  ;;  %v9994_v12 = vand.u32 4294901760, %v251_v61  ;;  %6521 = vmatprep.subr.mxu0 %v9819_v50  ;;  %3898 = vmatprep.mubr.f32.mxu1 %v9838_v54  ;;  %v12621_v54 = vld [vmem:[#allocation14_spill] sm:$0xff] }
 0x1e3   : > { %12569 = vst [vmem:[#allocation55_spill] sm:$0xff] %v9963_v36  ;;  %12571 = vst [vmem:[#allocation60_spill] sm:$0xff] %v9970_v27  ;;  %6555 = vmatprep.subr.mxu1 %v12573_v39  ;;  %v12577_v34 = vand.u32 4294901760, %v9772_v43  ;;  %v3748_v39 = vand.u32 4294901760, %v9944_v15  ;;  %v12578_v41 = vand.u32 4294901760, %v9905_v5  ;;  %v10007_v8 = vsub.f32 %v240_v25, %v9947_v22  ;;  %6522 = vmatpush3.msra.mxu0 %v9805_v28 }
 0x1e4   : > { %12576 = vst [vmem:[#allocation63_spill] sm:$0xff] %v9994_v12  ;;  %v10011_v10 = vsub.f32 %v9873_v16, %v9910_v17  ;;  %v12579_v43 = vand.u32 4294901760, %v9777_v21  ;;  %v3860_v15 = vand.u32 4294901760, %v9956_v35  ;;  %v12582_v46 = vand.u32 4294901760, %v9810_v55  ;;  %6523 = vmatprep.subr.mxu0 %v9857_v0 }
 0x1e5   : > { %6556 = vmatpush3.msra.mxu1 %v12577_v34  ;;  %v10004_v40 = vsub.f32 %v9905_v5, %v12578_v41  ;;  %v10018_v34 = vsub.f32 %v360_v7, %v9958_v32  ;;  %v12581_v41 = vand.u32 4294901760, %v9914_v3  ;;  %v3755_v21 = vand.u32 4294901760, %v9975_v49  ;;  %6524 = vmatpush3.msra.mxu0 %v9822_v26  ;;  %v6091_v25 = vpop.f32.mrf.mxu0 }
 0x1e6   : > { %6557 = vmatprep.subr.mxu1 %v12579_v43  ;;  %v10030_v35 = vsub.f32 %v376_v51, %v9970_v27  ;;  %v10032_v7 = vand.u32 4294901760, %v250_v42  ;;  %v261_v43 = vld [vmem:[%s7362_s6 + $0x128] sm:$0xff]  ;;  %v3867_v55 = vand.u32 4294901760, %v9986_v31  ;;  %v10044_v51 = vsub.f32 %v251_v61, %v9994_v12  ;;  %6525 = vmatprep.subr.mxu0 %v9869_v62 }
 0x1e7   : > { %12580 = vst [vmem:[#allocation65_spill] sm:$0xff] %v10018_v34  ;;  %v3873_v5 = vsub.f32 %v9914_v3, %v12581_v41  ;;  %6558 = vmatpush3.msra.mxu1 %v12582_v46  ;;  %v12585_v41 = vand.u32 4294901760, %v9833_v14  ;;  %v12586_v46 = vand.u32 4294901760, %v9866_v18  ;;  %v12587_v0 = vand.u32 4294901760, %v9845_v1  ;;  %6526 = vmatpush3.msra.mxu0 %v9871_v53 }
 0x1e8   : > { %12583 = vst [vmem:[#allocation67_spill] sm:$0xff] %v10030_v35  ;;  %12584 = vst [vmem:[#allocation68_spill] sm:$0xff] %v10032_v7  ;;  %v3616_v14 = vand.u32 4294901760, %v9991_v4  ;;  %v12588_v16 = vand.u32 4294901760, %v9885_v23  ;;  %v12589_v1 = vand.u32 4294901760, %v9963_v36  ;;  %v10061_v4 = vand.u32 4294901760, %v261_v43  ;;  %6527 = vmatprep.subr.mxu0 %v9910_v17 }
 0x1e9   : > { %6559 = vmatprep.subr.mxu1 %v12585_v41  ;;  %v3761_v49 = vsub.f32 %v9866_v18, %v12586_v46  ;;  %v3622_v41 = vand.u32 4294901760, %v10004_v40  ;;  %v260_v46 = vld [vmem:[%s7362_s6 + $0x120] sm:$0xff]  ;;  %v3874_v61 = vand.u32 4294901760, %v3873_v5  ;;  %v6092_v40 = vpop.f32.mrf.mxu0  ;;  %v12591_v31 = vand.u32 4294901760, %v9901_v37  ;;  %6528 = vmatpush3.msra.mxu0 %v9923_v63 }
 0x1ea   : > { %6560 = vmatpush3.msra.mxu1 %v12587_v0  ;;  %v3880_v0 = vsub.f32 %v9963_v36, %v12589_v1  ;;  %12590 = vst [vmem:[#allocation69_spill] sm:$0xff] %v10061_v4  ;;  %v12592_v23 = vand.u32 4294901760, %v9978_v60  ;;  %v10071_v26 = vsub.f32 %v250_v42, %v10032_v7  ;;  %v6093_v1 = vadd.f32 %v6092_v40, %v6091_v25 }
 0x1eb   : > { %6561 = vmatprep.subr.mxu1 %v12588_v16  ;;  %v3762_v62 = vand.u32 4294901760, %v3761_v49  ;;  %v12593_v53 = vand.u32 4294901760, %v9921_v57  ;;  %v10078_v17 = vand.u32 4294901760, %v260_v46  ;;  %6529 = vmatprep.subr.mxu0 %v9970_v27  ;;  %v10094_v27 = vsub.f32 %v261_v43, %v10061_v4 }
 0x1ec   : > { %6562 = vmatpush3.msra.mxu1 %v12591_v31  ;;  %v3630_v16 = vsub.f32 %v9978_v60, %v12592_v23  ;;  %v12595_v23 = vand.u32 4294901760, %v10007_v8  ;;  %v2001_v40 = vadd.f32 %v6093_v1, %v9734_v19  ;;  %6530 = vmatpush3.msra.mxu0 %v9958_v32  ;;  %v3881_v31 = vand.u32 4294901760, %v3880_v0 }
 0x1ed   : > { %6563 = vmatprep.subr.mxu1 %v3860_v15  ;;  %v3768_v37 = vsub.f32 %v9921_v57, %v12593_v53  ;;  %12594 = vst [vmem:[#allocation70_spill] sm:$0xff] %v10078_v17  ;;  %v12596_v15 = vand.u32 4294901760, %v10011_v10  ;;  %v6094_v53 = vpop.f32.mrf.mxu0  ;;  %3617 = vmatprep.mubr.f32.mxu0 %v3616_v14  ;;  %v12599_v1 = vand.u32 4294901760, %v10044_v51  ;;  %v10104_v43 = vsub.f32 %v260_v46, %v10078_v17 }
 0x1ee   : > { %6564 = vmatpush3.msra.mxu1 %v3748_v39  ;;  %v3636_v42 = vsub.f32 %v10007_v8, %v12595_v23  ;;  %v12597_v39 = vand.u32 4294901760, %v9968_v24  ;;  %v3631_v23 = vand.u32 4294901760, %v3630_v16  ;;  %3623 = vmatmul.mubr.f32.vlgmr.msra.gmra.mxu0 %v3622_v41 }
 0x1ef   : > { %v3887_v25 = vsub.f32 %v10011_v10, %v12596_v15  ;;  %6565 = vmatprep.subr.mxu1 %v3867_v55  ;;  %v12598_v15 = vand.u32 4294901760, %v10030_v35  ;;  %v6095_v55 = vpop.f32.mrf.mxu0  ;;  %v3769_v0 = vand.u32 4294901760, %v3768_v37  ;;  %6587 = vmatprep.subr.mxu0 %v9519_v58  ;;  %v6135_v46 = vpop.f32.mrf.mxu1 }
 0x1f0   : > { %v3775_v5 = vsub.f32 %v9968_v24, %v12597_v39  ;;  %6566 = vmatpush3.msra.mxu1 %v3755_v21  ;;  %v3645_v39 = vsub.f32 %v10044_v51, %v12599_v1  ;;  %v6096_v14 = vadd.f32 %v6095_v55, %v6094_v53  ;;  %v3637_v21 = vand.u32 4294901760, %v3636_v42  ;;  %6588 = vmatpush3.msra.mxu0 %v9516_v20 }
 0x1f1   : > { %v3894_v49 = vsub.f32 %v10030_v35, %v12598_v15  ;;  %6567 = vmatprep.subr.mxu1 %v3874_v61  ;;  %v3888_v16 = vand.u32 4294901760, %v3887_v25  ;;  %v12600_v15 = vand.u32 4294901760, %v10018_v34  ;;  %v11820_v61 = vand.u32 4294901760, %v10094_v27  ;;  %6589 = vmatprep.subr.mxu0 %v9536_v48  ;;  %v6097_v25 = vpop.f32.mrf.mxu0 }
 0x1f2   : > { %6568 = vmatpush3.msra.mxu1 %v3762_v62  ;;  %v3776_v41 = vand.u32 4294901760, %v3775_v5  ;;  %v2010_v37 = vadd.f32 %v6096_v14, %v9814_v38  ;;  %3632 = vmatprep.mubr.f32.mxu0 %v3631_v23  ;;  %v12601_v62 = vand.u32 4294901760, %v10071_v26  ;;  %v3646_v55 = vand.u32 4294901760, %v3645_v39 }
 0x1f3   : > { %v3782_v19 = vsub.f32 %v10018_v34, %v12600_v15  ;;  %6569 = vmatprep.subr.mxu1 %v3881_v31  ;;  %v3895_v53 = vand.u32 4294901760, %v3894_v49  ;;  %6590 = vmatpush3.msra.mxu0 %v9531_v2  ;;  %v11819_v5 = vand.u32 4294901760, %v10104_v43  ;;  %v6136_v31 = vpop.f32.mrf.mxu1  ;;  %v6098_v1 = vpop.f32.mrf.mxu0  ;;  %v3660_v49 = vsub.f32 %v10094_v27, %v11820_v61  ;;  %v12602_v15 = vld [vmem:[#allocation48_spill] sm:$0xff] }
 0x1f4   : > { %v3651_v42 = vsub.f32 %v10071_v26, %v12601_v62  ;;  %6570 = vmatpush3.msra.mxu1 %v3769_v0  ;;  %3638 = vmatmul.mubr.f32.gmra.mxu0 %v3637_v21  ;;  %v6137_v14 = vadd.f32 %v6136_v31, %v6135_v46  ;;  %v6099_v23 = vadd.f32 %v6098_v1, %v6097_v25  ;;  %v12603_v46 = vld [vmem:[#allocation27_spill] sm:$0xff]  ;;  %v12604_v62 = vld [vmem:[#allocation46_spill] sm:$0xff] }
 0x1f5   : > { %6571 = vmatprep.subr.mxu1 %v3888_v16  ;;  %v3783_v38 = vand.u32 4294901760, %v3782_v19  ;;  %6591 = vmatprep.subr.mxu0 %v9552_v52  ;;  %v3666_v19 = vsub.f32 %v10104_v43, %v11819_v5  ;;  %v6100_v16 = vpop.f32.mrf.mxu0  ;;  %v12606_v31 = vld [vmem:[#allocation19_spill] sm:$0xff]  ;;  %v12607_v1 = vld [vmem:[#allocation22_spill] sm:$0xff] }
 0x1f6   : > { %6572 = vmatpush3.msra.mxu1 %v3776_v41  ;;  %6592 = vmatpush3.msra.mxu0 %v9558_v45  ;;  %v3652_v0 = vand.u32 4294901760, %v3651_v42  ;;  %v10124_v39 = vadd.f32 %v6137_v14, %v2001_v40  ;;  %v2019_v21 = vadd.f32 %v6099_v23, %v9876_v30  ;;  %v6138_v41 = vpop.f32.mrf.mxu1  ;;  %v3661_v40 = vand.u32 4294901760, %v3660_v49  ;;  %v12608_v14 = vld [vmem:[#allocation51_spill] sm:$0xff] }
 0x1f7   : > { %6573 = vmatprep.subr.mxu1 %v3895_v53  ;;  %6593 = vmatprep.subr.mxu0 %v12602_v15  ;;  %v6101_v53 = vpop.f32.mrf.mxu0  ;;  %v3667_v30 = vand.u32 4294901760, %v3666_v19  ;;  %v12609_v5 = vld [vmem:[#allocation23_spill] sm:$0xff] }
 0x1f8   : > { %3647 = vmatprep.mubr.f32.mxu0 %v3646_v55  ;;  %6574 = vmatpush3.msra.mxu1 %v3783_v38  ;;  %v6102_v42 = vadd.f32 %v6101_v53, %v6100_v16  ;;  %v6139_v25 = vpop.f32.mrf.mxu1  ;;  %v12605_v55 = vld [vmem:[#allocation20_spill] sm:$0xff]  ;;  %v12610_v16 = vld [vmem:[#allocation13_spill] sm:$0xff] }
 0x1f9   : > { %6594 = vmatpush3.msra.mxu0 %v12603_v46  ;;  %3900 = vmatmul.mubr.f32.vlgmr.msra.gmra.mxu1 %v9848_v6  ;;  %v6140_v38 = vadd.f32 %v6139_v25, %v6138_v41  ;;  %v12611_v53 = vld [vmem:[#allocation41_spill] sm:$0xff]  ;;  %v12612_v41 = vld [vmem:[#allocation39_spill] sm:$0xff] }
 0x1fa   : > { %3653 = vmatmul.mubr.f32.gmra.mxu0 %v3652_v0  ;;  %6595 = vmatprep.subr.mxu0 %v12604_v62  ;;  %v2028_v23 = vadd.f32 %v6102_v42, %v9935_v33  ;;  %v12613_v33 = vld [vmem:[#allocation33_spill] sm:$0xff]  ;;  %v12614_v42 = vld [vmem:[#allocation44_spill] sm:$0xff] }
 0x1fb   : > { %6631 = vmatprep.subr.mxu1 %v12605_v55  ;;  %6596 = vmatpush3.msra.mxu0 %v12606_v31  ;;  %v10141_v49 = vadd.f32 %v6140_v38, %v2010_v37  ;;  %v6141_v0 = vpop.f32.mrf.mxu1  ;;  %v12615_v37 = vld [vmem:[#allocation25_spill] sm:$0xff] }
 0x1fc   : > { %6632 = vmatpush3.msra.mxu1 %v12607_v1  ;;  %6597 = vmatprep.subr.mxu0 %v12608_v14 }
 0x1fd   : > { %6633 = vmatprep.subr.mxu1 %v12609_v5  ;;  %3662 = vmatprep.mubr.f32.mxu0 %v3661_v40  ;;  %v6142_v19 = vpop.f32.mrf.mxu1  ;;  %v12616_v40 = vld [vmem:[#allocation36_spill] sm:$0xff] }
 0x1fe   : > { %3905 = vmatprep.mubr.f32.mxu1 %v9926_v47  ;;  %6598 = vmatpush3.msra.mxu0 %v12610_v16  ;;  %v6143_v25 = vadd.f32 %v6142_v19, %v6141_v0  ;;  %v12617_v47 = vld [vmem:[#allocation30_spill] sm:$0xff] }
 0x1ff   : > { %6634 = vmatpush3.msra.mxu1 %v12611_v53  ;;  %3668 = vmatmul.mubr.f32.gmra.mxu0 %v3667_v30  ;;  %v12618_v30 = vld [vmem:[#allocation59_spill] sm:$0xff]  ;;  %v12620_v19 = vld [vmem:[#allocation42_spill] sm:$0xff] }
 0x200   : > { %3907 = vmatmul.mubr.f32.gmra.mxu1 %v9947_v22  ;;  %6599 = vmatprep.subr.mxu0 %v12612_v41  ;;  %v10152_v38 = vadd.f32 %v6143_v25, %v2019_v21  ;;  %v6144_v61 = vpop.f32.mrf.mxu1  ;;  %v12619_v22 = vld [vmem:[#allocation38_spill] sm:$0xff]  ;;  %v12622_v21 = vld [vmem:[#allocation29_spill] sm:$0xff] }
 0x201   : > { %6635 = vmatprep.subr.mxu1 %v12613_v33  ;;  %6600 = vmatpush3.msra.mxu0 %v12614_v42 }
 0x202   : > { %6636 = vmatpush3.msra.mxu1 %v12615_v37  ;;  %6601 = vmatprep.subr.mxu0 %v12616_v40  ;;  %v6145_v0 = vpop.f32.mrf.mxu1 }
 0x203   : > { %6637 = vmatprep.subr.mxu1 %v12617_v47  ;;  %3912 = vmatprep.mubr.f32.mxu1 %v9994_v12  ;;  %v6146_v6 = vadd.f32 %v6145_v0, %v6144_v61  ;;  %v12623_v12 = vld [vmem:[#allocation18_spill] sm:$0xff]  ;;  %v12626_v61 = vld [vmem:[#allocation47_spill] sm:$0xff] }
 0x204   : > { %6602 = vmatpush3.msra.mxu0 %v12618_v30  ;;  %6638 = vmatpush3.msra.mxu1 %v12619_v22  ;;  %v12624_v22 = vld [vmem:[#allocation54_spill] sm:$0xff] }
 0x205   : > { %3914 = vmatmul.mubr.f32.gmra.mxu1 %v10032_v7  ;;  %6603 = vmatprep.subr.mxu0 %v12620_v19  ;;  %v10164_v25 = vadd.f32 %v6146_v6, %v2028_v23  ;;  %v12625_v7 = vld [vmem:[#allocation12_spill] sm:$0xff]  ;;  %v12627_v0 = vld [vmem:[#allocation50_spill] sm:$0xff] }
 0x206   : > { %6639 = vmatprep.subr.mxu1 %v12621_v54  ;;  %6604 = vmatpush3.msra.mxu0 %v9752_v59  ;;  %v12628_v6 = vld [vmem:[#allocation32_spill] sm:$0xff] }
 0x207   : > { %6640 = vmatpush3.msra.mxu1 %v12622_v21  ;;  %6605 = vmatprep.subr.mxu0 %v9786_v9  ;;  %v12629_v23 = vld [vmem:[#allocation16_spill] sm:$0xff] }
 0x208   : > { %6641 = vmatprep.subr.mxu1 %v12623_v12  ;;  %3919 = vmatprep.mubr.f32.mxu1 %v10061_v4  ;;  %v12630_v4 = vld [vmem:[#allocation53_spill] sm:$0xff] }
 0x209   : > { %6606 = vmatpush3.msra.mxu0 %v12624_v22  ;;  %6642 = vmatpush3.msra.mxu1 %v12625_v7 }
 0x20a   : > { %3921 = vmatmul.mubr.f32.gmra.mxu1 %v10078_v17  ;;  %6607 = vmatprep.subr.mxu0 %v9860_v56 }
 0x20b   : > { %6643 = vmatprep.subr.mxu1 %v12626_v61  ;;  %6608 = vmatpush3.msra.mxu0 %v9828_v29  ;;  %v12631_v61 = vld [vmem:[#allocation57_spill] sm:$0xff] }
 0x20c   : > { %6644 = vmatpush3.msra.mxu1 %v12627_v0  ;;  %6609 = vmatprep.subr.mxu0 %v9888_v44  ;;  %v12632_v44 = vld [vmem:[#allocation34_spill] sm:$0xff] }
 0x20d   : > { %6645 = vmatprep.subr.mxu1 %v12628_v6  ;;  %6610 = vmatpush3.msra.mxu0 %v9854_v13  ;;  %v6179_v17 = vpop.f32.mrf.mxu0 }
 0x20e   : > { %6646 = vmatpush3.msra.mxu1 %v12629_v23  ;;  %6611 = vmatprep.subr.mxu0 %v9914_v3  ;;  %v12633_v3 = vld [vmem:[#allocation21_spill] sm:$0xff] }
 0x20f   : > { %6647 = vmatprep.subr.mxu1 %v12630_v4  ;;  %6612 = vmatpush3.msra.mxu0 %v9866_v18  ;;  %v6180_v6 = vpop.f32.mrf.mxu0  ;;  %v12634_v18 = vld [vmem:[#allocation15_spill] sm:$0xff] }
 0x210   : > { %6648 = vmatpush3.msra.mxu1 %v12631_v61  ;;  %6613 = vmatprep.subr.mxu0 %v9963_v36  ;;  %v6181_v23 = vadd.f32 %v6180_v6, %v6179_v17  ;;  %v12636_v6 = vld [vmem:[#allocation62_spill] sm:$0xff] }
 0x211   : > { %6649 = vmatprep.subr.mxu1 %v9739_v11  ;;  %6614 = vmatpush3.msra.mxu0 %v9921_v57  ;;  %v12635_v57 = vld [vmem:[#allocation35_spill] sm:$0xff] }
 0x212   : > { %6650 = vmatpush3.msra.mxu1 %v12632_v44  ;;  %6615 = vmatprep.subr.mxu0 %v10011_v10  ;;  %v2337_v36 = vadd.f32 %v6181_v23, %v10124_v39  ;;  %v12640_v39 = vand.u32 4294901760, %v9516_v20  ;;  %v12641_v23 = vld [vmem:[#allocation61_spill] sm:$0xff] }
 0x213   : > { %6651 = vmatprep.subr.mxu1 %v12633_v3  ;;  %6616 = vmatpush3.msra.mxu0 %v9968_v24  ;;  %v6182_v61 = vpop.f32.mrf.mxu0  ;;  %v12637_v3 = vld [vmem:[#allocation37_spill] sm:$0xff] }
 0x214   : > { %6652 = vmatpush3.msra.mxu1 %v12634_v18  ;;  %6617 = vmatprep.subr.mxu0 %v10030_v35  ;;  %v12638_v18 = vand.u32 4294901760, %v9519_v58  ;;  %v12639_v35 = vld [vmem:[#allocation26_spill] sm:$0xff]  ;;  %v12644_v58 = vand.u32 4294901760, %v9531_v2  ;;  %v12645_v20 = vld [vmem:[#allocation17_spill] sm:$0xff] }
 0x215   : > { %6653 = vmatprep.subr.mxu1 %v9819_v50  ;;  %6618 = vmatpush3.msra.mxu0 %v10018_v34  ;;  %v6183_v17 = vpop.f32.mrf.mxu0 }
 0x216   : > { %4056 = vmatprep.mubr.f32.mxu0 %v12635_v57  ;;  %6654 = vmatpush3.msra.mxu1 %v9805_v28  ;;  %v6184_v24 = vadd.f32 %v6183_v17, %v6182_v61  ;;  %v12642_v28 = vand.u32 4294901760, %v9536_v48  ;;  %v12643_v61 = vld [vmem:[#allocation58_spill] sm:$0xff] }
 0x217   : > { %4059 = vmatmul.mubr.f32.vlgmr.msra.gmra.mxu0 %v12636_v6  ;;  %6655 = vmatprep.subr.mxu1 %v12637_v3 }
 0x218   : > { %6675 = vmatprep.subr.mxu0 %v12638_v18  ;;  %6656 = vmatpush3.msra.mxu1 %v12639_v35  ;;  %v2344_v34 = vadd.f32 %v6184_v24, %v10141_v49  ;;  %v6223_v50 = vpop.f32.mrf.mxu1  ;;  %v6185_v3 = vpop.f32.mrf.mxu0  ;;  %v12646_v24 = vand.u32 4294901760, %v9552_v52  ;;  %v12648_v49 = vld [vmem:[#allocation60_spill] sm:$0xff]  ;;  %v12650_v52 = vand.u32 4294901760, %v12635_v57  ;;  %v12654_v57 = vand.u32 4294901760, %v12606_v31 }
 0x219   : > { %6676 = vmatpush3.msra.mxu0 %v12640_v39  ;;  %6657 = vmatprep.subr.mxu1 %v12641_v23  ;;  %v12657_v31 = vand.u32 4294901760, %v12610_v16  ;;  %v12661_v16 = vand.u32 4294901760, %v12616_v40  ;;  %v12665_v40 = vand.u32 4294901760, %v10071_v26 }
 0x21a   : > { %6677 = vmatprep.subr.mxu0 %v12642_v28  ;;  %4065 = vmatprep.mubr.f32.mxu0 %v9978_v60  ;;  %v6224_v18 = vpop.f32.mrf.mxu1  ;;  %v6186_v17 = vpop.f32.mrf.mxu0  ;;  %v12647_v28 = vand.u32 4294901760, %v9558_v45  ;;  %v12651_v45 = vand.u32 4294901760, %v12603_v46  ;;  %v12655_v46 = vand.u32 4294901760, %v12608_v14  ;;  %v12658_v14 = vand.u32 4294901760, %v10007_v8 }
 0x21b   : > { %6658 = vmatpush3.msra.mxu1 %v12643_v61  ;;  %6678 = vmatpush3.msra.mxu0 %v12644_v58  ;;  %v6225_v39 = vadd.f32 %v6224_v18, %v6223_v50  ;;  %v6187_v48 = vadd.f32 %v6186_v17, %v6185_v3  ;;  %v12649_v58 = vand.u32 4294901760, %v12602_v15  ;;  %v12653_v15 = vand.u32 4294901760, %v12604_v62 }
 0x21c   : > { %4068 = vmatmul.mubr.f32.gmra.mxu0 %v10007_v8  ;;  %6659 = vmatprep.subr.mxu1 %v12645_v20 }
 0x21d   : > { %6679 = vmatprep.subr.mxu0 %v12646_v24  ;;  %6660 = vmatpush3.msra.mxu1 %v9923_v63  ;;  %v10220_v2 = vadd.f32 %v6225_v39, %v2337_v36  ;;  %v2351_v50 = vadd.f32 %v6187_v48, %v10152_v38  ;;  %v12652_v36 = vand.u32 4294901760, %v12636_v6 }
 0x21e   : > { %6680 = vmatpush3.msra.mxu0 %v12647_v28  ;;  %6661 = vmatprep.subr.mxu1 %v12648_v49  ;;  %v6188_v18 = vpop.f32.mrf.mxu0  ;;  %v6226_v3 = vpop.f32.mrf.mxu1 }
 0x21f   : > { %6681 = vmatprep.subr.mxu0 %v12649_v58  ;;  %4074 = vmatprep.mubr.f32.mxu0 %v10044_v51  ;;  %v422_v58 = vld [vmem:[#allocation6 + $0x4f0] sm:$0xff] }
 0x220   : > { %6662 = vmatpush3.msra.mxu1 %v9958_v32  ;;  %4190 = vmatprep.mubr.f32.mxu1 %v12650_v52  ;;  %v6189_v17 = vpop.f32.mrf.mxu0  ;;  %v6227_v39 = vpop.f32.mrf.mxu1 }
 0x221   : > { %6682 = vmatpush3.msra.mxu0 %v12651_v45  ;;  %4194 = vmatmul.mubr.f32.vlgmr.msra.gmra.mxu1 %v12652_v36  ;;  %v6190_v38 = vadd.f32 %v6189_v17, %v6188_v18  ;;  %v6228_v24 = vadd.f32 %v6227_v39, %v6226_v3  ;;  %v12666_v18 = vand.u32 4294901760, %v12620_v19  ;;  %v12670_v3 = vand.u32 4294901760, %v9786_v9  ;;  %v421_v19 = vld [vmem:[#allocation6 + $0x4e8] sm:$0xff]  ;;  %v420_v39 = vld [vmem:[#allocation6 + $0x4e0] sm:$0xff] }
 0x222   : > { %4077 = vmatmul.mubr.f32.gmra.mxu0 %v10071_v26  ;;  %6683 = vmatprep.subr.mxu0 %v12653_v15  ;;  %v10285_v26 = vand.u32 4294901760, %v422_v58  ;;  %v12672_v36 = vand.u32 4294901760, %v10094_v27  ;;  %v12675_v15 = vand.u32 4294901760, %v10104_v43 }
 0x223   : > { %6719 = vmatprep.subr.mxu1 %v12605_v55  ;;  %6684 = vmatpush3.msra.mxu0 %v12654_v57  ;;  %v2358_v6 = vadd.f32 %v6190_v38, %v10164_v25  ;;  %v10245_v62 = vadd.f32 %v6228_v24, %v2344_v34  ;;  %v12656_v55 = vand.u32 4294901760, %v9978_v60  ;;  %v12660_v60 = vand.u32 4294901760, %v12614_v42  ;;  %v407_v25 = vld [vmem:[#allocation6 + $0x478] sm:$0xff]  ;;  %v12664_v42 = vld [vmem:[#allocation38_spill] sm:$0xff]  ;;  %v404_v57 = vld [vmem:[#allocation6 + $0x460] sm:$0xff] }
 0x224   : > { %6720 = vmatpush3.msra.mxu1 %v12607_v1  ;;  %6685 = vmatprep.subr.mxu0 %v12655_v46  ;;  %v6229_v48 = vpop.f32.mrf.mxu1  ;;  %v10277_v52 = vand.u32 4294901760, %v407_v25  ;;  %12671 = vst [vmem:[#allocation46_spill] sm:$0xff] %v10285_v26  ;;  %v10315_v24 = vsub.f32 %v422_v58, %v10285_v26  ;;  %v12696_v58 = vld [vmem:[#allocation57_spill] sm:$0xff] }
 0x225   : > { %6721 = vmatprep.subr.mxu1 %v12609_v5  ;;  %4083 = vmatprep.mubr.f32.mxu0 %v10094_v27  ;;  %v12659_v5 = vand.u32 4294901760, %v12612_v41  ;;  %v12662_v41 = vand.u32 4294901760, %v10044_v51  ;;  %v12669_v51 = vand.u32 4294901760, %v9752_v59  ;;  %v12673_v59 = vand.u32 4294901760, %v12624_v22  ;;  %v12678_v22 = vld [vmem:[#allocation47_spill] sm:$0xff] }
 0x226   : > { %4201 = vmatprep.mubr.f32.mxu1 %v12656_v55  ;;  %6686 = vmatpush3.msra.mxu0 %v12657_v31  ;;  %v6230_v1 = vpop.f32.mrf.mxu1  ;;  %12668 = vst [vmem:[#allocation27_spill] sm:$0xff] %v10277_v52  ;;  %v10307_v27 = vand.u32 4294901760, %v421_v19  ;;  %v419_v55 = vld [vmem:[#allocation6 + $0x4d8] sm:$0xff] }
 0x227   : > { %6722 = vmatpush3.msra.mxu1 %v12611_v53  ;;  %4086 = vmatmul.mubr.f32.gmra.mxu0 %v10104_v43  ;;  %v6231_v34 = vadd.f32 %v6230_v1, %v6229_v48  ;;  %v423_v53 = vld [vmem:[#allocation6 + $0x4f8] sm:$0xff]  ;;  %v12684_v48 = vand.u32 4294901760, %v9854_v13 }
 0x228   : > { %4205 = vmatmul.mubr.f32.gmra.mxu1 %v12658_v14  ;;  %6687 = vmatprep.subr.mxu0 %v12659_v5  ;;  %v6232_v8 = vpop.f32.mrf.mxu1  ;;  %12677 = vst [vmem:[#allocation19_spill] sm:$0xff] %v10307_v27  ;;  %v12681_v43 = vld [vmem:[#allocation31_spill] sm:$0xff]  ;;  %v12686_v14 = vld [vmem:[#allocation16_spill] sm:$0xff]  ;;  %v10336_v13 = vsub.f32 %v421_v19, %v10307_v27 }
 0x229   : > { %6723 = vmatprep.subr.mxu1 %v12613_v33  ;;  %6688 = vmatpush3.msra.mxu0 %v12660_v60  ;;  %v10263_v28 = vadd.f32 %v6231_v34, %v2351_v50  ;;  %v12663_v33 = vand.u32 4294901760, %v12618_v30  ;;  %v10275_v50 = vand.u32 4294901760, %v423_v53  ;;  %v406_v30 = vld [vmem:[#allocation6 + $0x470] sm:$0xff]  ;;  %v12682_v46 = vand.u32 4294901760, %v12681_v43  ;;  %v12706_v43 = vld [vmem:[#allocation21_spill] sm:$0xff] }
 0x22a   : > { %6724 = vmatpush3.msra.mxu1 %v12615_v37  ;;  %6689 = vmatprep.subr.mxu0 %v12661_v16  ;;  %v6233_v37 = vpop.f32.mrf.mxu1  ;;  %v10298_v9 = vand.u32 4294901760, %v406_v30  ;;  %v10331_v34 = vand.u32 4294901760, %v420_v39  ;;  %v10333_v60 = vand.u32 4294901760, %v404_v57  ;;  %v402_v16 = vld [vmem:[#allocation6 + $0x450] sm:$0xff]  ;;  %12691 = vst [vmem:[#allocation41_spill] sm:$0xff] %v10336_v13 }
 0x22b   : > { %6725 = vmatprep.subr.mxu1 %v12617_v47  ;;  %4212 = vmatprep.mubr.f32.mxu1 %v12662_v41  ;;  %12667 = vst [vmem:[#allocation48_spill] sm:$0xff] %v10275_v50  ;;  %v6234_v47 = vadd.f32 %v6233_v37, %v6232_v8  ;;  %v10301_v17 = vsub.f32 %v423_v53, %v10275_v50  ;;  %v12692_v53 = vld [vmem:[#allocation43_spill] sm:$0xff]  ;;  %v10365_v19 = vand.u32 4294901760, %v402_v16 }
 0x22c   : > { %6690 = vmatpush3.msra.mxu0 %v12663_v33  ;;  %6726 = vmatpush3.msra.mxu1 %v12664_v42  ;;  %12674 = vst [vmem:[#allocation20_spill] sm:$0xff] %v10298_v9  ;;  %12689 = vst [vmem:[#allocation23_spill] sm:$0xff] %v10331_v34  ;;  %v11849_v33 = vand.u32 4294901760, %v10315_v24  ;;  %v12697_v37 = vld [vmem:[#allocation55_spill] sm:$0xff] }
 0x22d   : > { %4216 = vmatmul.mubr.f32.gmra.mxu1 %v12665_v40  ;;  %6691 = vmatprep.subr.mxu0 %v12666_v18  ;;  %v10287_v45 = vadd.f32 %v6234_v47, %v2358_v6  ;;  %v12683_v6 = vld [vmem:[#allocation32_spill] sm:$0xff]  ;;  %v11852_v31 = vand.u32 4294901760, %v10301_v17  ;;  %12690 = vst [vmem:[#allocation13_spill] sm:$0xff] %v10333_v60  ;;  %v12698_v40 = vand.u32 4294901760, %v12697_v37  ;;  %v10350_v18 = vand.u32 4294901760, %v419_v55  ;;  %12702 = vst [vmem:[#allocation25_spill] sm:$0xff] %v10365_v19 }
 0x22e   : > { %6727 = vmatprep.subr.mxu1 %v12621_v54  ;;  %6692 = vmatpush3.msra.mxu0 %v12669_v51  ;;  %v405_v54 = vld [vmem:[#allocation6 + $0x468] sm:$0xff]  ;;  %v12716_v37 = vld [vmem:[#allocation24_spill] sm:$0xff] }
 0x22f   : > { %6728 = vmatpush3.msra.mxu1 %v12622_v21  ;;  %6693 = vmatprep.subr.mxu0 %v12670_v3  ;;  %v10296_v21 = vsub.f32 %v407_v25, %v10277_v52  ;;  %v10312_v38 = vand.u32 4294901760, %v405_v54  ;;  %v12693_v25 = vand.u32 4294901760, %v12692_v53  ;;  %12699 = vst [vmem:[#allocation44_spill] sm:$0xff] %v10350_v18  ;;  %v10358_v51 = vsub.f32 %v10301_v17, %v11852_v31  ;;  %v418_v3 = vld [vmem:[#allocation6 + $0x4d0] sm:$0xff] }
 0x230   : > { %6729 = vmatprep.subr.mxu1 %v12623_v12  ;;  %4223 = vmatprep.mubr.f32.mxu1 %v12672_v36  ;;  %v12676_v12 = vand.u32 4294901760, %v9860_v56  ;;  %v403_v56 = vld [vmem:[#allocation6 + $0x458] sm:$0xff] }
 0x231   : > { %6694 = vmatpush3.msra.mxu0 %v12673_v59  ;;  %6730 = vmatpush3.msra.mxu1 %v12625_v7  ;;  %v12679_v7 = vand.u32 4294901760, %v9828_v29  ;;  %12680 = vst [vmem:[#allocation22_spill] sm:$0xff] %v10312_v38  ;;  %v10324_v29 = vsub.f32 %v406_v30, %v10298_v9  ;;  %v11850_v1 = vand.u32 4294901760, %v10296_v21  ;;  %v10342_v8 = vsub.f32 %v405_v54, %v10312_v38  ;;  %v417_v54 = vld [vmem:[#allocation6 + $0x4c8] sm:$0xff] }
 0x232   : > { %4227 = vmatmul.mubr.f32.gmra.mxu1 %v12675_v15  ;;  %6695 = vmatprep.subr.mxu0 %v12676_v12  ;;  %v10344_v41 = vand.u32 4294901760, %v403_v56  ;;  %v12703_v59 = vand.u32 4294901760, %v10011_v10  ;;  %v10372_v15 = vsub.f32 %v404_v57, %v10333_v60  ;;  %v11847_v12 = vand.u32 4294901760, %v10336_v13  ;;  %v401_v10 = vld [vmem:[#allocation6 + $0x448] sm:$0xff] }
 0x233   : > { %6731 = vmatprep.subr.mxu1 %v12678_v22  ;;  %6696 = vmatpush3.msra.mxu0 %v12679_v7  ;;  %12685 = vst [vmem:[#allocation51_spill] sm:$0xff] %v10324_v29  ;;  %12694 = vst [vmem:[#allocation39_spill] sm:$0xff] %v10342_v8  ;;  %v10363_v30 = vsub.f32 %v10296_v21, %v11850_v1  ;;  %v11848_v36 = vand.u32 4294901760, %v10324_v29  ;;  %v10376_v22 = vsub.f32 %v420_v39, %v10331_v34  ;;  %v12711_v39 = vld [vmem:[#allocation67_spill] sm:$0xff] }
 0x234   : > { %6732 = vmatpush3.msra.mxu1 %v12627_v0  ;;  %6697 = vmatprep.subr.mxu0 %v12682_v46  ;;  %v12687_v0 = vld [vmem:[#allocation66_spill] sm:$0xff]  ;;  %12695 = vst [vmem:[#allocation33_spill] sm:$0xff] %v10344_v41  ;;  %v6267_v42 = vpop.f32.mrf.mxu0  ;;  %12704 = vst [vmem:[#allocation36_spill] sm:$0xff] %v10372_v15  ;;  %v12707_v46 = vld [vmem:[#allocation52_spill] sm:$0xff]  ;;  %v11851_v57 = vand.u32 4294901760, %v10342_v8  ;;  %v10395_v53 = vand.u32 4294901760, %v417_v54 }
 0x235   : > { %6733 = vmatprep.subr.mxu1 %v12683_v6  ;;  %6698 = vmatpush3.msra.mxu0 %v12684_v48  ;;  %v12688_v5 = vand.u32 4294901760, %v12687_v0  ;;  %12705 = vst [vmem:[#allocation30_spill] sm:$0xff] %v10376_v22  ;;  %v12708_v6 = vand.u32 4294901760, %v12707_v46  ;;  %v10382_v48 = vsub.f32 %v403_v56, %v10344_v41  ;;  %v12712_v0 = vand.u32 4294901760, %v12711_v39  ;;  %v399_v1 = vld [vmem:[#allocation6 + $0x438] sm:$0xff] }
 0x236   : > { %6734 = vmatpush3.msra.mxu1 %v12686_v14  ;;  %v12710_v14 = vld [vmem:[#allocation15_spill] sm:$0xff]  ;;  %12714 = vst [vmem:[#allocation14_spill] sm:$0xff] %v10395_v53  ;;  %v10398_v56 = vsub.f32 %v419_v55, %v10350_v18  ;;  %v10414_v55 = vsub.f32 %v10324_v29, %v11848_v36  ;;  %v10423_v46 = vand.u32 4294901760, %v401_v10 }
 0x237   : > { %6699 = vmatprep.subr.mxu0 %v12688_v5  ;;  %6735 = vmatprep.subr.mxu1 %v12630_v4  ;;  %v12700_v4 = vld [vmem:[#allocation64_spill] sm:$0xff]  ;;  %12709 = vst [vmem:[#allocation59_spill] sm:$0xff] %v10382_v48  ;;  %v10393_v5 = vand.u32 4294901760, %v418_v3 }
 0x238   : > { %6700 = vmatpush3.msra.mxu0 %v12693_v25  ;;  %6736 = vmatpush3.msra.mxu1 %v12696_v58  ;;  %v12701_v47 = vand.u32 4294901760, %v12700_v4  ;;  %v400_v25 = vld [vmem:[#allocation6 + $0x440] sm:$0xff]  ;;  %12715 = vst [vmem:[#allocation29_spill] sm:$0xff] %v10398_v56 }
 0x239   : > { %6701 = vmatprep.subr.mxu0 %v12698_v40  ;;  %6737 = vmatprep.subr.mxu1 %v9739_v11  ;;  %v6268_v11 = vpop.f32.mrf.mxu0  ;;  %12713 = vst [vmem:[#allocation42_spill] sm:$0xff] %v10393_v5  ;;  %v12717_v40 = vld [vmem:[#allocation65_spill] sm:$0xff] }
 0x23a   : > { %6702 = vmatpush3.msra.mxu0 %v12701_v47  ;;  %6738 = vmatpush3.msra.mxu1 %v12632_v44  ;;  %v6269_v7 = vadd.f32 %v6268_v11, %v6267_v42  ;;  %v10387_v44 = vsub.f32 %v10315_v24, %v11849_v33  ;;  %v12718_v4 = vand.u32 4294901760, %v12717_v40  ;;  %v10432_v40 = vsub.f32 %v10342_v8, %v11851_v57 }
 0x23b   : > { %6703 = vmatprep.subr.mxu0 %v12703_v59  ;;  %6739 = vmatprep.subr.mxu1 %v12706_v43  ;;  %v6270_v58 = vpop.f32.mrf.mxu0  ;;  %v10409_v59 = vsub.f32 %v402_v16, %v10365_v19  ;;  %v10421_v43 = vsub.f32 %v10336_v13, %v11847_v12  ;;  %v11853_v16 = vand.u32 4294901760, %v10376_v22  ;;  %v11864_v33 = vand.u32 4294901760, %v10398_v56 }
 0x23c   : > { %6704 = vmatpush3.msra.mxu0 %v12708_v6  ;;  %6740 = vmatpush3.msra.mxu1 %v12710_v14  ;;  %v10401_v42 = vadd.f32 %v6269_v7, %v10220_v2  ;;  %v12720_v2 = vld [vmem:[#allocation45_spill] sm:$0xff]  ;;  %v12721_v7 = vld [vmem:[#allocation40_spill] sm:$0xff]  ;;  %v11854_v14 = vand.u32 4294901760, %v10372_v15  ;;  %v10445_v57 = vsub.f32 %v417_v54, %v10395_v53  ;;  %v10460_v11 = vsub.f32 %v401_v10, %v10423_v46  ;;  %v398_v54 = vld [vmem:[#allocation6 + $0x430] sm:$0xff] }
 0x23d   : > { %6705 = vmatprep.subr.mxu0 %v12712_v0  ;;  %6741 = vmatprep.subr.mxu1 %v12716_v37  ;;  %12719 = vst [vmem:[#allocation18_spill] sm:$0xff] %v10409_v59  ;;  %v416_v6 = vld [vmem:[#allocation6 + $0x4c0] sm:$0xff]  ;;  %v6271_v39 = vpop.f32.mrf.mxu0  ;;  %v12723_v37 = vld [vmem:[#allocation37_spill] sm:$0xff]  ;;  %v10478_v47 = vand.u32 4294901760, %v399_v1  ;;  %v12760_v8 = vand.u32 4294901760, %v10421_v43  ;;  %v12763_v29 = vand.u32 4294901760, %v10432_v40 }
 0x23e   : > { %6706 = vmatpush3.msra.mxu0 %v12718_v4  ;;  %4393 = vmatprep.mubr.f32.mxu0 %v12720_v2  ;;  %v12722_v0 = vld [vmem:[#allocation28_spill] sm:$0xff]  ;;  %v10434_v4 = vand.u32 4294901760, %v400_v25  ;;  %v6272_v12 = vadd.f32 %v6271_v39, %v6270_v58  ;;  %12726 = vst [vmem:[#allocation50_spill] sm:$0xff] %v10445_v57  ;;  %v10450_v39 = vand.u32 4294901760, %v416_v6  ;;  %12729 = vst [vmem:[#allocation34_spill] sm:$0xff] %v10460_v11 }
 0x23f   : > { %6742 = vmatpush3.msra.mxu1 %v12721_v7  ;;  %4395 = vmatmul.mubr.f32.vlgmr.msra.gmra.mxu0 %v12722_v0  ;;  %v11861_v7 = vand.u32 4294901760, %v10382_v48  ;;  %12731 = vst [vmem:[#allocation62_spill] sm:$0xff] %v10478_v47 }
 0x240   : > { %6743 = vmatprep.subr.mxu1 %v12723_v37  ;;  %12724 = vst [vmem:[#allocation54_spill] sm:$0xff] %v10434_v4  ;;  %6763 = vmatprep.subr.mxu0 %v10275_v50  ;;  %v10442_v37 = vsub.f32 %v418_v3, %v10393_v5  ;;  %12727 = vst [vmem:[#allocation53_spill] sm:$0xff] %v10450_v39  ;;  %v10454_v31 = vadd.f32 %v6272_v12, %v10245_v62  ;;  %v6311_v36 = vpop.f32.mrf.mxu1  ;;  %v12728_v3 = vld [vmem:[#allocation49_spill] sm:$0xff]  ;;  %v415_v12 = vld [vmem:[#allocation6 + $0x4b8] sm:$0xff]  ;;  %v6273_v58 = vpop.f32.mrf.mxu0 }
 0x241   : > { %6744 = vmatpush3.msra.mxu1 %v12639_v35  ;;  %6764 = vmatpush3.msra.mxu0 %v10277_v52  ;;  %v10470_v62 = vsub.f32 %v10372_v15, %v11854_v14  ;;  %v10476_v10 = vsub.f32 %v400_v25, %v10434_v4  ;;  %v12732_v35 = vld [vmem:[#allocation56_spill] sm:$0xff]  ;;  %v10506_v25 = vsub.f32 %v416_v6, %v10450_v39 }
 0x242   : > { %12725 = vst [vmem:[#allocation12_spill] sm:$0xff] %v10442_v37  ;;  %6745 = vmatprep.subr.mxu1 %v12641_v23  ;;  %6765 = vmatprep.subr.mxu0 %v10285_v26  ;;  %v10465_v23 = vsub.f32 %v10376_v22, %v11853_v16  ;;  %v10483_v16 = vsub.f32 %v10382_v48, %v11861_v7  ;;  %v6312_v14 = vpop.f32.mrf.mxu1  ;;  %v6274_v26 = vpop.f32.mrf.mxu0  ;;  %v10496_v7 = vand.u32 4294901760, %v415_v12  ;;  %v10498_v48 = vld [vmem:[#allocation6 + $0x4b0] sm:$0xff]  ;;  %v232_v15 = vld [vmem:[%s7362_s6 + $0x40] sm:$0xff] }
 0x243   : > { %4400 = vmatprep.mubr.f32.mxu0 %v12728_v3  ;;  %6746 = vmatpush3.msra.mxu1 %v12643_v61  ;;  %12730 = vst [vmem:[#allocation35_spill] sm:$0xff] %v10476_v10  ;;  %v10490_v61 = vsub.f32 %v10398_v56, %v11864_v33  ;;  %v6313_v52 = vadd.f32 %v6312_v14, %v6311_v36  ;;  %12735 = vst [vmem:[#allocation61_spill] sm:$0xff] %v10506_v25  ;;  %v397_v36 = vld [vmem:[#allocation6 + $0x428] sm:$0xff]  ;;  %v10575_v56 = vld [vmem:[#allocation6 + $0x498] sm:$0xff] }
 0x244   : > { %6766 = vmatpush3.msra.mxu0 %v10298_v9  ;;  %6747 = vmatprep.subr.mxu1 %v12645_v20  ;;  %12733 = vst [vmem:[#allocation26_spill] sm:$0xff] %v10496_v7  ;;  %v12734_v20 = vand.u32 4294901760, %v10409_v59  ;;  %v6275_v50 = vadd.f32 %v6274_v26, %v6273_v58  ;;  %v10519_v6 = vsub.f32 %v399_v1, %v10478_v47  ;;  %v10522_v58 = vand.u32 4294901760, %v398_v54 }
 0x245   : > { %4402 = vmatmul.mubr.f32.gmra.mxu0 %v12732_v35  ;;  %6767 = vmatprep.subr.mxu0 %v10307_v27  ;;  %v10514_v9 = vadd.f32 %v6313_v52, %v10401_v42  ;;  %v10533_v1 = vand.u32 4294901760, %v10498_v48  ;;  %v12740_v42 = vand.u32 4294901760, %v10442_v37  ;;  %v10553_v27 = vsub.f32 %v415_v12, %v10496_v7 }
 0x246   : > { %6748 = vmatpush3.msra.mxu1 %v9923_v63  ;;  %v10503_v33 = vsub.f32 %v10409_v59, %v12734_v20  ;;  %6768 = vmatpush3.msra.mxu0 %v10312_v38  ;;  %v12736_v20 = vld [vmem:[#allocation63_spill] sm:$0xff]  ;;  %12737 = vst [vmem:[#allocation58_spill] sm:$0xff] %v10519_v6  ;;  %12738 = vst [vmem:[#allocation17_spill] sm:$0xff] %v10522_v58  ;;  %v10527_v63 = vadd.f32 %v6275_v50, %v10263_v28  ;;  %v6276_v14 = vpop.f32.mrf.mxu0  ;;  %v396_v50 = vld [vmem:[#allocation6 + $0x420] sm:$0xff]  ;;  %v6314_v38 = vpop.f32.mrf.mxu1  ;;  %v12746_v12 = vand.u32 4294901760, %v10358_v51 }
 0x247   : > { %6749 = vmatprep.subr.mxu1 %v12648_v49  ;;  %6769 = vmatprep.subr.mxu0 %v10331_v34  ;;  %v10524_v49 = vld [vmem:[#allocation6 + $0x4a8] sm:$0xff]  ;;  %12739 = vst [vmem:[#allocation60_spill] sm:$0xff] %v10533_v1  ;;  %v10538_v26 = vsub.f32 %v10442_v37, %v12740_v42  ;;  %v12741_v34 = vand.u32 4294901760, %v10445_v57  ;;  %v10571_v37 = vsub.f32 %v398_v54, %v10522_v58 }
 0x248   : > { %4407 = vmatprep.mubr.f32.mxu0 %v12736_v20  ;;  %6750 = vmatpush3.msra.mxu1 %v9958_v32  ;;  %v6277_v59 = vpop.f32.mrf.mxu0  ;;  %v12745_v32 = vand.u32 4294901760, %v10460_v11  ;;  %v6315_v42 = vpop.f32.mrf.mxu1 }
 0x249   : > { %4518 = vmatprep.mubr.f32.mxu1 %v12720_v2  ;;  %v10543_v28 = vsub.f32 %v10445_v57, %v12741_v34  ;;  %6770 = vmatpush3.msra.mxu0 %v10333_v60  ;;  %v10548_v2 = vld [vmem:[#allocation6 + $0x4a0] sm:$0xff]  ;;  %v10558_v60 = vand.u32 4294901760, %v10524_v49  ;;  %v6278_v52 = vadd.f32 %v6277_v59, %v6276_v14  ;;  %v6316_v22 = vadd.f32 %v6315_v42, %v6314_v38  ;;  %v395_v14 = vld [vmem:[#allocation6 + $0x418] sm:$0xff] }
 0x24a   : > { %4520 = vmatmul.mubr.f32.vlgmr.msra.gmra.mxu1 %v12722_v0  ;;  %v12742_v34 = vld [vmem:[#allocation68_spill] sm:$0xff]  ;;  %6771 = vmatprep.subr.mxu0 %v10350_v18  ;;  %v10560_v0 = vand.u32 4294901760, %v397_v36  ;;  %v10565_v57 = vsub.f32 %v10460_v11, %v12745_v32  ;;  %v10573_v18 = vand.u32 4294901760, %v396_v50  ;;  %v12748_v32 = vand.u32 4294901760, %v10363_v30  ;;  %v12750_v30 = vld [vmem:[#allocation69_spill] sm:$0xff] }
 0x24b   : > { %4409 = vmatmul.mubr.f32.gmra.mxu0 %v12742_v34  ;;  %12743 = vst [vmem:[#allocation38_spill] sm:$0xff] %v10558_v60  ;;  %6807 = vmatprep.subr.mxu1 %v12746_v12  ;;  %v10584_v54 = vand.u32 4294901760, %v10548_v2  ;;  %v394_v12 = vld [vmem:[#allocation6 + $0x410] sm:$0xff]  ;;  %v12749_v38 = vand.u32 4294901760, %v10387_v44  ;;  %v12751_v42 = vand.u32 4294901760, %v10506_v25  ;;  %v12752_v59 = vand.u32 4294901760, %v10476_v10 }
 0x24c   : > { %12744 = vst [vmem:[#allocation47_spill] sm:$0xff] %v10560_v0  ;;  %6772 = vmatpush3.msra.mxu0 %v10344_v41  ;;  %12747 = vst [vmem:[#allocation31_spill] sm:$0xff] %v10573_v18  ;;  %6808 = vmatpush3.msra.mxu1 %v12748_v32  ;;  %v10587_v41 = vadd.f32 %v6278_v52, %v10287_v45  ;;  %v10605_v45 = vadd.f32 %v6316_v22, %v10454_v31  ;;  %v6317_v44 = vpop.f32.mrf.mxu1  ;;  %v12754_v31 = vand.u32 4294901760, %v10414_v55  ;;  %v12755_v22 = vld [vmem:[#allocation70_spill] sm:$0xff] }
 0x24d   : > { %6773 = vmatprep.subr.mxu0 %v10393_v5  ;;  %6809 = vmatprep.subr.mxu1 %v12749_v38  ;;  %v10595_v32 = vsub.f32 %v10506_v25, %v12751_v42  ;;  %v10600_v51 = vsub.f32 %v10476_v10, %v12752_v59  ;;  %v233_v5 = vld [vmem:[%s7362_s6 + $0x48] sm:$0xff]  ;;  %v10610_v52 = vsub.f32 %v397_v36, %v10560_v0  ;;  %v10614_v42 = vand.u32 4294901760, %v10575_v56  ;;  %v10634_v10 = vld [vmem:[#allocation6 + $0x490] sm:$0xff] }
 0x24e   : > { %4414 = vmatprep.mubr.f32.mxu0 %v12750_v30  ;;  %4525 = vmatprep.mubr.f32.mxu1 %v12728_v3  ;;  %v10618_v59 = vsub.f32 %v10498_v48, %v10533_v1  ;;  %v10625_v3 = vsub.f32 %v396_v50, %v10573_v18  ;;  %v10627_v36 = vand.u32 4294901760, %v395_v14  ;;  %v12757_v38 = vand.u32 4294901760, %v10519_v6  ;;  %v393_v25 = vld [vmem:[#allocation6 + $0x408] sm:$0xff]  ;;  %v6318_v11 = vpop.f32.mrf.mxu1 }
 0x24f   : > { %6774 = vmatpush3.msra.mxu0 %v10365_v19  ;;  %12753 = vst [vmem:[#allocation32_spill] sm:$0xff] %v10614_v42  ;;  %6810 = vmatpush3.msra.mxu1 %v12754_v31  ;;  %v10636_v48 = vand.u32 4294901760, %v394_v12  ;;  %v10641_v50 = vld [vmem:[#allocation6 + $0x488] sm:$0xff]  ;;  %v10645_v31 = vsub.f32 %v10524_v49, %v10558_v60  ;;  %v12761_v55 = vand.u32 4294901760, %v10553_v27  ;;  %v10659_v49 = vand.u32 4294901760, %v232_v15 }
 0x250   : > { %4416 = vmatmul.mubr.f32.gmra.mxu0 %v12755_v22  ;;  %12756 = vst [vmem:[#allocation16_spill] sm:$0xff] %v10627_v36  ;;  %v10632_v19 = vsub.f32 %v10519_v6, %v12757_v38  ;;  %4527 = vmatmul.mubr.f32.gmra.mxu1 %v12732_v35  ;;  %v10647_v38 = vand.u32 4294901760, %v233_v5  ;;  %v6319_v6 = vadd.f32 %v6318_v11, %v6317_v44  ;;  %v10668_v43 = vand.u32 4294901760, %v393_v25 }
 0x251   : > { %12758 = vst [vmem:[#allocation66_spill] sm:$0xff] %v10636_v48  ;;  %6775 = vmatprep.subr.mxu0 %v10395_v53  ;;  %6811 = vmatprep.subr.mxu1 %v12760_v8  ;;  %v10657_v13 = vsub.f32 %v10553_v27, %v12761_v55  ;;  %12762 = vst [vmem:[#allocation57_spill] sm:$0xff] %v10659_v49  ;;  %v10665_v8 = vand.u32 4294901760, %v10634_v10  ;;  %v6320_v53 = vpop.f32.mrf.mxu1  ;;  %v12764_v55 = vand.u32 4294901760, %v10465_v23  ;;  %v10683_v35 = vand.u32 4294901760, %v10641_v50 }
 0x252   : > { %12759 = vst [vmem:[#allocation43_spill] sm:$0xff] %v10647_v38  ;;  %6776 = vmatpush3.msra.mxu0 %v10423_v46  ;;  %6812 = vmatpush3.msra.mxu1 %v12763_v29  ;;  %v10671_v44 = vadd.f32 %v6319_v6, %v10527_v63  ;;  %v10677_v29 = vsub.f32 %v395_v14, %v10627_v36  ;;  %v243_v6 = vld [vmem:[%s7362_s6 + $0x98] sm:$0xff]  ;;  %v12769_v23 = vand.u32 4294901760, %v10470_v62  ;;  %v12770_v14 = vand.u32 4294901760, %v10571_v37 }
 0x253   : > { %6777 = vmatprep.subr.mxu0 %v10450_v39  ;;  %6813 = vmatprep.subr.mxu1 %v12764_v55  ;;  %v10680_v40 = vsub.f32 %v394_v12, %v10636_v48  ;;  %12767 = vst [vmem:[#allocation21_spill] sm:$0xff] %v10683_v35  ;;  %v10687_v63 = vsub.f32 %v10548_v2, %v10584_v54  ;;  %v6321_v2 = vpop.f32.mrf.mxu1  ;;  %v12773_v55 = vand.u32 4294901760, %v10490_v61 }
 0x254   : > { %4532 = vmatprep.mubr.f32.mxu1 %v12736_v20  ;;  %12765 = vst [vmem:[#allocation55_spill] sm:$0xff] %v10677_v29  ;;  %6778 = vmatpush3.msra.mxu0 %v10434_v4  ;;  %v10697_v12 = vsub.f32 %v10571_v37, %v12770_v14  ;;  %v10701_v11 = vsub.f32 %v233_v5, %v10647_v38  ;;  %v408_v20 = vld [vmem:[#allocation6 + $0x480] sm:$0xff]  ;;  %v242_v14 = vld [vmem:[%s7362_s6 + $0x90] sm:$0xff]  ;;  %v12774_v5 = vand.u32 4294901760, %v10618_v59 }
 0x255   : > { %12766 = vst [vmem:[#allocation64_spill] sm:$0xff] %v10680_v40  ;;  %12768 = vst [vmem:[#allocation52_spill] sm:$0xff] %v10687_v63  ;;  %6814 = vmatpush3.msra.mxu1 %v12769_v23  ;;  %6779 = vmatprep.subr.mxu0 %v10496_v7  ;;  %v10708_v4 = vsub.f32 %v232_v15, %v10659_v49  ;;  %v6322_v39 = vadd.f32 %v6321_v2, %v6320_v53  ;;  %v392_v23 = vld [vmem:[#allocation6 + $0x400] sm:$0xff]  ;;  %v10723_v7 = vand.u32 4294901760, %v243_v6 }
 0x256   : > { %12771 = vst [vmem:[#allocation15_spill] sm:$0xff] %v10701_v11  ;;  %4534 = vmatmul.mubr.f32.gmra.mxu1 %v12742_v34  ;;  %6815 = vmatprep.subr.mxu1 %v12773_v55  ;;  %v10717_v34 = vsub.f32 %v10618_v59, %v12774_v5  ;;  %v10720_v62 = vsub.f32 %v393_v25, %v10668_v43  ;;  %v12777_v53 = vand.u32 4294901760, %v10483_v16  ;;  %v12779_v5 = vand.u32 4294901760, %v10538_v26  ;;  %v253_v25 = vld [vmem:[%s7362_s6 + $0xe8] sm:$0xff] }
 0x257   : > { %12772 = vst [vmem:[#allocation67_spill] sm:$0xff] %v10708_v4  ;;  %6780 = vmatpush3.msra.mxu0 %v10478_v47  ;;  %12776 = vst [vmem:[#allocation65_spill] sm:$0xff] %v10723_v7  ;;  %v10731_v55 = vsub.f32 %v10575_v56, %v10614_v42  ;;  %v10735_v2 = vadd.f32 %v6322_v39, %v10587_v41  ;;  %4539 = vmatprep.mubr.f32.mxu1 %v12750_v30  ;;  %v12780_v16 = vand.u32 4294901760, %v10645_v31 }
 0x258   : > { %12775 = vst [vmem:[#allocation24_spill] sm:$0xff] %v10720_v62  ;;  %6816 = vmatpush3.msra.mxu1 %v12777_v53  ;;  %6781 = vmatprep.subr.mxu0 %v10533_v1  ;;  %v10745_v61 = vand.u32 4294901760, %v408_v20  ;;  %v10748_v15 = vand.u32 4294901760, %v242_v14  ;;  %v12783_v41 = vand.u32 4294901760, %v10503_v33  ;;  %v12784_v39 = vand.u32 4294901760, %v10610_v52 }
 0x259   : > { %12778 = vst [vmem:[#allocation45_spill] sm:$0xff] %v10731_v55  ;;  %6817 = vmatprep.subr.mxu1 %v12779_v5  ;;  %v10743_v53 = vsub.f32 %v10645_v31, %v12780_v16  ;;  %6782 = vmatpush3.msra.mxu0 %v10522_v58  ;;  %v10759_v30 = vand.u32 4294901760, %v392_v23  ;;  %v10764_v16 = vsub.f32 %v10634_v10, %v10665_v8  ;;  %v4883_v33 = vand.u32 4294901760, %v10717_v34 }
 0x25a   : > { %12781 = vst [vmem:[#allocation40_spill] sm:$0xff] %v10745_v61  ;;  %12782 = vst [vmem:[#allocation28_spill] sm:$0xff] %v10748_v15  ;;  %6818 = vmatpush3.msra.mxu1 %v12783_v41  ;;  %v10757_v26 = vsub.f32 %v10610_v52, %v12784_v39  ;;  %6783 = vmatprep.subr.mxu0 %v10558_v60  ;;  %v4771_v41 = vand.u32 4294901760, %v10697_v12  ;;  %v12786_v39 = vand.u32 4294901760, %v10625_v3  ;;  %v12787_v5 = vand.u32 4294901760, %v10543_v28 }
 0x25b   : > { %12785 = vst [vmem:[#allocation37_spill] sm:$0xff] %v10764_v16  ;;  %4541 = vmatmul.mubr.f32.gmra.mxu1 %v12755_v22  ;;  %v10776_v58 = vsub.f32 %v243_v6, %v10723_v7  ;;  %6784 = vmatpush3.msra.mxu0 %v10560_v0  ;;  %v12788_v10 = vand.u32 4294901760, %v10687_v63  ;;  %v12789_v34 = vand.u32 4294901760, %v10677_v29  ;;  %v10792_v60 = vand.u32 4294901760, %v253_v25  ;;  %v252_v6 = vld [vmem:[%s7362_s6 + $0xe0] sm:$0xff] }
 0x25c   : > { %v10773_v56 = vsub.f32 %v10625_v3, %v12786_v39  ;;  %6819 = vmatprep.subr.mxu1 %v12787_v5  ;;  %v12791_v28 = vand.u32 4294901760, %v10565_v57  ;;  %6785 = vmatprep.subr.mxu0 %v10584_v54  ;;  %v4890_v5 = vand.u32 4294901760, %v10743_v53  ;;  %v10803_v0 = vsub.f32 %v242_v14, %v10748_v15 }
 0x25d   : > { %v10784_v22 = vsub.f32 %v10687_v63, %v12788_v10  ;;  %v10790_v39 = vsub.f32 %v10677_v29, %v12789_v34  ;;  %12790 = vst [vmem:[#allocation49_spill] sm:$0xff] %v10792_v60  ;;  %v12792_v10 = vand.u32 4294901760, %v10701_v11  ;;  %v10807_v34 = vsub.f32 %v10641_v50, %v10683_v35  ;;  %6786 = vmatpush3.msra.mxu0 %v10573_v18  ;;  %v6355_v14 = vpop.f32.mrf.mxu0 }
 0x25e   : > { %6820 = vmatpush3.msra.mxu1 %v12791_v28  ;;  %v12793_v1 = vand.u32 4294901760, %v10595_v32  ;;  %v4778_v57 = vand.u32 4294901760, %v10757_v26  ;;  %v10814_v53 = vsub.f32 %v392_v23, %v10759_v30  ;;  %v12795_v28 = vand.u32 4294901760, %v10708_v4  ;;  %6787 = vmatprep.subr.mxu0 %v10614_v42  ;;  %v263_v26 = vld [vmem:[%s7362_s6 + $0x138] sm:$0xff] }
 0x25f   : > { %v4645_v12 = vsub.f32 %v10701_v11, %v12792_v10  ;;  %v12796_v11 = vand.u32 4294901760, %v10600_v51  ;;  %v10826_v50 = vsub.f32 %v408_v20, %v10745_v61  ;;  %v10828_v23 = vand.u32 4294901760, %v252_v6  ;;  %6788 = vmatpush3.msra.mxu0 %v10627_v36  ;;  %4928 = vmatprep.mubr.f32.mxu1 %v10647_v38  ;;  %v12835_v38 = vld [vmem:[#allocation23_spill] sm:$0xff] }
 0x260   : > { %6821 = vmatprep.subr.mxu1 %v12793_v1  ;;  %12794 = vst [vmem:[#allocation56_spill] sm:$0xff] %v10814_v53  ;;  %v4651_v10 = vsub.f32 %v10708_v4, %v12795_v28  ;;  %v4785_v1 = vand.u32 4294901760, %v10773_v56  ;;  %v12799_v28 = vand.u32 4294901760, %v10657_v13  ;;  %v4897_v51 = vand.u32 4294901760, %v10784_v22  ;;  %6789 = vmatprep.subr.mxu0 %v10665_v8  ;;  %v262_v4 = vld [vmem:[%s7362_s6 + $0x130] sm:$0xff] }
 0x261   : > { %6822 = vmatpush3.msra.mxu1 %v12796_v11  ;;  %12797 = vst [vmem:[#allocation63_spill] sm:$0xff] %v10826_v50  ;;  %12798 = vst [vmem:[#allocation68_spill] sm:$0xff] %v10828_v23  ;;  %v12800_v11 = vand.u32 4294901760, %v10731_v55  ;;  %v10840_v20 = vsub.f32 %v253_v25, %v10792_v60  ;;  %v12801_v42 = vand.u32 4294901760, %v10632_v19  ;;  %v4646_v13 = vand.u32 4294901760, %v4645_v12  ;;  %6790 = vmatpush3.msra.mxu0 %v10636_v48  ;;  %v6356_v12 = vpop.f32.mrf.mxu0 }
 0x262   : > { %6823 = vmatprep.subr.mxu1 %v12799_v28  ;;  %v4792_v28 = vand.u32 4294901760, %v10790_v39  ;;  %v12802_v25 = vand.u32 4294901760, %v10764_v16  ;;  %6791 = vmatprep.subr.mxu0 %v10683_v35  ;;  %v12804_v39 = vand.u32 4294901760, %v10776_v58  ;;  %v6357_v22 = vadd.f32 %v6356_v12, %v6355_v14 }
 0x263   : > { %v4903_v56 = vsub.f32 %v10731_v55, %v12800_v11  ;;  %6824 = vmatpush3.msra.mxu1 %v12801_v42  ;;  %v4652_v11 = vand.u32 4294901760, %v4651_v10  ;;  %v10854_v42 = vand.u32 4294901760, %v263_v26  ;;  %v10862_v10 = vsub.f32 %v252_v6, %v10828_v23  ;;  %6792 = vmatpush3.msra.mxu0 %v10668_v43 }
 0x264   : > { %6825 = vmatprep.subr.mxu1 %v4883_v33  ;;  %v4910_v32 = vsub.f32 %v10764_v16, %v12802_v25  ;;  %v4660_v36 = vsub.f32 %v10776_v58, %v12804_v39  ;;  %v12806_v19 = vand.u32 4294901760, %v10680_v40  ;;  %v10869_v48 = vand.u32 4294901760, %v262_v4  ;;  %6793 = vmatprep.subr.mxu0 %v10745_v61 }
 0x265   : > { %12803 = vst [vmem:[#allocation69_spill] sm:$0xff] %v10854_v42  ;;  %6826 = vmatpush3.msra.mxu1 %v4771_v41  ;;  %12805 = vst [vmem:[#allocation70_spill] sm:$0xff] %v10862_v10  ;;  %v4904_v25 = vand.u32 4294901760, %v4903_v56  ;;  %v12808_v39 = vand.u32 4294901760, %v10803_v0  ;;  %v3031_v12 = vadd.f32 %v6357_v22, %v10514_v9  ;;  %6794 = vmatpush3.msra.mxu0 %v10759_v30  ;;  %v12812_v22 = vand.u32 4294901760, %v10840_v20 }
 0x266   : > { %6827 = vmatprep.subr.mxu1 %v4890_v5  ;;  %v4798_v41 = vsub.f32 %v10680_v40, %v12806_v19  ;;  %12807 = vst [vmem:[#allocation71_spill] sm:$0xff] %v10869_v48  ;;  %v12809_v5 = vand.u32 4294901760, %v10807_v34  ;;  %v6358_v19 = vpop.f32.mrf.mxu0  ;;  %v4911_v35 = vand.u32 4294901760, %v4910_v32  ;;  %v10885_v61 = vsub.f32 %v263_v26, %v10854_v42  ;;  %4647 = vmatprep.mubr.f32.mxu0 %v4646_v13 }
 0x267   : > { %6828 = vmatpush3.msra.mxu1 %v4778_v57  ;;  %v4666_v6 = vsub.f32 %v10803_v0, %v12808_v39  ;;  %v12810_v57 = vand.u32 4294901760, %v10720_v62  ;;  %v4661_v39 = vand.u32 4294901760, %v4660_v36  ;;  %4653 = vmatmul.mubr.f32.vlgmr.msra.gmra.mxu0 %v4652_v11  ;;  %v10895_v26 = vsub.f32 %v262_v4, %v10869_v48 }
 0x268   : > { %v4917_v14 = vsub.f32 %v10807_v34, %v12809_v5  ;;  %6829 = vmatprep.subr.mxu1 %v4897_v51  ;;  %v12811_v5 = vand.u32 4294901760, %v10826_v50  ;;  %v6359_v51 = vpop.f32.mrf.mxu0  ;;  %v4799_v32 = vand.u32 4294901760, %v4798_v41  ;;  %6851 = vmatprep.subr.mxu0 %v10301_v17  ;;  %v6399_v4 = vpop.f32.mrf.mxu1 }
 0x269   : > { %v4805_v33 = vsub.f32 %v10720_v62, %v12810_v57  ;;  %6830 = vmatpush3.msra.mxu1 %v4785_v1  ;;  %v4675_v57 = vsub.f32 %v10840_v20, %v12812_v22  ;;  %v6360_v13 = vadd.f32 %v6359_v51, %v6358_v19  ;;  %v4667_v36 = vand.u32 4294901760, %v4666_v6  ;;  %6852 = vmatpush3.msra.mxu0 %v10296_v21  ;;  %v12815_v51 = vld [vmem:[#allocation51_spill] sm:$0xff] }
 0x26a   : > { %v4924_v56 = vsub.f32 %v10826_v50, %v12811_v5  ;;  %6831 = vmatprep.subr.mxu1 %v4904_v25  ;;  %v4918_v1 = vand.u32 4294901760, %v4917_v14  ;;  %v12813_v5 = vand.u32 4294901760, %v10814_v53  ;;  %6853 = vmatprep.subr.mxu0 %v10315_v24  ;;  %v6361_v14 = vpop.f32.mrf.mxu0  ;;  %v12816_v25 = vld [vmem:[#allocation41_spill] sm:$0xff] }
 0x26b   : > { %6832 = vmatpush3.msra.mxu1 %v4792_v28  ;;  %v4806_v11 = vand.u32 4294901760, %v4805_v33  ;;  %v3040_v41 = vadd.f32 %v6360_v13, %v10605_v45  ;;  %4662 = vmatprep.mubr.f32.mxu0 %v4661_v39  ;;  %v12814_v28 = vand.u32 4294901760, %v10862_v10  ;;  %v4676_v22 = vand.u32 4294901760, %v4675_v57  ;;  %v6400_v33 = vpop.f32.mrf.mxu1 }
 0x26c   : > { %v4812_v9 = vsub.f32 %v10814_v53, %v12813_v5  ;;  %6833 = vmatprep.subr.mxu1 %v4911_v35  ;;  %v4925_v19 = vand.u32 4294901760, %v4924_v56  ;;  %6854 = vmatpush3.msra.mxu0 %v12815_v51  ;;  %v6362_v13 = vpop.f32.mrf.mxu0  ;;  %v6401_v5 = vadd.f32 %v6400_v33, %v6399_v4  ;;  %v12817_v56 = vand.u32 4294901760, %v10885_v61  ;;  %v12819_v35 = vld [vmem:[#allocation30_spill] sm:$0xff] }
 0x26d   : > { %v4681_v6 = vsub.f32 %v10862_v10, %v12814_v28  ;;  %6834 = vmatpush3.msra.mxu1 %v4799_v32  ;;  %4668 = vmatmul.mubr.f32.gmra.mxu0 %v4667_v36  ;;  %v6363_v28 = vadd.f32 %v6362_v13, %v6361_v14  ;;  %v12818_v32 = vld [vmem:[#allocation39_spill] sm:$0xff]  ;;  %v12821_v14 = vld [vmem:[#allocation36_spill] sm:$0xff] }
 0x26e   : > { %6835 = vmatprep.subr.mxu1 %v4918_v1  ;;  %v4813_v45 = vand.u32 4294901760, %v4812_v9  ;;  %6855 = vmatprep.subr.mxu0 %v12816_v25  ;;  %v4690_v39 = vsub.f32 %v10885_v61, %v12817_v56  ;;  %v10915_v10 = vadd.f32 %v6401_v5, %v3031_v12  ;;  %v12820_v9 = vand.u32 4294901760, %v10895_v26  ;;  %v6402_v4 = vpop.f32.mrf.mxu1  ;;  %v12823_v13 = vld [vmem:[#allocation48_spill] sm:$0xff]  ;;  %v12824_v5 = vld [vmem:[#allocation59_spill] sm:$0xff] }
 0x26f   : > { %6836 = vmatpush3.msra.mxu1 %v4806_v11  ;;  %6856 = vmatpush3.msra.mxu0 %v12818_v32  ;;  %v4682_v57 = vand.u32 4294901760, %v4681_v6  ;;  %v3049_v1 = vadd.f32 %v6363_v28, %v10671_v44  ;;  %v6364_v11 = vpop.f32.mrf.mxu0  ;;  %v12822_v6 = vld [vmem:[#allocation29_spill] sm:$0xff]  ;;  %v12825_v56 = vld [vmem:[#allocation27_spill] sm:$0xff]  ;;  %v12826_v28 = vld [vmem:[#allocation12_spill] sm:$0xff] }
 0x270   : > { %6837 = vmatprep.subr.mxu1 %v4925_v19  ;;  %6857 = vmatprep.subr.mxu0 %v12819_v35  ;;  %v4696_v36 = vsub.f32 %v10895_v26, %v12820_v9  ;;  %v4691_v12 = vand.u32 4294901760, %v4690_v39  ;;  %v6403_v33 = vpop.f32.mrf.mxu1 }
 0x271   : > { %4677 = vmatprep.mubr.f32.mxu0 %v4676_v22  ;;  %6838 = vmatpush3.msra.mxu1 %v4813_v45  ;;  %v6365_v19 = vpop.f32.mrf.mxu0  ;;  %v6404_v45 = vadd.f32 %v6403_v33, %v6402_v4  ;;  %v12830_v4 = vld [vmem:[#allocation50_spill] sm:$0xff] }
 0x272   : > { %6858 = vmatpush3.msra.mxu0 %v12821_v14  ;;  %4930 = vmatmul.mubr.f32.vlgmr.msra.gmra.mxu1 %v10659_v49  ;;  %v6366_v22 = vadd.f32 %v6365_v19, %v6364_v11  ;;  %v4697_v44 = vand.u32 4294901760, %v4696_v36  ;;  %v12827_v49 = vld [vmem:[#allocation46_spill] sm:$0xff]  ;;  %v12829_v19 = vld [vmem:[#allocation20_spill] sm:$0xff] }
 0x273   : > { %4683 = vmatmul.mubr.f32.gmra.mxu0 %v4682_v57  ;;  %6859 = vmatprep.subr.mxu0 %v12822_v6  ;;  %v10932_v39 = vadd.f32 %v6404_v45, %v3040_v41  ;;  %v12828_v11 = vld [vmem:[#allocation18_spill] sm:$0xff] }
 0x274   : > { %6895 = vmatprep.subr.mxu1 %v12823_v13  ;;  %6860 = vmatpush3.msra.mxu0 %v12824_v5  ;;  %v3058_v9 = vadd.f32 %v6366_v22, %v10735_v2  ;;  %v6405_v57 = vpop.f32.mrf.mxu1  ;;  %v12831_v2 = vld [vmem:[#allocation19_spill] sm:$0xff]  ;;  %v12832_v22 = vld [vmem:[#allocation34_spill] sm:$0xff] }
 0x275   : > { %6896 = vmatpush3.msra.mxu1 %v12825_v56  ;;  %6861 = vmatprep.subr.mxu0 %v12826_v28  ;;  %v12833_v41 = vld [vmem:[#allocation22_spill] sm:$0xff] }
 0x276   : > { %6897 = vmatprep.subr.mxu1 %v12827_v49  ;;  %4692 = vmatprep.mubr.f32.mxu0 %v4691_v12  ;;  %v6406_v36 = vpop.f32.mrf.mxu1  ;;  %v12834_v12 = vld [vmem:[#allocation61_spill] sm:$0xff] }
 0x277   : > { %4935 = vmatprep.mubr.f32.mxu1 %v10723_v7  ;;  %6862 = vmatpush3.msra.mxu0 %v12828_v11  ;;  %v6407_v33 = vadd.f32 %v6406_v36, %v6405_v57 }
 0x278   : > { %6898 = vmatpush3.msra.mxu1 %v12829_v19  ;;  %4698 = vmatmul.mubr.f32.gmra.mxu0 %v4697_v44  ;;  %v12836_v44 = vld [vmem:[#allocation35_spill] sm:$0xff] }
 0x279   : > { %4937 = vmatmul.mubr.f32.gmra.mxu1 %v10748_v15  ;;  %6863 = vmatprep.subr.mxu0 %v12830_v4  ;;  %v10943_v45 = vadd.f32 %v6407_v33, %v3049_v1  ;;  %v6408_v7 = vpop.f32.mrf.mxu1  ;;  %v12837_v15 = vld [vmem:[#allocation13_spill] sm:$0xff] }
 0x27a   : > { %6899 = vmatprep.subr.mxu1 %v12831_v2  ;;  %6864 = vmatpush3.msra.mxu0 %v12832_v22  ;;  %v12840_v1 = vld [vmem:[#allocation33_spill] sm:$0xff] }
 0x27b   : > { %6900 = vmatpush3.msra.mxu1 %v12833_v41  ;;  %6865 = vmatprep.subr.mxu0 %v12834_v12  ;;  %v6409_v57 = vpop.f32.mrf.mxu1  ;;  %v12838_v41 = vld [vmem:[#allocation44_spill] sm:$0xff]  ;;  %v12839_v12 = vld [vmem:[#allocation58_spill] sm:$0xff] }
 0x27c   : > { %6901 = vmatprep.subr.mxu1 %v12835_v38  ;;  %4942 = vmatprep.mubr.f32.mxu1 %v10792_v60  ;;  %v6410_v36 = vadd.f32 %v6409_v57, %v6408_v7  ;;  %v12841_v60 = vld [vmem:[#allocation42_spill] sm:$0xff] }
 0x27d   : > { %6866 = vmatpush3.msra.mxu0 %v12836_v44  ;;  %6902 = vmatpush3.msra.mxu1 %v12837_v15  ;;  %v12843_v7 = vld [vmem:[#allocation14_spill] sm:$0xff] }
 0x27e   : > { %4944 = vmatmul.mubr.f32.gmra.mxu1 %v10828_v23  ;;  %6867 = vmatprep.subr.mxu0 %v10553_v27  ;;  %v10955_v33 = vadd.f32 %v6410_v36, %v3058_v9  ;;  %v12842_v23 = vld [vmem:[#allocation25_spill] sm:$0xff]  ;;  %v12845_v57 = vld [vmem:[#allocation54_spill] sm:$0xff] }
 0x27f   : > { %6903 = vmatprep.subr.mxu1 %v12838_v41  ;;  %6868 = vmatpush3.msra.mxu0 %v12839_v12  ;;  %v12844_v9 = vld [vmem:[#allocation53_spill] sm:$0xff]  ;;  %v12846_v36 = vld [vmem:[#allocation26_spill] sm:$0xff] }
 0x280   : > { %6904 = vmatpush3.msra.mxu1 %v12840_v1  ;;  %6869 = vmatprep.subr.mxu0 %v10618_v59 }
 0x281   : > { %6905 = vmatprep.subr.mxu1 %v12841_v60  ;;  %4949 = vmatprep.mubr.f32.mxu1 %v10854_v42  ;;  %v12847_v42 = vld [vmem:[#allocation60_spill] sm:$0xff] }
 0x282   : > { %6870 = vmatpush3.msra.mxu0 %v10571_v37  ;;  %6906 = vmatpush3.msra.mxu1 %v12842_v23 }
 0x283   : > { %4951 = vmatmul.mubr.f32.gmra.mxu1 %v10869_v48  ;;  %6871 = vmatprep.subr.mxu0 %v10645_v31 }
 0x284   : > { %6907 = vmatprep.subr.mxu1 %v12843_v7  ;;  %6872 = vmatpush3.msra.mxu0 %v10610_v52 }
 0x285   : > { %6908 = vmatpush3.msra.mxu1 %v10423_v46  ;;  %6873 = vmatprep.subr.mxu0 %v10687_v63  ;;  %v6443_v48 = vpop.f32.mrf.mxu0  ;;  %v12848_v63 = vld [vmem:[#allocation17_spill] sm:$0xff] }
 0x286   : > { %6909 = vmatprep.subr.mxu1 %v12844_v9  ;;  %6874 = vmatpush3.msra.mxu0 %v10625_v3 }
 0x287   : > { %6910 = vmatpush3.msra.mxu1 %v12845_v57  ;;  %6875 = vmatprep.subr.mxu0 %v10731_v55  ;;  %v6444_v9 = vpop.f32.mrf.mxu0  ;;  %v12849_v55 = vld [vmem:[#allocation38_spill] sm:$0xff] }
 0x288   : > { %6911 = vmatprep.subr.mxu1 %v12846_v36  ;;  %6876 = vmatpush3.msra.mxu0 %v10677_v29  ;;  %v6445_v57 = vadd.f32 %v6444_v9, %v6443_v48  ;;  %v12850_v29 = vld [vmem:[#allocation47_spill] sm:$0xff] }
 0x289   : > { %6912 = vmatpush3.msra.mxu1 %v10478_v47  ;;  %6877 = vmatprep.subr.mxu0 %v10764_v16  ;;  %v12852_v9 = vld [vmem:[#allocation67_spill] sm:$0xff] }
 0x28a   : > { %6913 = vmatprep.subr.mxu1 %v12847_v42  ;;  %6878 = vmatpush3.msra.mxu0 %v10680_v40  ;;  %v3367_v16 = vadd.f32 %v6445_v57, %v10915_v10  ;;  %v12851_v40 = vld [vmem:[#allocation15_spill] sm:$0xff]  ;;  %v12856_v10 = vand.u32 4294901760, %v10296_v21  ;;  %v12860_v21 = vld [vmem:[#allocation21_spill] sm:$0xff] }
 0x28b   : > { %6914 = vmatpush3.msra.mxu1 %v12848_v63  ;;  %6879 = vmatprep.subr.mxu0 %v10807_v34  ;;  %v6446_v47 = vpop.f32.mrf.mxu0 }
 0x28c   : > { %6915 = vmatprep.subr.mxu1 %v12849_v55  ;;  %6880 = vmatpush3.msra.mxu0 %v10720_v62  ;;  %v12853_v55 = vld [vmem:[#allocation32_spill] sm:$0xff] }
 0x28d   : > { %6916 = vmatpush3.msra.mxu1 %v12850_v29  ;;  %6881 = vmatprep.subr.mxu0 %v10826_v50  ;;  %v6447_v48 = vpop.f32.mrf.mxu0  ;;  %v12854_v29 = vand.u32 4294901760, %v10301_v17  ;;  %v12855_v50 = vld [vmem:[#allocation16_spill] sm:$0xff]  ;;  %v12859_v17 = vand.u32 4294901760, %v12815_v51 }
 0x28e   : > { %6917 = vmatprep.subr.mxu1 %v10584_v54  ;;  %6882 = vmatpush3.msra.mxu0 %v10814_v53  ;;  %v6448_v62 = vadd.f32 %v6447_v48, %v6446_v47  ;;  %v12858_v47 = vld [vmem:[#allocation66_spill] sm:$0xff] }
 0x28f   : > { %5086 = vmatprep.mubr.f32.mxu0 %v12851_v40  ;;  %6918 = vmatpush3.msra.mxu1 %v10573_v18  ;;  %v12857_v18 = vand.u32 4294901760, %v10315_v24 }
 0x290   : > { %5089 = vmatmul.mubr.f32.vlgmr.msra.gmra.mxu0 %v12852_v9  ;;  %6919 = vmatprep.subr.mxu1 %v12853_v55  ;;  %v3374_v57 = vadd.f32 %v6448_v62, %v10932_v39  ;;  %v6487_v53 = vpop.f32.mrf.mxu1  ;;  %v6449_v55 = vpop.f32.mrf.mxu0  ;;  %v12861_v62 = vand.u32 4294901760, %v12816_v25  ;;  %v12863_v39 = vld [vmem:[#allocation40_spill] sm:$0xff]  ;;  %v12865_v25 = vand.u32 4294901760, %v12851_v40  ;;  %v12870_v40 = vand.u32 4294901760, %v12824_v5 }
 0x291   : > { %6939 = vmatprep.subr.mxu0 %v12854_v29  ;;  %6920 = vmatpush3.msra.mxu1 %v12855_v50  ;;  %v12873_v5 = vand.u32 4294901760, %v12828_v11  ;;  %v12878_v11 = vld [vmem:[#allocation61_spill] sm:$0xff] }
 0x292   : > { %6940 = vmatpush3.msra.mxu0 %v12856_v10  ;;  %6921 = vmatprep.subr.mxu1 %v10665_v8  ;;  %v6488_v29 = vpop.f32.mrf.mxu1  ;;  %v6450_v48 = vpop.f32.mrf.mxu0 }
 0x293   : > { %6941 = vmatprep.subr.mxu0 %v12857_v18  ;;  %5095 = vmatprep.mubr.f32.mxu0 %v10776_v58  ;;  %v6489_v10 = vadd.f32 %v6488_v29, %v6487_v53  ;;  %v6451_v24 = vadd.f32 %v6450_v48, %v6449_v55  ;;  %v12862_v18 = vand.u32 4294901760, %v12818_v32  ;;  %v12866_v32 = vand.u32 4294901760, %v12821_v14 }
 0x294   : > { %6922 = vmatpush3.msra.mxu1 %v12858_v47  ;;  %6942 = vmatpush3.msra.mxu0 %v12859_v17  ;;  %v12864_v17 = vand.u32 4294901760, %v12819_v35  ;;  %v12868_v35 = vld [vmem:[#allocation70_spill] sm:$0xff]  ;;  %v12871_v14 = vand.u32 4294901760, %v12826_v28  ;;  %v12874_v28 = vand.u32 4294901760, %v10803_v0 }
 0x295   : > { %5098 = vmatmul.mubr.f32.gmra.mxu0 %v10803_v0  ;;  %6923 = vmatprep.subr.mxu1 %v12860_v21  ;;  %v11011_v51 = vadd.f32 %v6489_v10, %v3367_v16  ;;  %v3381_v53 = vadd.f32 %v6451_v24, %v10943_v45  ;;  %v6490_v55 = vpop.f32.mrf.mxu1  ;;  %v12867_v16 = vand.u32 4294901760, %v12852_v9  ;;  %v12869_v10 = vand.u32 4294901760, %v12822_v6 }
 0x296   : > { %6943 = vmatprep.subr.mxu0 %v12861_v62  ;;  %6924 = vmatpush3.msra.mxu1 %v10668_v43  ;;  %v6452_v29 = vpop.f32.mrf.mxu0  ;;  %v12880_v0 = vand.u32 4294901760, %v10840_v20 }
 0x297   : > { %6944 = vmatpush3.msra.mxu0 %v12862_v18  ;;  %6925 = vmatprep.subr.mxu1 %v12863_v39  ;;  %v6491_v62 = vpop.f32.mrf.mxu1 }
 0x298   : > { %6945 = vmatprep.subr.mxu0 %v12864_v17  ;;  %5104 = vmatprep.mubr.f32.mxu0 %v10840_v20  ;;  %v6453_v48 = vpop.f32.mrf.mxu0  ;;  %v6492_v24 = vadd.f32 %v6491_v62, %v6490_v55  ;;  %v12879_v17 = vand.u32 4294901760, %v12878_v11  ;;  %v12885_v20 = vand.u32 4294901760, %v10618_v59  ;;  %v12890_v59 = vand.u32 4294901760, %v10610_v52  ;;  %v12900_v55 = vld [vmem:[#allocation62_spill] sm:$0xff]  ;;  %v12910_v62 = vld [vmem:[#allocation63_spill] sm:$0xff] }
 0x299   : > { %6926 = vmatpush3.msra.mxu1 %v10759_v30  ;;  %5220 = vmatprep.mubr.f32.mxu1 %v12865_v25  ;;  %v6454_v45 = vadd.f32 %v6453_v48, %v6452_v29  ;;  %v12883_v25 = vand.u32 4294901760, %v10553_v27  ;;  %v12887_v27 = vand.u32 4294901760, %v10571_v37  ;;  %v12893_v37 = vld [vmem:[#allocation53_spill] sm:$0xff]  ;;  %v12905_v48 = vand.u32 4294901760, %v10807_v34 }
 0x29a   : > { %6946 = vmatpush3.msra.mxu0 %v12866_v32  ;;  %5224 = vmatmul.mubr.f32.vlgmr.msra.gmra.mxu1 %v12867_v16  ;;  %v11036_v6 = vadd.f32 %v6492_v24, %v3374_v57  ;;  %v12877_v57 = vld [vmem:[#allocation22_spill] sm:$0xff]  ;;  %v12903_v16 = vld [vmem:[#allocation64_spill] sm:$0xff]  ;;  %v12916_v34 = vld [vmem:[#allocation57_spill] sm:$0xff] }
 0x29b   : > { %5107 = vmatmul.mubr.f32.gmra.mxu0 %v12868_v35  ;;  %6947 = vmatprep.subr.mxu0 %v12869_v10  ;;  %v3388_v9 = vadd.f32 %v6454_v45, %v10955_v33  ;;  %v6493_v18 = vpop.f32.mrf.mxu1  ;;  %v12909_v45 = vld [vmem:[#allocation47_spill] sm:$0xff] }
 0x29c   : > { %6983 = vmatprep.subr.mxu1 %v12823_v13  ;;  %6948 = vmatpush3.msra.mxu0 %v12870_v40  ;;  %v12872_v13 = vand.u32 4294901760, %v10776_v58  ;;  %v12876_v58 = vand.u32 4294901760, %v12832_v22  ;;  %v12882_v22 = vand.u32 4294901760, %v12868_v35  ;;  %v12906_v35 = vld [vmem:[#allocation38_spill] sm:$0xff]  ;;  %v12911_v40 = vand.u32 4294901760, %v12910_v62 }
 0x29d   : > { %6984 = vmatpush3.msra.mxu1 %v12825_v56  ;;  %6949 = vmatprep.subr.mxu0 %v12871_v14  ;;  %v6494_v56 = vpop.f32.mrf.mxu1  ;;  %v12914_v14 = vld [vmem:[#allocation43_spill] sm:$0xff] }
 0x29e   : > { %6985 = vmatprep.subr.mxu1 %v12827_v49  ;;  %5113 = vmatprep.mubr.f32.mxu0 %v10885_v61  ;;  %v12875_v49 = vand.u32 4294901760, %v12830_v4  ;;  %v6495_v33 = vadd.f32 %v6494_v56, %v6493_v18  ;;  %v12881_v4 = vand.u32 4294901760, %v12836_v44  ;;  %v12918_v18 = vld [vmem:[#allocation65_spill] sm:$0xff] }
 0x29f   : > { %5231 = vmatprep.mubr.f32.mxu1 %v12872_v13  ;;  %6950 = vmatpush3.msra.mxu0 %v12873_v5  ;;  %v12920_v13 = vld [vmem:[#allocation49_spill] sm:$0xff] }
 0x2a0   : > { %6986 = vmatpush3.msra.mxu1 %v12829_v19  ;;  %5116 = vmatmul.mubr.f32.gmra.mxu0 %v10895_v26  ;;  %v11054_v19 = vadd.f32 %v6495_v33, %v3381_v53  ;;  %v6496_v29 = vpop.f32.mrf.mxu1 }
 0x2a1   : > { %5235 = vmatmul.mubr.f32.gmra.mxu1 %v12874_v28  ;;  %6951 = vmatprep.subr.mxu0 %v12875_v49 }
 0x2a2   : > { %6987 = vmatprep.subr.mxu1 %v12831_v2  ;;  %6952 = vmatpush3.msra.mxu0 %v12876_v58  ;;  %v6497_v2 = vpop.f32.mrf.mxu1 }
 0x2a3   : > { %6988 = vmatpush3.msra.mxu1 %v12877_v57  ;;  %6953 = vmatprep.subr.mxu0 %v12879_v17  ;;  %v6498_v53 = vadd.f32 %v6497_v2, %v6496_v29 }
 0x2a4   : > { %6989 = vmatprep.subr.mxu1 %v12835_v38  ;;  %5242 = vmatprep.mubr.f32.mxu1 %v12880_v0  ;;  %v12884_v38 = vand.u32 4294901760, %v12839_v12  ;;  %v12889_v12 = vand.u32 4294901760, %v10645_v31 }
 0x2a5   : > { %6954 = vmatpush3.msra.mxu0 %v12881_v4  ;;  %6990 = vmatpush3.msra.mxu1 %v12837_v15  ;;  %v11072_v44 = vadd.f32 %v6498_v53, %v3388_v9  ;;  %v12886_v15 = vand.u32 4294901760, %v10885_v61  ;;  %v12917_v9 = vld [vmem:[#allocation32_spill] sm:$0xff] }
 0x2a6   : > { %5246 = vmatmul.mubr.f32.gmra.mxu1 %v12882_v22  ;;  %6955 = vmatprep.subr.mxu0 %v12883_v25 }
 0x2a7   : > { %6991 = vmatprep.subr.mxu1 %v12838_v41  ;;  %6956 = vmatpush3.msra.mxu0 %v12884_v38  ;;  %v12888_v41 = vand.u32 4294901760, %v10895_v26  ;;  %v12895_v26 = vld [vmem:[#allocation54_spill] sm:$0xff] }
 0x2a8   : > { %6992 = vmatpush3.msra.mxu1 %v12840_v1  ;;  %6957 = vmatprep.subr.mxu0 %v12885_v20  ;;  %v12896_v1 = vld [vmem:[#allocation45_spill] sm:$0xff] }
 0x2a9   : > { %6993 = vmatprep.subr.mxu1 %v12841_v60  ;;  %5253 = vmatprep.mubr.f32.mxu1 %v12886_v15  ;;  %v12891_v60 = vld [vmem:[#allocation52_spill] sm:$0xff]  ;;  %v12897_v31 = vand.u32 4294901760, %v12896_v1 }
 0x2aa   : > { %6958 = vmatpush3.msra.mxu0 %v12887_v27  ;;  %6994 = vmatpush3.msra.mxu1 %v12842_v23  ;;  %v12892_v61 = vand.u32 4294901760, %v12891_v60  ;;  %v12894_v23 = vand.u32 4294901760, %v10625_v3  ;;  %v12904_v3 = vand.u32 4294901760, %v12903_v16 }
 0x2ab   : > { %5257 = vmatmul.mubr.f32.gmra.mxu1 %v12888_v41  ;;  %6959 = vmatprep.subr.mxu0 %v12889_v12 }
 0x2ac   : > { %6995 = vmatprep.subr.mxu1 %v12843_v7  ;;  %6960 = vmatpush3.msra.mxu0 %v12890_v59  ;;  %v12898_v7 = vld [vmem:[#allocation55_spill] sm:$0xff] }
 0x2ad   : > { %6996 = vmatpush3.msra.mxu1 %v10423_v46  ;;  %6961 = vmatprep.subr.mxu0 %v12892_v61  ;;  %v12899_v52 = vand.u32 4294901760, %v12898_v7  ;;  %v12901_v46 = vld [vmem:[#allocation37_spill] sm:$0xff] }
 0x2ae   : > { %6997 = vmatprep.subr.mxu1 %v12893_v37  ;;  %6962 = vmatpush3.msra.mxu0 %v12894_v23  ;;  %v12902_v32 = vand.u32 4294901760, %v12901_v46 }
 0x2af   : > { %6998 = vmatpush3.msra.mxu1 %v12895_v26  ;;  %6963 = vmatprep.subr.mxu0 %v12897_v31 }
 0x2b0   : > { %6999 = vmatprep.subr.mxu1 %v12846_v36  ;;  %6964 = vmatpush3.msra.mxu0 %v12899_v52  ;;  %v12907_v36 = vld [vmem:[#allocation24_spill] sm:$0xff] }
 0x2b1   : > { %7000 = vmatpush3.msra.mxu1 %v12900_v55  ;;  %6965 = vmatprep.subr.mxu0 %v12902_v32  ;;  %v12908_v10 = vand.u32 4294901760, %v12907_v36 }
 0x2b2   : > { %7001 = vmatprep.subr.mxu1 %v12847_v42  ;;  %6966 = vmatpush3.msra.mxu0 %v12904_v3  ;;  %v12912_v42 = vld [vmem:[#allocation56_spill] sm:$0xff] }
 0x2b3   : > { %7002 = vmatpush3.msra.mxu1 %v12848_v63  ;;  %6967 = vmatprep.subr.mxu0 %v12905_v48  ;;  %v12913_v24 = vand.u32 4294901760, %v12912_v42  ;;  %v12915_v63 = vld [vmem:[#allocation31_spill] sm:$0xff] }
 0x2b4   : > { %7003 = vmatprep.subr.mxu1 %v12906_v35  ;;  %6968 = vmatpush3.msra.mxu0 %v12908_v10 }
 0x2b5   : > { %7004 = vmatpush3.msra.mxu1 %v12909_v45  ;;  %6969 = vmatprep.subr.mxu0 %v12911_v40 }
 0x2b6   : > { %7005 = vmatprep.subr.mxu1 %v10584_v54  ;;  %6970 = vmatpush3.msra.mxu0 %v12913_v24  ;;  %v12919_v54 = vld [vmem:[#allocation28_spill] sm:$0xff] }
 0x2b7   : > { %5423 = vmatprep.mubr.f32.mxu0 %v12914_v14  ;;  %7006 = vmatpush3.msra.mxu1 %v12915_v63 }
 0x2b8   : > { %5425 = vmatmul.mubr.f32.vlgmr.msra.gmra.mxu0 %v12916_v34  ;;  %7007 = vmatprep.subr.mxu1 %v12917_v9 }
 0x2b9   : > { %7008 = vmatpush3.msra.mxu1 %v12855_v50  ;;  %5430 = vmatprep.mubr.f32.mxu0 %v12918_v18  ;;  %v12921_v50 = vld [vmem:[#allocation68_spill] sm:$0xff] }
 0x2ba   : > { %7009 = vmatprep.subr.mxu1 %v10665_v8  ;;  %5548 = vmatprep.mubr.f32.mxu1 %v12914_v14  ;;  %v12922_v8 = vld [vmem:[#allocation69_spill] sm:$0xff] }
 0x2bb   : > { %7010 = vmatpush3.msra.mxu1 %v12858_v47  ;;  %v12923_v47 = vld [vmem:[#allocation71_spill] sm:$0xff] }
 0x2bc   : > { %5432 = vmatmul.mubr.f32.gmra.mxu0 %v12919_v54  ;;  %7011 = vmatprep.subr.mxu1 %v12860_v21 }
 0x2bd   : > { %7012 = vmatpush3.msra.mxu1 %v10668_v43  ;;  %5437 = vmatprep.mubr.f32.mxu0 %v12920_v13  ;;  %v11142_v43 = vpop.f32.mrf.mxu0 }
 0x2be   : > { %7013 = vmatprep.subr.mxu1 %v12863_v39  ;;  %v11148_v39 = vpop.f32.mrf.mxu1 }
 0x2bf   : > { %7014 = vmatpush3.msra.mxu1 %v10759_v30  ;;  %v11144_v30 = vpop.f32.mrf.mxu0 }
 0x2c0   : > { %5439 = vmatmul.mubr.f32.gmra.mxu0 %v12921_v50  ;;  %5550 = vmatmul.mubr.f32.vlgmr.msra.gmra.mxu1 %v12916_v34  ;;  %v11152_v56 = vpop.f32.mrf.mxu1 }
 0x2c1   : > { %5444 = vmatprep.mubr.f32.mxu0 %v12922_v8  ;;  %5555 = vmatprep.mubr.f32.mxu1 %v12918_v18  ;;  %v11146_v21 = vpop.f32.mrf.mxu0 }
 0x2c2   : > { %v11156_v49 = vpop.f32.mrf.mxu1 }
 0x2c3   : > { %v11150_v5 = vpop.f32.mrf.mxu0 }
 0x2c4   : > { %5446 = vmatmul.mubr.f32.gmra.mxu0 %v12923_v47  ;;  %5557 = vmatmul.mubr.f32.gmra.mxu1 %v12919_v54  ;;  %v11160_v58 = vpop.f32.mrf.mxu1 }
 0x2c5   : > { %5562 = vmatprep.mubr.f32.mxu1 %v12920_v13  ;;  %v11154_v28 = vpop.f32.mrf.mxu0 }
 0x2c6   : > { %v11164_v11 = vpop.f32.mrf.mxu1 }
 0x2c7   : > { %v11158_v33 = vpop.f32.mrf.mxu0 }
 0x2c8   : > { %5564 = vmatmul.mubr.f32.gmra.mxu1 %v12921_v50  ;;  %v11168_v29 = vpop.f32.mrf.mxu1 }
 0x2c9   : > { %5569 = vmatprep.mubr.f32.mxu1 %v12922_v8  ;;  %v11162_v57 = vpop.f32.mrf.mxu0 }
 0x2ca   : > { %v11172_v4 = vpop.f32.mrf.mxu1 }
 0x2cb   : > { %v11166_v17 = vpop.f32.mrf.mxu0 }
 0x2cc   : > { %5571 = vmatmul.mubr.f32.gmra.mxu1 %v12923_v47  ;;  %v11174_v22 = vpop.f32.mrf.mxu1 }
 0x2d7   : > { %v11170_v0 = vpop.f32.mrf.mxu0 }
 0x2d9   : > { %v6620_v2 = vpop.f32.mrf.mxu0 }
 0x2dc   : > { %v11176_v25 = vpop.f32.mrf.mxu0 }
 0x2de   : > { %v11178_v38 = vpop.f32.mrf.mxu0 }
 0x2e1   : > { %v6663_v53 = vpop.f32.mrf.mxu1 }
 0x2e2   : > { %v11180_v15 = vpop.f32.mrf.mxu0 }
 0x2e3   : > { %v6664_v20 = vpop.f32.mrf.mxu1 }
 0x2e4   : > { %v11184_v41 = vpop.f32.mrf.mxu0 }
 0x2e7   : > { %v11188_v59 = vpop.f32.mrf.mxu0 }
 0x2e8   : > { %v11182_v27 = vpop.f32.mrf.mxu1 }
 0x2e9   : > { %v11192_v61 = vpop.f32.mrf.mxu0 }
 0x2ea   : > { %v11186_v12 = vpop.f32.mrf.mxu1 }
 0x2ed   : > { %v11190_v60 = vpop.f32.mrf.mxu1 }
 0x2ef   : > { %v11194_v37 = vpop.f32.mrf.mxu1 }
 0x2f2   : > { %v11196_v26 = vpop.f32.mrf.mxu1 }
 0x2f3   : > { %12924 = vst [vmem:[#allocation51_spill] sm:$0xff] %v11196_v26  ;;  %v6665_v26 = vadd.f32 %v6664_v20, %v6663_v53  ;;  %v6542_v53 = vadd.f32 %v11166_v17, %v11162_v57  ;;  %v6671_v57 = vadd.f32 %v11194_v37, %v11190_v60 }
 0x2f4   : > { %v11198_v31 = vpop.f32.mrf.mxu1 }
 0x2f5   : > { %12925 = vst [vmem:[#allocation41_spill] sm:$0xff] %v11198_v31 }
 0x2ff   : > { %v6707_v23 = vpop.f32.mrf.mxu0 }
 0x301   : > { %v6708_v1 = vpop.f32.mrf.mxu0 }
 0x305   : > { %v11200_v7 = vpop.f32.mrf.mxu0 }
 0x307   : > { %v11202_v55 = vpop.f32.mrf.mxu0 }
 0x30a   : > { %v6751_v52 = vpop.f32.mrf.mxu1 }
 0x30b   : > { %v11204_v32 = vpop.f32.mrf.mxu0 }
 0x30c   : > { %v6752_v46 = vpop.f32.mrf.mxu1 }
 0x30d   : > { %v11208_v3 = vpop.f32.mrf.mxu0 }
 0x310   : > { %v11206_v16 = vpop.f32.mrf.mxu1  ;;  %v11212_v35 = vpop.f32.mrf.mxu0 }
 0x311   : > { %12926 = vst [vmem:[#allocation39_spill] sm:$0xff] %v11212_v35 }
 0x312   : > { %v11210_v48 = vpop.f32.mrf.mxu1  ;;  %v11216_v10 = vpop.f32.mrf.mxu0 }
 0x313   : > { %12928 = vst [vmem:[#allocation36_spill] sm:$0xff] %v11216_v10 }
 0x316   : > { %v11214_v36 = vpop.f32.mrf.mxu1 }
 0x317   : > { %12927 = vst [vmem:[#allocation30_spill] sm:$0xff] %v11214_v36 }
 0x318   : > { %v11218_v45 = vpop.f32.mrf.mxu1 }
 0x319   : > { %12929 = vst [vmem:[#allocation29_spill] sm:$0xff] %v11218_v45 }
 0x31b   : > { %v11220_v40 = vpop.f32.mrf.mxu1 }
 0x31c   : > { %12930 = vst [vmem:[#allocation48_spill] sm:$0xff] %v11220_v40 }
 0x31d   : > { %v11222_v24 = vpop.f32.mrf.mxu1 }
 0x31e   : > { %12931 = vst [vmem:[#allocation59_spill] sm:$0xff] %v11222_v24 }
 0x327   : > { %v6795_v62 = vpop.f32.mrf.mxu0 }
 0x329   : > { %v6796_v42 = vpop.f32.mrf.mxu0 }
 0x32d   : > { %v11224_v14 = vpop.f32.mrf.mxu0 }
 0x32f   : > { %v11226_v34 = vpop.f32.mrf.mxu0 }
 0x332   : > { %v6839_v63 = vpop.f32.mrf.mxu1 }
 0x333   : > { %v11228_v18 = vpop.f32.mrf.mxu0 }
 0x334   : > { %v6840_v9 = vpop.f32.mrf.mxu1  ;;  %12932 = vst [vmem:[#allocation27_spill] sm:$0xff] %v11228_v18 }
 0x335   : > { %v11232_v13 = vpop.f32.mrf.mxu0 }
 0x336   : > { %12934 = vst [vmem:[#allocation46_spill] sm:$0xff] %v11232_v13 }
 0x338   : > { %v11236_v8 = vpop.f32.mrf.mxu0 }
 0x339   : > { %v11230_v54 = vpop.f32.mrf.mxu1  ;;  %12936 = vst [vmem:[#allocation20_spill] sm:$0xff] %v11236_v8 }
 0x33a   : > { %12933 = vst [vmem:[#allocation12_spill] sm:$0xff] %v11230_v54  ;;  %v11240_v40 = vpop.f32.mrf.mxu0 }
 0x33b   : > { %v11234_v50 = vpop.f32.mrf.mxu1  ;;  %12938 = vst [vmem:[#allocation19_spill] sm:$0xff] %v11240_v40  ;;  %v6533_v40 = vadd.f32 %v11144_v30, %v11142_v43  ;;  %v6539_v43 = vadd.f32 %v11158_v33, %v11154_v28  ;;  %v6753_v28 = vadd.f32 %v6752_v46, %v6751_v52  ;;  %v6715_v52 = vadd.f32 %v11208_v3, %v11204_v32 }
 0x33c   : > { %12935 = vst [vmem:[#allocation18_spill] sm:$0xff] %v11234_v50 }
 0x33d   : > { %v3655_v33 = vadd.f32 %v6539_v43, %v11054_v19  ;;  %v6586_v19 = vadd.f32 %v11174_v22, %v11172_v4  ;;  %v12952_v43 = vld [vmem:[#allocation39_spill] sm:$0xff] }
 0x33e   : > { %v11238_v47 = vpop.f32.mrf.mxu1 }
 0x33f   : > { %12937 = vst [vmem:[#allocation50_spill] sm:$0xff] %v11238_v47 }
 0x340   : > { %v11242_v24 = vpop.f32.mrf.mxu1 }
 0x341   : > { %12939 = vst [vmem:[#allocation34_spill] sm:$0xff] %v11242_v24  ;;  %v6577_v24 = vadd.f32 %v11152_v56, %v11148_v39  ;;  %v12950_v3 = vld [vmem:[#allocation12_spill] sm:$0xff] }
 0x343   : > { %v11244_v35 = vpop.f32.mrf.mxu1 }
 0x344   : > { %12940 = vst [vmem:[#allocation23_spill] sm:$0xff] %v11244_v35 }
 0x345   : > { %v11246_v36 = vpop.f32.mrf.mxu1 }
 0x346   : > { %12941 = vst [vmem:[#allocation35_spill] sm:$0xff] %v11246_v36  ;;  %v3625_v36 = vadd.f32 %v6533_v40, %v11011_v51  ;;  %v12948_v40 = vld [vmem:[#allocation30_spill] sm:$0xff] }
 0x350   : > { %v6883_v10 = vpop.f32.mrf.mxu0 }
 0x352   : > { %v6884_v45 = vpop.f32.mrf.mxu0 }
 0x353   : > { %v6885_v46 = vadd.f32 %v6884_v45, %v6883_v10  ;;  %v12954_v45 = vld [vmem:[#allocation27_spill] sm:$0xff] }
 0x355   : > { %v11248_v18 = vpop.f32.mrf.mxu0 }
 0x356   : > { %12942 = vst [vmem:[#allocation13_spill] sm:$0xff] %v11248_v18  ;;  %v6621_v18 = vadd.f32 %v6620_v2, %v11170_v0  ;;  %v6583_v0 = vadd.f32 %v11168_v29, %v11164_v11  ;;  %v6712_v29 = vadd.f32 %v11202_v55, %v11200_v7  ;;  %v6630_v7 = vadd.f32 %v11192_v61, %v11188_v59 }
 0x357   : > { %v11250_v13 = vpop.f32.mrf.mxu0  ;;  %v6800_v55 = vadd.f32 %v11226_v34, %v11224_v14  ;;  %v12953_v14 = vld [vmem:[#allocation36_spill] sm:$0xff]  ;;  %v12955_v34 = vld [vmem:[#allocation46_spill] sm:$0xff] }
 0x358   : > { %12943 = vst [vmem:[#allocation44_spill] sm:$0xff] %v11250_v13  ;;  %v6536_v13 = vadd.f32 %v11150_v5, %v11146_v21  ;;  %v6624_v21 = vadd.f32 %v11178_v38, %v11176_v25  ;;  %v6709_v5 = vadd.f32 %v6708_v1, %v6707_v23  ;;  %v6797_v23 = vadd.f32 %v6796_v42, %v6795_v62  ;;  %v12949_v42 = vld [vmem:[#allocation29_spill] sm:$0xff] }
 0x359   : > { %v3670_v1 = vadd.f32 %v6542_v53, %v11072_v44  ;;  %v12947_v44 = vld [vmem:[#allocation41_spill] sm:$0xff]  ;;  %v6759_v59 = vadd.f32 %v12949_v42, %v12948_v40  ;;  %v6718_v10 = vadd.f32 %v12953_v14, %v12952_v43  ;;  %v12967_v40 = vld [vmem:[#allocation35_spill] sm:$0xff] }
 0x35a   : > { %v6927_v54 = vpop.f32.mrf.mxu1  ;;  %v3640_v56 = vadd.f32 %v6536_v13, %v11036_v6  ;;  %v6627_v6 = vadd.f32 %v11184_v41, %v11180_v15  ;;  %v6756_v41 = vadd.f32 %v11210_v48, %v11206_v16 }
 0x35b   : > { %v11252_v31 = vpop.f32.mrf.mxu0  ;;  %v3923_v16 = vadd.f32 %v6586_v19, %v3670_v1  ;;  %v12963_v1 = vld [vmem:[#allocation20_spill] sm:$0xff] }
 0x35c   : > { %v6928_v50 = vpop.f32.mrf.mxu1  ;;  %12944 = vst [vmem:[#allocation58_spill] sm:$0xff] %v11252_v31  ;;  %v3902_v31 = vadd.f32 %v6577_v24, %v3625_v36  ;;  %v12946_v36 = vld [vmem:[#allocation51_spill] sm:$0xff] }
 0x35d   : > { %v11260_v35 = vpop.f32.mrf.mxu0  ;;  %v6674_v62 = vadd.f32 %v12947_v44, %v12946_v36  ;;  %v4088_v13 = vadd.f32 %v6630_v7, %v3923_v16 }
 0x35e   : > { %v4061_v51 = vadd.f32 %v6621_v18, %v3902_v31  ;;  %v6929_v18 = vadd.f32 %v6928_v50, %v6927_v54  ;;  %v12958_v54 = vld [vmem:[#allocation48_spill] sm:$0xff]  ;;  %v12959_v50 = vld [vmem:[#allocation59_spill] sm:$0xff] }
 0x360   : > { %v11272_v30 = vpop.f32.mrf.mxu0 }
 0x361   : > { %v11254_v8 = vpop.f32.mrf.mxu1 }
 0x362   : > { %12945 = vst [vmem:[#allocation33_spill] sm:$0xff] %v11254_v8  ;;  %v6580_v8 = vadd.f32 %v11160_v58, %v11156_v49  ;;  %v4196_v49 = vadd.f32 %v6665_v26, %v4061_v51  ;;  %v6668_v58 = vadd.f32 %v11186_v12, %v11182_v27  ;;  %v11288_v20 = vpop.f32.mrf.mxu0  ;;  %v3916_v27 = vadd.f32 %v6583_v0, %v3655_v33 }
 0x363   : > { %v11262_v47 = vpop.f32.mrf.mxu1  ;;  %v6841_v26 = vadd.f32 %v6840_v9, %v6839_v63  ;;  %v12951_v63 = vld [vmem:[#allocation18_spill] sm:$0xff]  ;;  %v4229_v33 = vadd.f32 %v6674_v62, %v4088_v13 }
 0x364   : > { %v3909_v2 = vadd.f32 %v6580_v8, %v3640_v56  ;;  %v4397_v11 = vadd.f32 %v6709_v5, %v4196_v49  ;;  %v4079_v31 = vadd.f32 %v6627_v6, %v3916_v27  ;;  %v6844_v9 = vadd.f32 %v12951_v63, %v12950_v3  ;;  %v12957_v49 = vld [vmem:[#allocation44_spill] sm:$0xff]  ;;  %v12965_v7 = vld [vmem:[#allocation58_spill] sm:$0xff] }
 0x365   : > { %v6803_v56 = vadd.f32 %v12955_v34, %v12954_v45  ;;  %v6762_v6 = vadd.f32 %v12959_v50, %v12958_v54 }
 0x366   : > { %v11274_v39 = vpop.f32.mrf.mxu1  ;;  %v4070_v38 = vadd.f32 %v6624_v21, %v3909_v2  ;;  %v4522_v15 = vadd.f32 %v6753_v28, %v4397_v11  ;;  %v4218_v48 = vadd.f32 %v6671_v57, %v4079_v31  ;;  %v12956_v2 = vld [vmem:[#allocation13_spill] sm:$0xff]  ;;  %v12961_v11 = vld [vmem:[#allocation34_spill] sm:$0xff] }
 0x368   : > { %v11290_v25 = vpop.f32.mrf.mxu1  ;;  %v4207_v12 = vadd.f32 %v6668_v58, %v4070_v38  ;;  %v4655_v37 = vadd.f32 %v6797_v23, %v4522_v15  ;;  %v4411_v8 = vadd.f32 %v6715_v52, %v4218_v48  ;;  %v6888_v58 = vadd.f32 %v12957_v49, %v12956_v2  ;;  %v12960_v38 = vld [vmem:[#allocation50_spill] sm:$0xff] }
 0x369   : > { %v6891_v52 = vadd.f32 %v11260_v35, %v12965_v7 }
 0x36a   : > { %v4404_v60 = vadd.f32 %v6712_v29, %v4207_v12  ;;  %v4932_v32 = vadd.f32 %v6841_v26, %v4655_v37  ;;  %v4536_v53 = vadd.f32 %v6759_v59, %v4411_v8  ;;  %v6847_v29 = vadd.f32 %v12961_v11, %v12960_v38  ;;  %v12962_v12 = vld [vmem:[#allocation33_spill] sm:$0xff] }
 0x36b   : > { %v11305_v4 = vpop.f32.mrf.mxu1  ;;  %v6932_v15 = vadd.f32 %v11262_v47, %v12962_v12  ;;  %v12966_v47 = vld [vmem:[#allocation23_spill] sm:$0xff] }
 0x36c   : > { %v4529_v24 = vadd.f32 %v6756_v41, %v4404_v60  ;;  %v5091_v0 = vadd.f32 %v6885_v46, %v4932_v32  ;;  %v4418_v41 = vadd.f32 %v6718_v10, %v4229_v33  ;;  %v4685_v26 = vadd.f32 %v6803_v56, %v4536_v53 }
 0x36d   : > { %v6937_v51 = vpop.f32.mrf.mxu1  ;;  %v6850_v42 = vadd.f32 %v12967_v40, %v12966_v47 }
 0x36e   : > { %v4670_v5 = vadd.f32 %v6800_v55, %v4529_v24  ;;  %v5226_v57 = vadd.f32 %v6929_v18, %v5091_v0  ;;  %v4543_v48 = vadd.f32 %v6762_v6, %v4418_v41  ;;  %v4946_v36 = vadd.f32 %v6847_v29, %v4685_v26 }
 0x36f   : > { %v6935_v24 = vadd.f32 %v11290_v25, %v11274_v39  ;;  %v6938_v25 = vadd.f32 %v6937_v51, %v11305_v4 }
 0x370   : > { %v4939_v19 = vadd.f32 %v6844_v9, %v4670_v5  ;;  %v5109_v35 = vadd.f32 %v6891_v52, %v4946_v36  ;;  %v6894_v9 = vadd.f32 %v11288_v20, %v11272_v30 }
 0x372   : > { %v5100_v37 = vadd.f32 %v6888_v58, %v4939_v19  ;;  %v5248_v39 = vadd.f32 %v6935_v24, %v5109_v35 }
 0x374   : > { %v5237_v59 = vadd.f32 %v6932_v15, %v5100_v37 }
 0x378   : > { %v6971_v17 = vpop.f32.mrf.mxu0 }
 0x37a   : > { %v6972_v22 = vpop.f32.mrf.mxu0 }
 0x37b   : > { %v6973_v28 = vadd.f32 %v6972_v22, %v6971_v17  ;;  %v12964_v17 = vld [vmem:[#allocation19_spill] sm:$0xff] }
 0x37c   : > { %v6974_v61 = vpop.f32.mrf.mxu0  ;;  %v6806_v31 = vadd.f32 %v12964_v17, %v12963_v1 }
 0x37d   : > { %v5427_v55 = vadd.f32 %v6973_v28, %v5226_v57 }
 0x37e   : > { %v6975_v21 = vpop.f32.mrf.mxu0  ;;  %v4700_v3 = vadd.f32 %v6806_v31, %v4543_v48 }
 0x37f   : > { %v6976_v46 = vadd.f32 %v6975_v21, %v6974_v61 }
 0x380   : > { %v6977_v23 = vpop.f32.mrf.mxu0  ;;  %v7015_v27 = vpop.f32.mrf.mxu1  ;;  %v4953_v14 = vadd.f32 %v6850_v42, %v4700_v3 }
 0x381   : > { %v5434_v61 = vadd.f32 %v6976_v46, %v5237_v59 }
 0x382   : > { %v6978_v22 = vpop.f32.mrf.mxu0  ;;  %v7016_v60 = vpop.f32.mrf.mxu1  ;;  %v5118_v30 = vadd.f32 %v6894_v9, %v4953_v14 }
 0x383   : > { %v7017_v16 = vadd.f32 %v7016_v60, %v7015_v27  ;;  %v6979_v18 = vadd.f32 %v6978_v22, %v6977_v23 }
 0x384   : > { %v6980_v44 = vpop.f32.mrf.mxu0  ;;  %v7018_v62 = vpop.f32.mrf.mxu1  ;;  %v5259_v5 = vadd.f32 %v6938_v25, %v5118_v30 }
 0x385   : > { %v5552_v32 = vadd.f32 %v7017_v16, %v5427_v55  ;;  %v5441_v20 = vadd.f32 %v6979_v18, %v5248_v39 }
 0x386   : > { %v7019_v63 = vpop.f32.mrf.mxu1  ;;  %v6981_v8 = vpop.f32.mrf.mxu0 }
 0x387   : > { %5576 = vst [vmem:[%s11338_s12] sm:$0xff] %v5552_v32  ;;  %v7020_v13 = vadd.f32 %v7019_v63, %v7018_v62  ;;  %v6982_v34 = vadd.f32 %v6981_v8, %v6980_v44 }
 0x388   : > { %v7021_v43 = vpop.f32.mrf.mxu1 }
 0x389   : > { %v5559_v10 = vadd.f32 %v7020_v13, %v5434_v61  ;;  %v5448_v49 = vadd.f32 %v6982_v34, %v5259_v5 }
 0x38a   : > { %v7022_v45 = vpop.f32.mrf.mxu1 }
 0x38b   : > { %5577 = vst [vmem:[%s11338_s12 + $0x8] sm:$0xff] %v5559_v10  ;;  %v7023_v56 = vadd.f32 %v7022_v45, %v7021_v43 }
 0x38c   : > { %v7024_v21 = vpop.f32.mrf.mxu1 }
 0x38d   : > { %v5566_v0 = vadd.f32 %v7023_v56, %v5441_v20 }
 0x38e   : > { %v7025_v2 = vpop.f32.mrf.mxu1 }
 0x38f   : > { %5578 = vst [vmem:[%s11338_s12 + $0x10] sm:$0xff] %v5566_v0  ;;  %v7026_v58 = vadd.f32 %v7025_v2, %v7024_v21  ;;  %5587 = sbr.rel (!%p12968_p4) target bundleno = 943 (0x3af), region = 44 }
 0x391   : > { %v5573_v28 = vadd.f32 %v7026_v58, %v5448_v49 }
 0x393   : > { %5579 = vst [vmem:[%s11338_s12 + $0x18] sm:$0xff] %v5573_v28 }
 0x394   : > { %s12977_s30 = smov (!%p5590_p13, %s5589_s30), 4 }
 0x395   : > { %s11349_s7 = sshll.u32 %s12977_s30, 7 }
 0x396   : > { %s5594_s8 = ssub.s32 512, %s11349_s7 }
 0x397   : > { %5595 = vsyncadd %s5581_s18, %s5594_s8  ;;  %p5700_p5 = scmp.ne.s32.totalorder %s11349_s7, 0  ;;  %s5706_s25 = sshll.u32 %s7261_s2, 9 }
 0x398   : > { %s11359_s11 = scalar_lea.hbm %s11409_s3, %s5706_s25  ;;  %s5600_s13 = sshll.u32 %s11338_s12, 4  ;;  %s11362_s13 = int_to_ptr.vmem [resolvable:$true] %s5600_s13 }
 0x399   : > { %s7138_s20 = scalar_lea.vmem %s11362_s13, %s11349_s7  ;;  %s7214_s21 = smov [#allocation8]  }
 0x39a   : > { %p7139_p0 = scmp.ne.s32.totalorder %s11362_s13, %s7138_s20  ;;  %s7142_s28 = sshll.u32 %s7214_s21, 4  ;;  %s7143_s28 = int_to_ptr.vmem [resolvable:$false] %s7142_s28 }
 0x39b   : > { %s7144_s2 = scalar_lea.vmem %s7143_s28, 1024  ;;  %p7145_p8 = scmp.lt.s32.totalorder %s11362_s13, %s7143_s28 }
 0x39c   : > { %p7140_p7 = pnand %p7139_p0, %p5700_p5  ;;  %p7146_p9 = scmp.lt.s32.totalorder %s7144_s2, %s7138_s20 }
 0x39e   : > { %p7141_p3 = pneg %p7140_p7  ;;  %p7147_p10 = por %p7146_p9, %p7145_p8 }
 0x3a0   : > { %p7148_p6 = pnand %p7147_p10, %p7141_p3 }
 0x3a2   : > { %7151 = shalt.err (!%p7148_p6)
}
 0x3a3   : > { %s7152_s4 = scalar_lea.hbm %s11359_s11, %s11349_s7  ;;  %s7156_s24 = scalar_lea.hbm %s11409_s3, 4224 }
 0x3a4   : > { %p7153_p11 = scmp.ne.s32.totalorder %s11359_s11, %s7152_s4  ;;  %p7157_p1 = scmp.lt.s32.totalorder %s11359_s11, %s11409_s3 }
 0x3a5   : > { %p7158_p4 = scmp.lt.s32.totalorder %s7156_s24, %s7152_s4 }
 0x3a6   : > { %p7154_p12 = pnand %p7153_p11, %p5700_p5 }
 0x3a7   : > { %p7159_p13 = por %p7158_p4, %p7157_p1 }
 0x3a8   : > { %p7155_p2 = pneg %p7154_p12 }
 0x3aa   : > { %p7160_p0 = pnand %p7159_p13, %p7155_p2 }
 0x3ac   : > { %7163 = shalt.err (!%p7160_p0)
}
 0x3ad   : > { %s7215_s23 = smov 128   ;;  %s7216_s30 = smov 8  }
 0x3ae   : > { %5606 = dma.vmem_to_hbm [thread:$0]  (%p5700_p5), %s11362_s13, %s11349_s7, %s11359_s11, %s5581_s18, %s7215_s23, %s7215_s23, %s7216_s30  }
 0x3af PF: > { %p7046_p7 = scmp.ge.s32.totalorder %s7206_s17, 2  ;;  %s5615_s8 = sand.u32 1, %s7194_s14  }
 0x3b0   : > { %p12969_p3 = scmp.ne.s32.totalorder %s11970_s26, 0  ;;  %s5616_s25 = scalar_lea.sflag [#allocation5], %s5615_s8 }
 0x3b2   : > { %p7041_p8 = pnand %p7046_p7, %p12969_p3 }
 0x3b4   : > { %p7042_p9 = pneg %p7041_p8 }
 0x3b6   : > { %7189 = dma.done.wait (%p7042_p9), %s5616_s25, 512  }
 0x3b7   : > { %7191 = vsyncadd (%p7042_p9), %s5616_s25, 4294966784  ;;  %p18_p10 = scmp.ge.s32.totalorder %s7265_s19, 11   ;;  %s12970_s14 = smov %s7198_s15 }
 0x3b8   : > { %s12971_s15 = smov %s7202_s16  ;;  %s12972_s16 = smov %s7277_s22 }
 0x3b9   : > { %s12973_s17 = smov %s7265_s19  ;;  %20 = sbr.rel (!%p18_p10) target bundleno = 8 (0x8), region = 81 }
 0x3be   :  { %5621 = vsyncpa [#allocation4], 1 }
 0x3bf   :  { %5623 = vsyncpa [#allocation4 + $0x1], 1 }
 0x3c0   :  { %5624 = vsyncpa [#allocation7], 1 }
 0x3c1   :  { %5625 = vsyncpa [#allocation5], 1 }
 0x3c2   :  { %5627 = vsyncpa [#allocation5 + $0x1], 1 }

</bundles_post_ra>
